<compile_context>
chip_gen: v7x
topology: tpu7x:2x2x1
jax: 0.10.0
libtpu: 0.0.40
codegen_flags: <defaults>
</compile_context>

<pallas_src>
import functools

import jax
import jax.numpy as jnp
from jax import lax
from jax.experimental import pallas as pl
from jax.experimental.pallas import tpu as pltpu

LANES = 128
SUBLANES = 8
_CHUNK_ROWS = 512            # inner slab: 64 f32 vregs per input, bounds live ranges


def _tpu_generation():
    try:
        kind = jax.devices()[0].device_kind.lower()
    except Exception:
        return "unknown"
    if "v7" in kind or "7x" in kind:
        return "v7x"
    if "v6" in kind:
        return "v6e"
    if "v5" in kind and ("lite" in kind or "v5e" in kind):
        return "v5e"
    return "other"


_GEN = _tpu_generation()
if _GEN == "v7x":
    BLOCK_ROWS = 8192        # 4 MiB f32 per input block; 2 TCs -> 2 shards
    NUM_SHARDS = 2
else:                        # v5e / v6e / unknown: single TensorCore
    BLOCK_ROWS = 4096        # 2 MiB f32 per input block; fits 16 MiB scoped VMEM
    NUM_SHARDS = 1

PALLAS_MIN_N = BLOCK_ROWS * LANES   # below this, plain jnp is faster


def _fold_rows(a):
    """Fold (R, 128) f32 -> (8, 128) with a pairwise VALU tree (R = 8 * 2^k).

    Slices always land on (8, 128) vreg boundaries, so this is pure elementwise
    adds with log-depth critical path; no XLU, no cross-lane movement.
    """
    rows = a.shape[0]
    while rows > SUBLANES:
        half = rows // 2
        a = a[:half, :] + a[half:rows, :]
        rows = half
    return a


def _block_partial(x_ref, y_ref, block_rows, mask_base=None, rows_valid=None):
    """Sum of (x - y)^2 over the (block_rows, 128) block, folded to (8, 128).

    Processes the block in _CHUNK_ROWS slabs so intermediate vector values stay
    small (<= 256 KiB).  If `mask_base` is given, row r of the block only
    contributes when mask_base + r < rows_valid (select-style mask — never a
    0/1 multiply, so stale OOB bits can't poison the sum via 0*NaN).
    """
    acc = jnp.zeros((SUBLANES, LANES), jnp.float32)
    for c in range(0, block_rows, _CHUNK_ROWS):
        xs = x_ref[c:c + _CHUNK_ROWS, :].astype(jnp.float32)
        ys = y_ref[c:c + _CHUNK_ROWS, :].astype(jnp.float32)
        d = xs - ys
        dsq = d * d
        if mask_base is not None:
            row_ids = mask_base + c + lax.broadcasted_iota(
                jnp.int32, (_CHUNK_ROWS, LANES), 0)
            dsq = jnp.where(row_ids < rows_valid, dsq, jnp.float32(0.0))
        acc = acc + _fold_rows(dsq)
    return acc


def _mse_partial_kernel(x_ref, y_ref, out_ref, *, block_rows, rows_valid,
                        tiles_per_shard, n_blocks, needs_mask, inv_n):
    t = pl.program_id(1)              # chunk index within this shard (reduction)

    @pl.when(t == 0)
    def _init():
        out_ref[...] = jnp.zeros_like(out_ref)

    if needs_mask:
        # Global (unclamped) block id.  Only the last valid block can be
        # partial; clamped re-reads (blk >= n_blocks) must contribute zero.
        blk = pl.program_id(0) * tiles_per_shard + t

        @pl.when(blk < n_blocks - 1)
        def _accum_interior():                    # mask-free fast path
            out_ref[...] += _block_partial(x_ref, y_ref, block_rows)

        @pl.when(blk >= n_blocks - 1)
        def _accum_edge():                        # partial / clamped block
            out_ref[...] += _block_partial(
                x_ref, y_ref, block_rows,
                mask_base=blk * block_rows, rows_valid=rows_valid)
    else:
        out_ref[...] += _block_partial(x_ref, y_ref, block_rows)

    @pl.when(t == pl.num_programs(1) - 1)
    def _finalize():
        out_ref[...] = out_ref[...] * jnp.float32(inv_n)


def myloss(x, y):
    """mean((x - y)**2); Pallas TPU kernel for large inputs. Returns a scalar."""
    x = jnp.asarray(x)
    y = jnp.asarray(y)
    assert x.shape == y.shape

    # Stream sub-32-bit float inputs in their native dtype (halves HBM bytes);
    # upcast to f32 per chunk inside the kernel.  Everything else goes as f32.
    stream_dtype = jnp.promote_types(x.dtype, y.dtype)
    if stream_dtype not in (jnp.dtype(jnp.bfloat16), jnp.dtype(jnp.float16)):
        stream_dtype = jnp.dtype(jnp.float32)
    x = x.astype(stream_dtype).reshape(-1)
    y = y.astype(stream_dtype).reshape(-1)
    n = int(x.shape[0])

    # Tiny inputs: kernel launch overhead dominates -> fused XLA directly.
    if n < PALLAS_MIN_N:
        return jnp.mean((x.astype(jnp.float32) - y.astype(jnp.float32)) ** 2)

    # Ragged lane tail (<128 elems): sum it with plain jnp instead of padding
    # the whole array.
    rem = n % LANES
    if rem:
        xt = x[n - rem:].astype(jnp.float32)
        yt = y[n - rem:].astype(jnp.float32)
        tail_sq = jnp.sum((xt - yt) ** 2)
        x_main = x[:n - rem]
        y_main = y[:n - rem]
    else:
        tail_sq = None
        x_main = x
        y_main = y

    rows = (n - rem) // LANES
    x2d = x_main.reshape(rows, LANES)           # lane-aligned 2-D view
    y2d = y_main.reshape(rows, LANES)

    n_blocks = pl.cdiv(rows, BLOCK_ROWS)
    tiles_per_shard = pl.cdiv(n_blocks, NUM_SHARDS)
    needs_mask = (NUM_SHARDS * tiles_per_shard != n_blocks) or (rows % BLOCK_ROWS != 0)

    def in_block_map(s, t):
        # Clamp so over-provisioned shards re-read the last valid block (their
        # contribution is masked to zero in-kernel).
        return (jnp.minimum(s * tiles_per_shard + t, n_blocks - 1), 0)

    kernel = functools.partial(
        _mse_partial_kernel,
        block_rows=BLOCK_ROWS,
        rows_valid=rows,
        tiles_per_shard=tiles_per_shard,
        n_blocks=n_blocks,
        needs_mask=needs_mask,
        inv_n=1.0 / n,
    )

    # Double-buffered inputs (2 arrays x 2 buffers) + generous slack for the
    # tiny output buffers and Mosaic-internal temporaries.
    block_bytes = BLOCK_ROWS * LANES * jnp.dtype(stream_dtype).itemsize
    vmem_limit = 2 * 2 * block_bytes + (8 << 20)

    partial = pl.pallas_call(
        kernel,
        out_shape=jax.ShapeDtypeStruct((NUM_SHARDS * SUBLANES, LANES), jnp.float32),
        grid_spec=pltpu.PrefetchScalarGridSpec(
            num_scalar_prefetch=0,
            grid=(NUM_SHARDS, tiles_per_shard),
            in_specs=[
                pl.BlockSpec((BLOCK_ROWS, LANES), in_block_map),
                pl.BlockSpec((BLOCK_ROWS, LANES), in_block_map),
            ],
            out_specs=pl.BlockSpec((SUBLANES, LANES), lambda s, t: (s, 0)),
        ),
        compiler_params=pltpu.CompilerParams(
            dimension_semantics=("parallel", "arbitrary"),
            vmem_limit_bytes=int(vmem_limit),
        ),
    )(x2d, y2d)

    loss = jnp.sum(partial)                     # already scaled by 1/n in-kernel
    if rem:
        loss = loss + tail_sq * jnp.float32(1.0 / n)
    return loss


if __name__ == "__main__":
    key = jax.random.PRNGKey(0)
    k1, k2, k3, k4, k5 = jax.random.split(key, 5)

    cases = []

    # Case 1: the original module's data shape -- 199-element float vectors
    # (x in [0.1, 39.8], y = x + noise).  Exercises the tiny-input fast path.
    base = jnp.concatenate(
        [
            jnp.arange(1, 100, dtype=jnp.float32) / 10.0,
            jnp.arange(100, 200, dtype=jnp.float32) / 5.0,
        ]
    )
    noise = jax.random.uniform(
        k1, base.shape, jnp.float32, minval=-1.0, maxval=1.0
    ) * (base / 9.8)
    cases.append((base, base + noise, 1e-5))

    # Case 2: block/shard-aligned f32 -> Pallas path, mask-free fast path only.
    n2 = 2 * NUM_SHARDS * BLOCK_ROWS * LANES
    x2 = jax.random.normal(k2, (n2,), jnp.float32)
    y2 = x2 + 0.1 * jax.random.normal(k3, (n2,), jnp.float32)
    cases.append((x2, y2, 1e-4))

    # Case 3: ragged f32 -> Pallas path with a masked edge block, a clamped
    # shard (when NUM_SHARDS=2), and the <128-element jnp tail.
    n3 = NUM_SHARDS * BLOCK_ROWS * LANES + 37 * LANES + 53
    x3 = jax.random.normal(k4, (n3,), jnp.float32)
    y3 = x3 + 0.1 * jax.random.normal(k5, (n3,), jnp.float32)
    cases.append((x3, y3, 1e-4))

    # Case 4: bf16 inputs streamed in native dtype (half the HBM bytes),
    # upcast to f32 inside the kernel.
    x4 = x3.astype(jnp.bfloat16)
    y4 = y3.astype(jnp.bfloat16)
    cases.append((x4, y4, 1e-3))

    for xi, yi, rtol in cases:
        got = myloss(xi, yi)
        jax.block_until_ready(got)
        ref = jnp.mean((xi.astype(jnp.float32) - yi.astype(jnp.float32)) ** 2)
        assert jnp.allclose(got, ref, rtol=rtol, atol=1e-6), (
            xi.shape, str(xi.dtype), got, ref)

    print("KERNEL_OK")
</pallas_src>

<mosaic_0001>
module attributes {stable_mosaic.version = 11 : i64} {
  func.func @_mse_partial_kernel(%arg0: i32, %arg1: i32, %arg2: memref<4096x128xf32, #tpu.memory_space<vmem>>, %arg3: memref<4096x128xf32, #tpu.memory_space<vmem>>, %arg4: memref<8x128xf32, #tpu.memory_space<vmem>>) attributes {dimension_semantics = [#tpu.dimension_semantics<parallel>, #tpu.dimension_semantics<arbitrary>], iteration_bounds = array<i64: 1, 2>, scalar_prefetch = 0 : i64, scratch_operands = 0 : i64, tpu.core_type = #tpu.core_type<tc>, window_params = [{transform_indices = @transform_0, window_bounds = array<i64: 4096, 128>}, {transform_indices = @transform_1, window_bounds = array<i64: 4096, 128>}, {transform_indices = @transform_2, window_bounds = array<i64: 8, 128>}]} {
    %c0_i32 = arith.constant 0 : i32
    %0 = arith.cmpi eq, %arg1, %c0_i32 : i32
    %1 = arith.extui %0 : i1 to i32
    %c0_i32_0 = arith.constant 0 : i32
    %2 = arith.cmpi ne, %1, %c0_i32_0 : i32
    scf.if %2 {
      %cst_30 = arith.constant 0.000000e+00 : f32
      %194 = vector.broadcast %cst_30 : f32 to vector<8x128xf32>
      %c0_31 = arith.constant 0 : index
      %c0_32 = arith.constant 0 : index
      %195 = vector.load %arg4[%c0_31, %c0_32] : memref<8x128xf32, #tpu.memory_space<vmem>>, vector<8x128xf32>
      tpu.vector_store %arg4[%c0_31, %c0_32], %194 {strides = array<i32>} : memref<8x128xf32, #tpu.memory_space<vmem>>, vector<8x128xf32>,
    } else {
    }
    %c0 = arith.constant 0 : index
    %c0_1 = arith.constant 0 : index
    %3 = vector.load %arg4[%c0, %c0_1] : memref<8x128xf32, #tpu.memory_space<vmem>>, vector<8x128xf32>
    %cst = arith.constant 0.000000e+00 : f32
    %4 = vector.broadcast %cst : f32 to vector<8x128xf32>
    %c0_2 = arith.constant 0 : index
    %c0_3 = arith.constant 0 : index
    %5 = vector.load %arg2[%c0_2, %c0_3] : memref<4096x128xf32, #tpu.memory_space<vmem>>, vector<512x128xf32>
    %c0_4 = arith.constant 0 : index
    %c0_5 = arith.constant 0 : index
    %6 = vector.load %arg3[%c0_4, %c0_5] : memref<4096x128xf32, #tpu.memory_space<vmem>>, vector<512x128xf32>
    %7 = arith.subf %5, %6 : vector<512x128xf32>
    %8 = arith.mulf %7, %7 : vector<512x128xf32>
    %9 = vector.extract_strided_slice %8 {offsets = [0, 0], sizes = [256, 128], strides = [1, 1]} : vector<512x128xf32> to vector<256x128xf32>
    %10 = vector.extract_strided_slice %8 {offsets = [256, 0], sizes = [256, 128], strides = [1, 1]} : vector<512x128xf32> to vector<256x128xf32>
    %11 = arith.addf %9, %10 : vector<256x128xf32>
    %12 = vector.extract_strided_slice %11 {offsets = [0, 0], sizes = [128, 128], strides = [1, 1]} : vector<256x128xf32> to vector<128x128xf32>
    %13 = vector.extract_strided_slice %11 {offsets = [128, 0], sizes = [128, 128], strides = [1, 1]} : vector<256x128xf32> to vector<128x128xf32>
    %14 = arith.addf %12, %13 : vector<128x128xf32>
    %15 = vector.extract_strided_slice %14 {offsets = [0, 0], sizes = [64, 128], strides = [1, 1]} : vector<128x128xf32> to vector<64x128xf32>
    %16 = vector.extract_strided_slice %14 {offsets = [64, 0], sizes = [64, 128], strides = [1, 1]} : vector<128x128xf32> to vector<64x128xf32>
    %17 = arith.addf %15, %16 : vector<64x128xf32>
    %18 = vector.extract_strided_slice %17 {offsets = [0, 0], sizes = [32, 128], strides = [1, 1]} : vector<64x128xf32> to vector<32x128xf32>
    %19 = vector.extract_strided_slice %17 {offsets = [32, 0], sizes = [32, 128], strides = [1, 1]} : vector<64x128xf32> to vector<32x128xf32>
    %20 = arith.addf %18, %19 : vector<32x128xf32>
    %21 = vector.extract_strided_slice %20 {offsets = [0, 0], sizes = [16, 128], strides = [1, 1]} : vector<32x128xf32> to vector<16x128xf32>
    %22 = vector.extract_strided_slice %20 {offsets = [16, 0], sizes = [16, 128], strides = [1, 1]} : vector<32x128xf32> to vector<16x128xf32>
    %23 = arith.addf %21, %22 : vector<16x128xf32>
    %24 = vector.extract_strided_slice %23 {offsets = [0, 0], sizes = [8, 128], strides = [1, 1]} : vector<16x128xf32> to vector<8x128xf32>
    %25 = vector.extract_strided_slice %23 {offsets = [8, 0], sizes = [8, 128], strides = [1, 1]} : vector<16x128xf32> to vector<8x128xf32>
    %26 = arith.addf %24, %25 : vector<8x128xf32>
    %27 = arith.addf %4, %26 : vector<8x128xf32>
    %c512 = arith.constant 512 : index
    %c0_6 = arith.constant 0 : index
    %28 = vector.load %arg2[%c512, %c0_6] : memref<4096x128xf32, #tpu.memory_space<vmem>>, vector<512x128xf32>
    %c512_7 = arith.constant 512 : index
    %c0_8 = arith.constant 0 : index
    %29 = vector.load %arg3[%c512_7, %c0_8] : memref<4096x128xf32, #tpu.memory_space<vmem>>, vector<512x128xf32>
    %30 = arith.subf %28, %29 : vector<512x128xf32>
    %31 = arith.mulf %30, %30 : vector<512x128xf32>
    %32 = vector.extract_strided_slice %31 {offsets = [0, 0], sizes = [256, 128], strides = [1, 1]} : vector<512x128xf32> to vector<256x128xf32>
    %33 = vector.extract_strided_slice %31 {offsets = [256, 0], sizes = [256, 128], strides = [1, 1]} : vector<512x128xf32> to vector<256x128xf32>
    %34 = arith.addf %32, %33 : vector<256x128xf32>
    %35 = vector.extract_strided_slice %34 {offsets = [0, 0], sizes = [128, 128], strides = [1, 1]} : vector<256x128xf32> to vector<128x128xf32>
    %36 = vector.extract_strided_slice %34 {offsets = [128, 0], sizes = [128, 128], strides = [1, 1]} : vector<256x128xf32> to vector<128x128xf32>
    %37 = arith.addf %35, %36 : vector<128x128xf32>
    %38 = vector.extract_strided_slice %37 {offsets = [0, 0], sizes = [64, 128], strides = [1, 1]} : vector<128x128xf32> to vector<64x128xf32>
    %39 = vector.extract_strided_slice %37 {offsets = [64, 0], sizes = [64, 128], strides = [1, 1]} : vector<128x128xf32> to vector<64x128xf32>
    %40 = arith.addf %38, %39 : vector<64x128xf32>
    %41 = vector.extract_strided_slice %40 {offsets = [0, 0], sizes = [32, 128], strides = [1, 1]} : vector<64x128xf32> to vector<32x128xf32>
    %42 = vector.extract_strided_slice %40 {offsets = [32, 0], sizes = [32, 128], strides = [1, 1]} : vector<64x128xf32> to vector<32x128xf32>
    %43 = arith.addf %41, %42 : vector<32x128xf32>
    %44 = vector.extract_strided_slice %43 {offsets = [0, 0], sizes = [16, 128], strides = [1, 1]} : vector<32x128xf32> to vector<16x128xf32>
    %45 = vector.extract_strided_slice %43 {offsets = [16, 0], sizes = [16, 128], strides = [1, 1]} : vector<32x128xf32> to vector<16x128xf32>
    %46 = arith.addf %44, %45 : vector<16x128xf32>
    %47 = vector.extract_strided_slice %46 {offsets = [0, 0], sizes = [8, 128], strides = [1, 1]} : vector<16x128xf32> to vector<8x128xf32>
    %48 = vector.extract_strided_slice %46 {offsets = [8, 0], sizes = [8, 128], strides = [1, 1]} : vector<16x128xf32> to vector<8x128xf32>
    %49 = arith.addf %47, %48 : vector<8x128xf32>
    %50 = arith.addf %27, %49 : vector<8x128xf32>
    %c1024 = arith.constant 1024 : index
    %c0_9 = arith.constant 0 : index
    %51 = vector.load %arg2[%c1024, %c0_9] : memref<4096x128xf32, #tpu.memory_space<vmem>>, vector<512x128xf32>
    %c1024_10 = arith.constant 1024 : index
    %c0_11 = arith.constant 0 : index
    %52 = vector.load %arg3[%c1024_10, %c0_11] : memref<4096x128xf32, #tpu.memory_space<vmem>>, vector<512x128xf32>
    %53 = arith.subf %51, %52 : vector<512x128xf32>
    %54 = arith.mulf %53, %53 : vector<512x128xf32>
    %55 = vector.extract_strided_slice %54 {offsets = [0, 0], sizes = [256, 128], strides = [1, 1]} : vector<512x128xf32> to vector<256x128xf32>
    %56 = vector.extract_strided_slice %54 {offsets = [256, 0], sizes = [256, 128], strides = [1, 1]} : vector<512x128xf32> to vector<256x128xf32>
    %57 = arith.addf %55, %56 : vector<256x128xf32>
    %58 = vector.extract_strided_slice %57 {offsets = [0, 0], sizes = [128, 128], strides = [1, 1]} : vector<256x128xf32> to vector<128x128xf32>
    %59 = vector.extract_strided_slice %57 {offsets = [128, 0], sizes = [128, 128], strides = [1, 1]} : vector<256x128xf32> to vector<128x128xf32>
    %60 = arith.addf %58, %59 : vector<128x128xf32>
    %61 = vector.extract_strided_slice %60 {offsets = [0, 0], sizes = [64, 128], strides = [1, 1]} : vector<128x128xf32> to vector<64x128xf32>
    %62 = vector.extract_strided_slice %60 {offsets = [64, 0], sizes = [64, 128], strides = [1, 1]} : vector<128x128xf32> to vector<64x128xf32>
    %63 = arith.addf %61, %62 : vector<64x128xf32>
    %64 = vector.extract_strided_slice %63 {offsets = [0, 0], sizes = [32, 128], strides = [1, 1]} : vector<64x128xf32> to vector<32x128xf32>
    %65 = vector.extract_strided_slice %63 {offsets = [32, 0], sizes = [32, 128], strides = [1, 1]} : vector<64x128xf32> to vector<32x128xf32>
    %66 = arith.addf %64, %65 : vector<32x128xf32>
    %67 = vector.extract_strided_slice %66 {offsets = [0, 0], sizes = [16, 128], strides = [1, 1]} : vector<32x128xf32> to vector<16x128xf32>
    %68 = vector.extract_strided_slice %66 {offsets = [16, 0], sizes = [16, 128], strides = [1, 1]} : vector<32x128xf32> to vector<16x128xf32>
    %69 = arith.addf %67, %68 : vector<16x128xf32>
    %70 = vector.extract_strided_slice %69 {offsets = [0, 0], sizes = [8, 128], strides = [1, 1]} : vector<16x128xf32> to vector<8x128xf32>
    %71 = vector.extract_strided_slice %69 {offsets = [8, 0], sizes = [8, 128], strides = [1, 1]} : vector<16x128xf32> to vector<8x128xf32>
    %72 = arith.addf %70, %71 : vector<8x128xf32>
    %73 = arith.addf %50, %72 : vector<8x128xf32>
    %c1536 = arith.constant 1536 : index
    %c0_12 = arith.constant 0 : index
    %74 = vector.load %arg2[%c1536, %c0_12] : memref<4096x128xf32, #tpu.memory_space<vmem>>, vector<512x128xf32>
    %c1536_13 = arith.constant 1536 : index
    %c0_14 = arith.constant 0 : index
    %75 = vector.load %arg3[%c1536_13, %c0_14] : memref<4096x128xf32, #tpu.memory_space<vmem>>, vector<512x128xf32>
    %76 = arith.subf %74, %75 : vector<512x128xf32>
    %77 = arith.mulf %76, %76 : vector<512x128xf32>
    %78 = vector.extract_strided_slice %77 {offsets = [0, 0], sizes = [256, 128], strides = [1, 1]} : vector<512x128xf32> to vector<256x128xf32>
    %79 = vector.extract_strided_slice %77 {offsets = [256, 0], sizes = [256, 128], strides = [1, 1]} : vector<512x128xf32> to vector<256x128xf32>
    %80 = arith.addf %78, %79 : vector<256x128xf32>
    %81 = vector.extract_strided_slice %80 {offsets = [0, 0], sizes = [128, 128], strides = [1, 1]} : vector<256x128xf32> to vector<128x128xf32>
    %82 = vector.extract_strided_slice %80 {offsets = [128, 0], sizes = [128, 128], strides = [1, 1]} : vector<256x128xf32> to vector<128x128xf32>
    %83 = arith.addf %81, %82 : vector<128x128xf32>
    %84 = vector.extract_strided_slice %83 {offsets = [0, 0], sizes = [64, 128], strides = [1, 1]} : vector<128x128xf32> to vector<64x128xf32>
    %85 = vector.extract_strided_slice %83 {offsets = [64, 0], sizes = [64, 128], strides = [1, 1]} : vector<128x128xf32> to vector<64x128xf32>
    %86 = arith.addf %84, %85 : vector<64x128xf32>
    %87 = vector.extract_strided_slice %86 {offsets = [0, 0], sizes = [32, 128], strides = [1, 1]} : vector<64x128xf32> to vector<32x128xf32>
    %88 = vector.extract_strided_slice %86 {offsets = [32, 0], sizes = [32, 128], strides = [1, 1]} : vector<64x128xf32> to vector<32x128xf32>
    %89 = arith.addf %87, %88 : vector<32x128xf32>
    %90 = vector.extract_strided_slice %89 {offsets = [0, 0], sizes = [16, 128], strides = [1, 1]} : vector<32x128xf32> to vector<16x128xf32>
    %91 = vector.extract_strided_slice %89 {offsets = [16, 0], sizes = [16, 128], strides = [1, 1]} : vector<32x128xf32> to vector<16x128xf32>
    %92 = arith.addf %90, %91 : vector<16x128xf32>
    %93 = vector.extract_strided_slice %92 {offsets = [0, 0], sizes = [8, 128], strides = [1, 1]} : vector<16x128xf32> to vector<8x128xf32>
    %94 = vector.extract_strided_slice %92 {offsets = [8, 0], sizes = [8, 128], strides = [1, 1]} : vector<16x128xf32> to vector<8x128xf32>
    %95 = arith.addf %93, %94 : vector<8x128xf32>
    %96 = arith.addf %73, %95 : vector<8x128xf32>
    %c2048 = arith.constant 2048 : index
    %c0_15 = arith.constant 0 : index
    %97 = vector.load %arg2[%c2048, %c0_15] : memref<4096x128xf32, #tpu.memory_space<vmem>>, vector<512x128xf32>
    %c2048_16 = arith.constant 2048 : index
    %c0_17 = arith.constant 0 : index
    %98 = vector.load %arg3[%c2048_16, %c0_17] : memref<4096x128xf32, #tpu.memory_space<vmem>>, vector<512x128xf32>
    %99 = arith.subf %97, %98 : vector<512x128xf32>
    %100 = arith.mulf %99, %99 : vector<512x128xf32>
    %101 = vector.extract_strided_slice %100 {offsets = [0, 0], sizes = [256, 128], strides = [1, 1]} : vector<512x128xf32> to vector<256x128xf32>
    %102 = vector.extract_strided_slice %100 {offsets = [256, 0], sizes = [256, 128], strides = [1, 1]} : vector<512x128xf32> to vector<256x128xf32>
    %103 = arith.addf %101, %102 : vector<256x128xf32>
    %104 = vector.extract_strided_slice %103 {offsets = [0, 0], sizes = [128, 128], strides = [1, 1]} : vector<256x128xf32> to vector<128x128xf32>
    %105 = vector.extract_strided_slice %103 {offsets = [128, 0], sizes = [128, 128], strides = [1, 1]} : vector<256x128xf32> to vector<128x128xf32>
    %106 = arith.addf %104, %105 : vector<128x128xf32>
    %107 = vector.extract_strided_slice %106 {offsets = [0, 0], sizes = [64, 128], strides = [1, 1]} : vector<128x128xf32> to vector<64x128xf32>
    %108 = vector.extract_strided_slice %106 {offsets = [64, 0], sizes = [64, 128], strides = [1, 1]} : vector<128x128xf32> to vector<64x128xf32>
    %109 = arith.addf %107, %108 : vector<64x128xf32>
    %110 = vector.extract_strided_slice %109 {offsets = [0, 0], sizes = [32, 128], strides = [1, 1]} : vector<64x128xf32> to vector<32x128xf32>
    %111 = vector.extract_strided_slice %109 {offsets = [32, 0], sizes = [32, 128], strides = [1, 1]} : vector<64x128xf32> to vector<32x128xf32>
    %112 = arith.addf %110, %111 : vector<32x128xf32>
    %113 = vector.extract_strided_slice %112 {offsets = [0, 0], sizes = [16, 128], strides = [1, 1]} : vector<32x128xf32> to vector<16x128xf32>
    %114 = vector.extract_strided_slice %112 {offsets = [16, 0], sizes = [16, 128], strides = [1, 1]} : vector<32x128xf32> to vector<16x128xf32>
    %115 = arith.addf %113, %114 : vector<16x128xf32>
    %116 = vector.extract_strided_slice %115 {offsets = [0, 0], sizes = [8, 128], strides = [1, 1]} : vector<16x128xf32> to vector<8x128xf32>
    %117 = vector.extract_strided_slice %115 {offsets = [8, 0], sizes = [8, 128], strides = [1, 1]} : vector<16x128xf32> to vector<8x128xf32>
    %118 = arith.addf %116, %117 : vector<8x128xf32>
    %119 = arith.addf %96, %118 : vector<8x128xf32>
    %c2560 = arith.constant 2560 : index
    %c0_18 = arith.constant 0 : index
    %120 = vector.load %arg2[%c2560, %c0_18] : memref<4096x128xf32, #tpu.memory_space<vmem>>, vector<512x128xf32>
    %c2560_19 = arith.constant 2560 : index
    %c0_20 = arith.constant 0 : index
    %121 = vector.load %arg3[%c2560_19, %c0_20] : memref<4096x128xf32, #tpu.memory_space<vmem>>, vector<512x128xf32>
    %122 = arith.subf %120, %121 : vector<512x128xf32>
    %123 = arith.mulf %122, %122 : vector<512x128xf32>
    %124 = vector.extract_strided_slice %123 {offsets = [0, 0], sizes = [256, 128], strides = [1, 1]} : vector<512x128xf32> to vector<256x128xf32>
    %125 = vector.extract_strided_slice %123 {offsets = [256, 0], sizes = [256, 128], strides = [1, 1]} : vector<512x128xf32> to vector<256x128xf32>
    %126 = arith.addf %124, %125 : vector<256x128xf32>
    %127 = vector.extract_strided_slice %126 {offsets = [0, 0], sizes = [128, 128], strides = [1, 1]} : vector<256x128xf32> to vector<128x128xf32>
    %128 = vector.extract_strided_slice %126 {offsets = [128, 0], sizes = [128, 128], strides = [1, 1]} : vector<256x128xf32> to vector<128x128xf32>
    %129 = arith.addf %127, %128 : vector<128x128xf32>
    %130 = vector.extract_strided_slice %129 {offsets = [0, 0], sizes = [64, 128], strides = [1, 1]} : vector<128x128xf32> to vector<64x128xf32>
    %131 = vector.extract_strided_slice %129 {offsets = [64, 0], sizes = [64, 128], strides = [1, 1]} : vector<128x128xf32> to vector<64x128xf32>
    %132 = arith.addf %130, %131 : vector<64x128xf32>
    %133 = vector.extract_strided_slice %132 {offsets = [0, 0], sizes = [32, 128], strides = [1, 1]} : vector<64x128xf32> to vector<32x128xf32>
    %134 = vector.extract_strided_slice %132 {offsets = [32, 0], sizes = [32, 128], strides = [1, 1]} : vector<64x128xf32> to vector<32x128xf32>
    %135 = arith.addf %133, %134 : vector<32x128xf32>
    %136 = vector.extract_strided_slice %135 {offsets = [0, 0], sizes = [16, 128], strides = [1, 1]} : vector<32x128xf32> to vector<16x128xf32>
    %137 = vector.extract_strided_slice %135 {offsets = [16, 0], sizes = [16, 128], strides = [1, 1]} : vector<32x128xf32> to vector<16x128xf32>
    %138 = arith.addf %136, %137 : vector<16x128xf32>
    %139 = vector.extract_strided_slice %138 {offsets = [0, 0], sizes = [8, 128], strides = [1, 1]} : vector<16x128xf32> to vector<8x128xf32>
    %140 = vector.extract_strided_slice %138 {offsets = [8, 0], sizes = [8, 128], strides = [1, 1]} : vector<16x128xf32> to vector<8x128xf32>
    %141 = arith.addf %139, %140 : vector<8x128xf32>
    %142 = arith.addf %119, %141 : vector<8x128xf32>
    %c3072 = arith.constant 3072 : index
    %c0_21 = arith.constant 0 : index
    %143 = vector.load %arg2[%c3072, %c0_21] : memref<4096x128xf32, #tpu.memory_space<vmem>>, vector<512x128xf32>
    %c3072_22 = arith.constant 3072 : index
    %c0_23 = arith.constant 0 : index
    %144 = vector.load %arg3[%c3072_22, %c0_23] : memref<4096x128xf32, #tpu.memory_space<vmem>>, vector<512x128xf32>
    %145 = arith.subf %143, %144 : vector<512x128xf32>
    %146 = arith.mulf %145, %145 : vector<512x128xf32>
    %147 = vector.extract_strided_slice %146 {offsets = [0, 0], sizes = [256, 128], strides = [1, 1]} : vector<512x128xf32> to vector<256x128xf32>
    %148 = vector.extract_strided_slice %146 {offsets = [256, 0], sizes = [256, 128], strides = [1, 1]} : vector<512x128xf32> to vector<256x128xf32>
    %149 = arith.addf %147, %148 : vector<256x128xf32>
    %150 = vector.extract_strided_slice %149 {offsets = [0, 0], sizes = [128, 128], strides = [1, 1]} : vector<256x128xf32> to vector<128x128xf32>
    %151 = vector.extract_strided_slice %149 {offsets = [128, 0], sizes = [128, 128], strides = [1, 1]} : vector<256x128xf32> to vector<128x128xf32>
    %152 = arith.addf %150, %151 : vector<128x128xf32>
    %153 = vector.extract_strided_slice %152 {offsets = [0, 0], sizes = [64, 128], strides = [1, 1]} : vector<128x128xf32> to vector<64x128xf32>
    %154 = vector.extract_strided_slice %152 {offsets = [64, 0], sizes = [64, 128], strides = [1, 1]} : vector<128x128xf32> to vector<64x128xf32>
    %155 = arith.addf %153, %154 : vector<64x128xf32>
    %156 = vector.extract_strided_slice %155 {offsets = [0, 0], sizes = [32, 128], strides = [1, 1]} : vector<64x128xf32> to vector<32x128xf32>
    %157 = vector.extract_strided_slice %155 {offsets = [32, 0], sizes = [32, 128], strides = [1, 1]} : vector<64x128xf32> to vector<32x128xf32>
    %158 = arith.addf %156, %157 : vector<32x128xf32>
    %159 = vector.extract_strided_slice %158 {offsets = [0, 0], sizes = [16, 128], strides = [1, 1]} : vector<32x128xf32> to vector<16x128xf32>
    %160 = vector.extract_strided_slice %158 {offsets = [16, 0], sizes = [16, 128], strides = [1, 1]} : vector<32x128xf32> to vector<16x128xf32>
    %161 = arith.addf %159, %160 : vector<16x128xf32>
    %162 = vector.extract_strided_slice %161 {offsets = [0, 0], sizes = [8, 128], strides = [1, 1]} : vector<16x128xf32> to vector<8x128xf32>
    %163 = vector.extract_strided_slice %161 {offsets = [8, 0], sizes = [8, 128], strides = [1, 1]} : vector<16x128xf32> to vector<8x128xf32>
    %164 = arith.addf %162, %163 : vector<8x128xf32>
    %165 = arith.addf %142, %164 : vector<8x128xf32>
    %c3584 = arith.constant 3584 : index
    %c0_24 = arith.constant 0 : index
    %166 = vector.load %arg2[%c3584, %c0_24] : memref<4096x128xf32, #tpu.memory_space<vmem>>, vector<512x128xf32>
    %c3584_25 = arith.constant 3584 : index
    %c0_26 = arith.constant 0 : index
    %167 = vector.load %arg3[%c3584_25, %c0_26] : memref<4096x128xf32, #tpu.memory_space<vmem>>, vector<512x128xf32>
    %168 = arith.subf %166, %167 : vector<512x128xf32>
    %169 = arith.mulf %168, %168 : vector<512x128xf32>
    %170 = vector.extract_strided_slice %169 {offsets = [0, 0], sizes = [256, 128], strides = [1, 1]} : vector<512x128xf32> to vector<256x128xf32>
    %171 = vector.extract_strided_slice %169 {offsets = [256, 0], sizes = [256, 128], strides = [1, 1]} : vector<512x128xf32> to vector<256x128xf32>
    %172 = arith.addf %170, %171 : vector<256x128xf32>
    %173 = vector.extract_strided_slice %172 {offsets = [0, 0], sizes = [128, 128], strides = [1, 1]} : vector<256x128xf32> to vector<128x128xf32>
    %174 = vector.extract_strided_slice %172 {offsets = [128, 0], sizes = [128, 128], strides = [1, 1]} : vector<256x128xf32> to vector<128x128xf32>
    %175 = arith.addf %173, %174 : vector<128x128xf32>
    %176 = vector.extract_strided_slice %175 {offsets = [0, 0], sizes = [64, 128], strides = [1, 1]} : vector<128x128xf32> to vector<64x128xf32>
    %177 = vector.extract_strided_slice %175 {offsets = [64, 0], sizes = [64, 128], strides = [1, 1]} : vector<128x128xf32> to vector<64x128xf32>
    %178 = arith.addf %176, %177 : vector<64x128xf32>
    %179 = vector.extract_strided_slice %178 {offsets = [0, 0], sizes = [32, 128], strides = [1, 1]} : vector<64x128xf32> to vector<32x128xf32>
    %180 = vector.extract_strided_slice %178 {offsets = [32, 0], sizes = [32, 128], strides = [1, 1]} : vector<64x128xf32> to vector<32x128xf32>
    %181 = arith.addf %179, %180 : vector<32x128xf32>
    %182 = vector.extract_strided_slice %181 {offsets = [0, 0], sizes = [16, 128], strides = [1, 1]} : vector<32x128xf32> to vector<16x128xf32>
    %183 = vector.extract_strided_slice %181 {offsets = [16, 0], sizes = [16, 128], strides = [1, 1]} : vector<32x128xf32> to vector<16x128xf32>
    %184 = arith.addf %182, %183 : vector<16x128xf32>
    %185 = vector.extract_strided_slice %184 {offsets = [0, 0], sizes = [8, 128], strides = [1, 1]} : vector<16x128xf32> to vector<8x128xf32>
    %186 = vector.extract_strided_slice %184 {offsets = [8, 0], sizes = [8, 128], strides = [1, 1]} : vector<16x128xf32> to vector<8x128xf32>
    %187 = arith.addf %185, %186 : vector<8x128xf32>
    %188 = arith.addf %165, %187 : vector<8x128xf32>
    %189 = arith.addf %3, %188 : vector<8x128xf32>
    %c0_27 = arith.constant 0 : index
    %c0_28 = arith.constant 0 : index
    %190 = vector.load %arg4[%c0_27, %c0_28] : memref<8x128xf32, #tpu.memory_space<vmem>>, vector<8x128xf32>
    tpu.vector_store %arg4[%c0_27, %c0_28], %189 {strides = array<i32>} : memref<8x128xf32, #tpu.memory_space<vmem>>, vector<8x128xf32>,
    %c1_i32 = arith.constant 1 : i32
    %191 = arith.cmpi eq, %arg1, %c1_i32 : i32
    %192 = arith.extui %191 : i1 to i32
    %c0_i32_29 = arith.constant 0 : i32
    %193 = arith.cmpi ne, %192, %c0_i32_29 : i32
    scf.if %193 {
      %c0_30 = arith.constant 0 : index
      %c0_31 = arith.constant 0 : index
      %194 = vector.load %arg4[%c0_30, %c0_31] : memref<8x128xf32, #tpu.memory_space<vmem>>, vector<8x128xf32>
      %cst_32 = arith.constant 9.53674316E-7 : f32
      %195 = vector.broadcast %cst_32 : f32 to vector<8x128xf32>
      %196 = arith.mulf %194, %195 : vector<8x128xf32>
      %c0_33 = arith.constant 0 : index
      %c0_34 = arith.constant 0 : index
      %197 = vector.load %arg4[%c0_33, %c0_34] : memref<8x128xf32, #tpu.memory_space<vmem>>, vector<8x128xf32>
      tpu.vector_store %arg4[%c0_33, %c0_34], %196 {strides = array<i32>} : memref<8x128xf32, #tpu.memory_space<vmem>>, vector<8x128xf32>,
    } else {
    }
    return
  }
  func.func @transform_0(%arg0: i32, %arg1: i32) -> (i32, i32) {
    %c2_i32 = arith.constant 2 : i32
    %0 = arith.muli %arg0, %c2_i32 : i32
    %1 = arith.addi %0, %arg1 : i32
    %c1_i32 = arith.constant 1 : i32
    %2 = arith.minsi %1, %c1_i32 : i32
    %c0_i32 = arith.constant 0 : i32
    %c0_i32_0 = arith.constant 0 : i32
    return %2, %c0_i32 : i32, i32
  }
  func.func @transform_1(%arg0: i32, %arg1: i32) -> (i32, i32) {
    %c2_i32 = arith.constant 2 : i32
    %0 = arith.muli %arg0, %c2_i32 : i32
    %1 = arith.addi %0, %arg1 : i32
    %c1_i32 = arith.constant 1 : i32
    %2 = arith.minsi %1, %c1_i32 : i32
    %c0_i32 = arith.constant 0 : i32
    %c0_i32_0 = arith.constant 0 : i32
    return %2, %c0_i32 : i32, i32
  }
  func.func @transform_2(%arg0: i32, %arg1: i32) -> (i32, i32) {
    %c0_i32 = arith.constant 0 : i32
    %c0_i32_0 = arith.constant 0 : i32
    return %arg0, %c0_i32 : i32, i32
  }
}

</mosaic_0001>

<bundles_post_ra>
// kernel: tpu_custom_call.1
= control target key start
LH: loop header
LB: loop body
LE: loop exit
PB: predicated region body
PF: predicated region fallthrough
CT: control target
= control target key end

     0   :  { %7 = vsyncpa [#allocation3], 0  ;;  %s7579_s0 = inlined_call_operand.hbm [shape: f32[8192,128], index: 0, kind: input, shape index: {}]   ;;  %s7580_s1 = inlined_call_operand.hbm [shape: f32[8192,128], index: 1, kind: input, shape index: {}]   ;;  %s7581_s2 = inlined_call_operand.hbm [shape: f32[8,128], index: 2, kind: output, shape index: {}]  }
   0x1   :  { %9 = vsyncpa [#allocation3 + $0x1], 0 }
   0x2   :  { %10 = vsyncpa [#allocation6], 0 }
   0x3   :  { %12 = vsyncpa [#allocation6 + $0x1], 0 }
   0x4   :  { %13 = vsyncpa [#allocation4], 0  ;;  %s3166_s9 = smov 0   ;;  %s3168_s10 = smov 0  }
   0x5   :  { %s3170_s11 = smov 0   ;;  %s3172_s12 = smov 0  }
   0x6   :  { %s3174_s13 = smov 0   ;;  %s3176_s14 = smov 0  }
   0x7 LB: > { %s2909_s15 = sadd.s32 4294967295, %s3143_s14   ;;  %s28_s16 = sadd.s32 1, %s3139_s13  ;;  %s3143_s14 = sphi %s3176_s14, %s19_s14   ;;  %s3139_s13 = sphi %s3174_s13, %s8204_s13   ;;  %s3135_s12 = sphi %s3172_s12, %s8203_s12   ;;  %s3131_s11 = sphi %s3170_s11, %s8202_s11   ;;  %s3127_s10 = sphi %s3168_s10, %s8201_s10   ;;  %s3123_s9 = sphi %s3166_s9, %s8200_s9  }
   0x8   : > { %p29_p0 = scmp.ge.s32.totalorder %s28_s16, 2  ;;  %p37_p1 = scmp.lt.s32.totalorder %s3139_s13, 1 }
   0x9   : > { %s46_s17 = sadd.s32 1, %s3131_s11  ;;  %p53_p2 = scmp.ne.s32.totalorder %s3131_s11, %s3127_s10 }
   0xa   : > { %s8206_s16 = smov (%p29_p0, %s28_s16), 0  ;;  %p54_p4 = scmp.eq.s32.totalorder %s3143_s14, 0 }
   0xb   : > { %s3203_s18 = scalar_select %p37_p1, %s3139_s13, 1 }
   0xc   : > { %p41_p3 = scmp.lt.s32.totalorder %s8206_s16, 1  ;;  %p59_p5 = scmp.ne.s32.totalorder %s3127_s10, %s3123_s9 }
   0xd   : > { %p60_p6 = scmp.eq.s32.totalorder %s2909_s15, 0  ;;  %p55_p7 = por %p54_p4, %p53_p2 }
   0xe   : > { %s42_s19 = scalar_select %p41_p3, %s8206_s16, 1 }
   0xf   : > { %p3211_p8 = por %p60_p6, %p59_p5  ;;  %p2944_p10 = scmp.lt.s32.totalorder %s3143_s14, 2 }
  0x10   : > { %s43_s21 = ssub.s32 %s3203_s18, %s42_s19  ;;  %s3218_s22 = sand.u32 1, %s3131_s11  }
  0x11   : > { %s7583_s20 = scalar_select %p3211_p8, 1, 0 }
  0x12   : > { %p44_p9 = scmp.eq.s32.totalorder %s43_s21, 0  ;;  %s2927_s23 = sshll.u32 %s3203_s18, 16 }
  0x13   : > { %s2912_s25 = sshll.u32 %s3218_s22, 12  ;;  %s3230_s28 = scalar_lea.hbm %s7579_s0, %s2927_s23 }
  0x14   : > { %s3222_s24 = scalar_select %p44_p9, %s3131_s11, %s46_s17  }
  0x15   : > { %s147_s29 = scalar_lea.vmem [#allocation2], %s2912_s25  ;;  %p3234_p11 = pnand %p2944_p10, %p55_p7 }
  0x16   : > { %s158_s30 = sshll.u32 %s147_s29, 4  ;;  %s144_s4 = scalar_lea.sflag [#allocation3], %s3218_s22  ;;  %s3238_s30 = int_to_ptr.vmem [resolvable:$true] %s158_s30 }
  0x17   : > { %s2999_s5 = scalar_lea.hbm %s3230_s28, 65536  ;;  %p3001_p13 = pneg %p3234_p11 }
  0x18   : > { %p3000_p12 = scmp.ne.s32.totalorder %s3230_s28, %s2999_s5  ;;  %s3004_s8 = scalar_lea.hbm %s7579_s0, 131072 }
  0x19   : > { %p3005_p2 = scmp.lt.u32.totalorder %s3230_s28, %s7579_s0  ;;  %p3006_p3 = scmp.lt.u32.totalorder %s3004_s8, %s2999_s5 }
  0x1a   : > { %p3002_p0 = pnand %p3001_p13, %p3000_p12  ;;  %p3008_p5 = scmp.lt.u32.totalorder %s2999_s5, %s3230_s28 }
  0x1b   : > { %p3007_p4 = por %p3006_p3, %p3005_p2 }
  0x1c   : > { %p3003_p1 = pneg %p3002_p0 }
  0x1d   : > { %p3009_p6 = por %p3008_p5, %p3007_p4 }
  0x1f   : > { %p3010_p7 = pnand %p3009_p6, %p3003_p1 }
  0x21   : > { %3013 = shalt.err (!%p3010_p7)
}
  0x22   : > { %s3014_s19 = scalar_lea.vmem %s3238_s30, 65536  ;;  %s3145_s21 = smov [#allocation2]  }
  0x23   : > { %p3015_p9 = scmp.ne.s32.totalorder %s3238_s30, %s3014_s19  ;;  %s3019_s26 = sshll.u32 %s3145_s21, 4  ;;  %s3020_s26 = int_to_ptr.vmem [resolvable:$false] %s3019_s26 }
  0x24   : > { %s3021_s27 = scalar_lea.vmem %s3020_s26, 131072  ;;  %p3022_p0 = scmp.lt.s32.totalorder %s3238_s30, %s3020_s26 }
  0x25   : > { %p3017_p10 = pnand %p3015_p9, %p3001_p13  ;;  %p3023_p2 = scmp.lt.s32.totalorder %s3021_s27, %s3014_s19 }
  0x27   : > { %p3018_p12 = pneg %p3017_p10  ;;  %p3024_p3 = por %p3023_p2, %p3022_p0 }
  0x29   : > { %p3025_p4 = pnand %p3024_p3, %p3018_p12 }
  0x2b   : > { %3028 = shalt.err (!%p3025_p4)
}
  0x2c   : > { %s3146_s29 = smov 128   ;;  %s3147_s5 = smov 8  }
  0x2d   : > { %2940 = dma.hbm_to_vmem [thread:$0]  (!%p3234_p11), %s3230_s28, 65536, %s3238_s30, %s144_s4, %s3146_s29, %s3146_s29, %s3147_s5  }
  0x2e   : > { %p2918_p1 = scmp.ge.s32.totalorder %s3143_s14, 1  ;;  %p191_p5 = scmp.lt.s32.totalorder %s3143_s14, 3 }
  0x2f   : > { %s3282_s9 = scalar_lea.hbm %s7580_s1, %s2927_s23  ;;  %s172_s17 = scalar_lea.vmem [#allocation5], %s2912_s25 }
  0x30   : > { %p3273_p6 = pnand %p2918_p1, %p191_p5  ;;  %s183_s19 = sshll.u32 %s172_s17, 4  ;;  %s3286_s19 = int_to_ptr.vmem [resolvable:$true] %s183_s19 }
  0x31   : > { %s169_s28 = scalar_lea.sflag [#allocation6], %s3218_s22  ;;  %s3029_s30 = scalar_lea.hbm %s3282_s9, 65536 }
  0x32   : > { %p3030_p7 = scmp.ne.s32.totalorder %s3282_s9, %s3029_s30  ;;  %s3034_s23 = scalar_lea.hbm %s7580_s1, 131072 }
  0x33   : > { %p3035_p12 = scmp.lt.u32.totalorder %s3282_s9, %s7580_s1  ;;  %p3036_p0 = scmp.lt.u32.totalorder %s3034_s23, %s3029_s30 }
  0x34   : > { %p3032_p9 = pnand %p3030_p7, %p3001_p13  ;;  %p3038_p3 = scmp.lt.u32.totalorder %s3029_s30, %s3282_s9 }
  0x35   : > { %p3037_p2 = por %p3036_p0, %p3035_p12 }
  0x36   : > { %p3033_p10 = pneg %p3032_p9 }
  0x37   : > { %p3039_p4 = por %p3038_p3, %p3037_p2 }
  0x39   : > { %p3040_p1 = pnand %p3039_p4, %p3033_p10 }
  0x3b   : > { %3043 = shalt.err (!%p3040_p1)
}
  0x3c   : > { %s3044_s25 = scalar_lea.vmem %s3286_s19, 65536  ;;  %s3148_s27 = smov [#allocation5]  }
  0x3d   : > { %p3045_p5 = scmp.ne.s32.totalorder %s3286_s19, %s3044_s25  ;;  %s3049_s7 = sshll.u32 %s3148_s27, 4  ;;  %s3050_s7 = int_to_ptr.vmem [resolvable:$false] %s3049_s7 }
  0x3e   : > { %s3051_s8 = scalar_lea.vmem %s3050_s7, 131072  ;;  %p3052_p8 = scmp.lt.s32.totalorder %s3286_s19, %s3050_s7 }
  0x3f   : > { %p3047_p7 = pnand %p3045_p5, %p3001_p13  ;;  %p3053_p12 = scmp.lt.s32.totalorder %s3051_s8, %s3044_s25 }
  0x41   : > { %p3048_p9 = pneg %p3047_p7  ;;  %p3054_p0 = por %p3053_p12, %p3052_p8 }
  0x43   : > { %p3055_p2 = pnand %p3054_p0, %p3048_p9 }
  0x45   : > { %3058 = shalt.err (!%p3055_p2)
}
  0x46   : > { %2943 = dma.hbm_to_vmem [thread:$0]  (!%p3234_p11), %s3282_s9, 65536, %s3286_s19, %s169_s28, %s3146_s29, %s3146_s29, %s3147_s5  }
  0x47   : > { %195 = sbr.rel (%p3273_p6) target bundleno = 672 (0x2a0), region = 28 }
  0x4e   : > { %s197_s17 = sand.u32 1, %s3127_s10   ;;  %p7586_p8 = scmp.ne.s32.totalorder %s7583_s20, 0 }
  0x4f   : > { %s2919_s30 = sshll.u32 %s197_s17, 12  ;;  %s198_s18 = scalar_lea.sflag [#allocation3], %s197_s17 }
  0x50   : > { %s3320_s4 = scalar_lea.vmem [#allocation2], %s2919_s30 }
  0x51   : > { %3110 = dma.done.wait (%p7586_p8), %s198_s18, 65536  }
  0x52   : > { %3112 = vsyncadd (%p7586_p8), %s198_s18, 4294901760  ;;  %s207_s22 = scalar_lea.sflag [#allocation6], %s197_s17  ;;  %s3326_s3 = scalar_lea.vmem [#allocation5], %s2919_s30 }
  0x53   : > { %3114 = dma.done.wait (%p7586_p8), %s207_s22, 65536  }
  0x54   : > { %3116 = vsyncadd (%p7586_p8), %s207_s22, 4294901760  ;;  %p2921_p11 = scmp.ne.s32.totalorder %s3135_s12, 0 }
  0x55   : > { %v3149_v0 = vmov (!%p2921_p11), 0.0  }
  0x56   : > { %244 = sbr.rel (%p2921_p11) target bundleno = 93 (0x5d), region = 40  ;;  %245 = vst [vmem:[#allocation7] sm:$0xff] (!%p2921_p11), %v3149_v0 }
  0x5d PF: > { %v247_v1 = vld [vmem:[%s3320_s4] sm:$0xff]  ;;  %v248_v2 = vld [vmem:[%s3320_s4 + $0x8] sm:$0xff]  ;;  %v249_v3 = vld [vmem:[%s3320_s4 + $0x10] sm:$0xff]  ;;  %p2922_p13 = scmp.ne.s32.totalorder %s3135_s12, 1 }
  0x5e   : > { %v250_v4 = vld [vmem:[%s3320_s4 + $0x18] sm:$0xff]  ;;  %v251_v5 = vld [vmem:[%s3320_s4 + $0x20] sm:$0xff]  ;;  %v252_v6 = vld [vmem:[%s3320_s4 + $0x28] sm:$0xff] }
  0x5f   : > { %v253_v7 = vld [vmem:[%s3320_s4 + $0x30] sm:$0xff]  ;;  %v254_v8 = vld [vmem:[%s3320_s4 + $0x38] sm:$0xff]  ;;  %v255_v9 = vld [vmem:[%s3320_s4 + $0x40] sm:$0xff] }
  0x60   : > { %v256_v10 = vld [vmem:[%s3320_s4 + $0x48] sm:$0xff]  ;;  %v257_v11 = vld [vmem:[%s3320_s4 + $0x50] sm:$0xff]  ;;  %v258_v12 = vld [vmem:[%s3320_s4 + $0x58] sm:$0xff] }
  0x61   : > { %v259_v13 = vld [vmem:[%s3320_s4 + $0x60] sm:$0xff]  ;;  %v260_v15 = vld [vmem:[%s3320_s4 + $0x68] sm:$0xff]  ;;  %v261_v16 = vld [vmem:[%s3320_s4 + $0x70] sm:$0xff] }
  0x62   : > { %v311_v14 = vld [vmem:[%s3326_s3] sm:$0xff]  ;;  %v262_v17 = vld [vmem:[%s3320_s4 + $0x78] sm:$0xff]  ;;  %v312_v18 = vld [vmem:[%s3326_s3 + $0x8] sm:$0xff] }
  0x63   : > { %v313_v19 = vld [vmem:[%s3326_s3 + $0x10] sm:$0xff]  ;;  %v314_v20 = vld [vmem:[%s3326_s3 + $0x18] sm:$0xff]  ;;  %v375_v21 = vsub.f32 %v247_v1, %v311_v14  ;;  %v263_v22 = vld [vmem:[%s3320_s4 + $0x80] sm:$0xff]  ;;  %v376_v28 = vsub.f32 %v248_v2, %v312_v18 }
  0x64   : > { %v264_v23 = vld [vmem:[%s3320_s4 + $0x88] sm:$0xff]  ;;  %v265_v24 = vld [vmem:[%s3320_s4 + $0x90] sm:$0xff]  ;;  %v315_v25 = vld [vmem:[%s3326_s3 + $0x20] sm:$0xff]  ;;  %v377_v29 = vsub.f32 %v249_v3, %v313_v19  ;;  %v378_v30 = vsub.f32 %v250_v4, %v314_v20 }
  0x65   : > { %v316_v26 = vld [vmem:[%s3326_s3 + $0x28] sm:$0xff]  ;;  %v317_v27 = vld [vmem:[%s3326_s3 + $0x30] sm:$0xff]  ;;  %v266_v31 = vld [vmem:[%s3320_s4 + $0x98] sm:$0xff]  ;;  %v379_v37 = vsub.f32 %v251_v5, %v315_v25  ;;  %v3365_v40 = vmul.f32 %v375_v21, %v375_v21  ;;  %v3379_v50 = vmul.f32 %v376_v28, %v376_v28 }
  0x66   : > { %v267_v32 = vld [vmem:[%s3320_s4 + $0xa0] sm:$0xff]  ;;  %v268_v33 = vld [vmem:[%s3320_s4 + $0xa8] sm:$0xff]  ;;  %v318_v34 = vld [vmem:[%s3326_s3 + $0x38] sm:$0xff]  ;;  %v380_v38 = vsub.f32 %v252_v6, %v316_v26  ;;  %v381_v39 = vsub.f32 %v253_v7, %v317_v27  ;;  %v3393_v60 = vmul.f32 %v377_v29, %v377_v29  ;;  %v3407_v6 = vmul.f32 %v378_v30, %v378_v30 }
  0x67   : > { %v319_v35 = vld [vmem:[%s3326_s3 + $0x40] sm:$0xff]  ;;  %v320_v36 = vld [vmem:[%s3326_s3 + $0x48] sm:$0xff]  ;;  %7587 = vst [vmem:[#allocation11_spill] sm:$0xff] %v3365_v40  ;;  %v269_v41 = vld [vmem:[%s3320_s4 + $0xb0] sm:$0xff]  ;;  %v3373_v47 = vsub.f32 %v254_v8, %v318_v34 }
  0x68   : > { %v270_v42 = vld [vmem:[%s3320_s4 + $0xb8] sm:$0xff]  ;;  %v271_v43 = vld [vmem:[%s3320_s4 + $0xc0] sm:$0xff]  ;;  %v321_v44 = vld [vmem:[%s3326_s3 + $0x50] sm:$0xff]  ;;  %v3375_v48 = vsub.f32 %v255_v9, %v319_v35  ;;  %v3377_v49 = vsub.f32 %v256_v10, %v320_v36  ;;  %7588 = vst [vmem:[#allocation12_spill] sm:$0xff] %v3379_v50  ;;  %v3435_v26 = vmul.f32 %v380_v38, %v380_v38  ;;  %v3449_v36 = vmul.f32 %v381_v39, %v381_v39 }
  0x69   : > { %v322_v45 = vld [vmem:[%s3326_s3 + $0x58] sm:$0xff]  ;;  %v323_v46 = vld [vmem:[%s3326_s3 + $0x60] sm:$0xff]  ;;  %v272_v51 = vld [vmem:[%s3320_s4 + $0xc8] sm:$0xff]  ;;  %v3387_v57 = vsub.f32 %v257_v11, %v321_v44  ;;  %7589 = vst [vmem:[#allocation13_spill] sm:$0xff] %v3393_v60  ;;  %v3465_v39 = vmul.f32 %v3373_v47, %v3373_v47 }
  0x6a   : > { %v273_v52 = vld [vmem:[%s3320_s4 + $0xd0] sm:$0xff]  ;;  %v274_v53 = vld [vmem:[%s3320_s4 + $0xd8] sm:$0xff]  ;;  %v324_v54 = vld [vmem:[%s3326_s3 + $0x68] sm:$0xff]  ;;  %v3389_v58 = vsub.f32 %v258_v12, %v322_v45  ;;  %v3391_v59 = vsub.f32 %v259_v13, %v323_v46  ;;  %7590 = vst [vmem:[#allocation14_spill] sm:$0xff] %v3407_v6  ;;  %v3481_v47 = vmul.f32 %v3375_v48, %v3375_v48  ;;  %v3497_v48 = vmul.f32 %v3377_v49, %v3377_v49 }
  0x6b   : > { %v325_v55 = vld [vmem:[%s3326_s3 + $0x70] sm:$0xff]  ;;  %v326_v56 = vld [vmem:[%s3326_s3 + $0x78] sm:$0xff]  ;;  %v275_v61 = vld [vmem:[%s3320_s4 + $0xe0] sm:$0xff]  ;;  %v3401_v3 = vsub.f32 %v260_v15, %v324_v54  ;;  %7592 = vst [vmem:[#allocation16_spill] sm:$0xff] %v3435_v26  ;;  %v3513_v49 = vmul.f32 %v3387_v57, %v3387_v57 }
  0x6c   : > { %v276_v62 = vld [vmem:[%s3320_s4 + $0xe8] sm:$0xff]  ;;  %v277_v63 = vld [vmem:[%s3320_s4 + $0xf0] sm:$0xff]  ;;  %v327_v0 = vld [vmem:[%s3326_s3 + $0x80] sm:$0xff]  ;;  %v3403_v4 = vsub.f32 %v261_v16, %v325_v55  ;;  %v3405_v5 = vsub.f32 %v262_v17, %v326_v56  ;;  %v3421_v16 = vmul.f32 %v379_v37, %v379_v37  ;;  %7593 = vst [vmem:[#allocation17_spill] sm:$0xff] %v3449_v36  ;;  %v3529_v57 = vmul.f32 %v3389_v58, %v3389_v58 }
  0x6d   : > { %v328_v1 = vld [vmem:[%s3326_s3 + $0x88] sm:$0xff]  ;;  %v329_v2 = vld [vmem:[%s3326_s3 + $0x90] sm:$0xff]  ;;  %v278_v7 = vld [vmem:[%s3320_s4 + $0xf8] sm:$0xff]  ;;  %v3415_v13 = vsub.f32 %v263_v22, %v327_v0  ;;  %7594 = vst [vmem:[#allocation18_spill] sm:$0xff] %v3465_v39  ;;  %v3545_v58 = vmul.f32 %v3391_v59, %v3391_v59  ;;  %v3561_v59 = vmul.f32 %v3401_v3, %v3401_v3 }
  0x6e   : > { %v279_v8 = vld [vmem:[%s3320_s4 + $0x100] sm:$0xff]  ;;  %v280_v9 = vld [vmem:[%s3320_s4 + $0x108] sm:$0xff]  ;;  %v330_v10 = vld [vmem:[%s3326_s3 + $0x98] sm:$0xff]  ;;  %v3417_v14 = vsub.f32 %v264_v23, %v328_v1  ;;  %v3419_v15 = vsub.f32 %v265_v24, %v329_v2  ;;  %7591 = vst [vmem:[#allocation15_spill] sm:$0xff] %v3421_v16 }
  0x6f   : > { %v331_v11 = vld [vmem:[%s3326_s3 + $0xa0] sm:$0xff]  ;;  %v332_v12 = vld [vmem:[%s3326_s3 + $0xa8] sm:$0xff]  ;;  %v281_v17 = vld [vmem:[%s3320_s4 + $0x110] sm:$0xff]  ;;  %v3429_v22 = vsub.f32 %v266_v31, %v330_v10  ;;  %7595 = vst [vmem:[#allocation19_spill] sm:$0xff] %v3481_v47 }
  0x70   : > { %v282_v18 = vld [vmem:[%s3320_s4 + $0x118] sm:$0xff]  ;;  %v283_v19 = vld [vmem:[%s3320_s4 + $0x120] sm:$0xff]  ;;  %v333_v20 = vld [vmem:[%s3326_s3 + $0xb0] sm:$0xff]  ;;  %v3431_v23 = vsub.f32 %v267_v32, %v331_v11  ;;  %v3433_v24 = vsub.f32 %v268_v33, %v332_v12  ;;  %7596 = vst [vmem:[#allocation20_spill] sm:$0xff] %v3497_v48 }
  0x71   : > { %v334_v21 = vld [vmem:[%s3326_s3 + $0xb8] sm:$0xff]  ;;  %v335_v25 = vld [vmem:[%s3326_s3 + $0xc0] sm:$0xff]  ;;  %v284_v27 = vld [vmem:[%s3320_s4 + $0x128] sm:$0xff]  ;;  %v3443_v31 = vsub.f32 %v269_v41, %v333_v20  ;;  %7597 = vst [vmem:[#allocation21_spill] sm:$0xff] %v3513_v49 }
  0x72   : > { %v285_v28 = vld [vmem:[%s3320_s4 + $0x130] sm:$0xff]  ;;  %v286_v29 = vld [vmem:[%s3320_s4 + $0x138] sm:$0xff]  ;;  %v336_v30 = vld [vmem:[%s3326_s3 + $0xc8] sm:$0xff]  ;;  %v3445_v32 = vsub.f32 %v270_v42, %v334_v21  ;;  %v3447_v33 = vsub.f32 %v271_v43, %v335_v25  ;;  %7598 = vst [vmem:[#allocation22_spill] sm:$0xff] %v3529_v57 }
  0x73   : > { %v337_v34 = vld [vmem:[%s3326_s3 + $0xd0] sm:$0xff]  ;;  %v338_v35 = vld [vmem:[%s3326_s3 + $0xd8] sm:$0xff]  ;;  %v287_v37 = vld [vmem:[%s3320_s4 + $0x140] sm:$0xff]  ;;  %v3457_v41 = vsub.f32 %v272_v51, %v336_v30  ;;  %7600 = vst [vmem:[#allocation24_spill] sm:$0xff] %v3545_v58 }
  0x74   : > { %v288_v38 = vld [vmem:[%s3320_s4 + $0x148] sm:$0xff]  ;;  %v289_v44 = vld [vmem:[%s3320_s4 + $0x150] sm:$0xff]  ;;  %v339_v45 = vld [vmem:[%s3326_s3 + $0xe0] sm:$0xff]  ;;  %v3459_v42 = vsub.f32 %v273_v52, %v337_v34  ;;  %v3461_v43 = vsub.f32 %v274_v53, %v338_v35  ;;  %7604 = vst [vmem:[#allocation28_spill] sm:$0xff] %v3561_v59 }
  0x75   : > { %v340_v46 = vld [vmem:[%s3326_s3 + $0xe8] sm:$0xff]  ;;  %v341_v54 = vld [vmem:[%s3326_s3 + $0xf0] sm:$0xff]  ;;  %v290_v55 = vld [vmem:[%s3320_s4 + $0x158] sm:$0xff]  ;;  %v3473_v10 = vsub.f32 %v275_v61, %v339_v45 }
  0x76   : > { %v291_v56 = vld [vmem:[%s3320_s4 + $0x160] sm:$0xff]  ;;  %v292_v0 = vld [vmem:[%s3320_s4 + $0x168] sm:$0xff]  ;;  %v342_v1 = vld [vmem:[%s3326_s3 + $0xf8] sm:$0xff]  ;;  %v3475_v52 = vsub.f32 %v276_v62, %v340_v46  ;;  %v3477_v53 = vsub.f32 %v277_v63, %v341_v54 }
  0x77   : > { %v343_v2 = vld [vmem:[%s3326_s3 + $0x100] sm:$0xff]  ;;  %v344_v51 = vld [vmem:[%s3326_s3 + $0x108] sm:$0xff]  ;;  %v293_v11 = vld [vmem:[%s3320_s4 + $0x170] sm:$0xff]  ;;  %v3489_v30 = vsub.f32 %v278_v7, %v342_v1 }
  0x78   : > { %v294_v12 = vld [vmem:[%s3320_s4 + $0x178] sm:$0xff]  ;;  %v295_v20 = vld [vmem:[%s3320_s4 + $0x180] sm:$0xff]  ;;  %v345_v21 = vld [vmem:[%s3326_s3 + $0x110] sm:$0xff]  ;;  %v3491_v62 = vsub.f32 %v279_v8, %v343_v2  ;;  %v3493_v63 = vsub.f32 %v280_v9, %v344_v51 }
  0x79   : > { %v346_v25 = vld [vmem:[%s3326_s3 + $0x118] sm:$0xff]  ;;  %v347_v61 = vld [vmem:[%s3326_s3 + $0x120] sm:$0xff]  ;;  %v296_v34 = vld [vmem:[%s3320_s4 + $0x188] sm:$0xff]  ;;  %v3505_v1 = vsub.f32 %v281_v17, %v345_v21 }
  0x7a   : > { %v297_v35 = vld [vmem:[%s3320_s4 + $0x190] sm:$0xff]  ;;  %v298_v45 = vld [vmem:[%s3320_s4 + $0x198] sm:$0xff]  ;;  %v348_v46 = vld [vmem:[%s3326_s3 + $0x128] sm:$0xff]  ;;  %v3507_v8 = vsub.f32 %v282_v18, %v346_v25  ;;  %v3509_v9 = vsub.f32 %v283_v19, %v347_v61 }
  0x7b   : > { %v349_v54 = vld [vmem:[%s3326_s3 + $0x130] sm:$0xff]  ;;  %v350_v7 = vld [vmem:[%s3326_s3 + $0x138] sm:$0xff]  ;;  %v299_v2 = vld [vmem:[%s3320_s4 + $0x1a0] sm:$0xff]  ;;  %v3521_v21 = vsub.f32 %v284_v27, %v348_v46 }
  0x7c   : > { %v300_v51 = vld [vmem:[%s3320_s4 + $0x1a8] sm:$0xff]  ;;  %v301_v48 = vld [vmem:[%s3320_s4 + $0x1b0] sm:$0xff]  ;;  %v351_v47 = vld [vmem:[%s3326_s3 + $0x140] sm:$0xff]  ;;  %v3523_v18 = vsub.f32 %v285_v28, %v349_v54  ;;  %v3525_v19 = vsub.f32 %v286_v29, %v350_v7 }
  0x7d   : > { %v352_v39 = vld [vmem:[%s3326_s3 + $0x148] sm:$0xff]  ;;  %v353_v17 = vld [vmem:[%s3326_s3 + $0x150] sm:$0xff]  ;;  %v302_v25 = vld [vmem:[%s3320_s4 + $0x1b8] sm:$0xff]  ;;  %v3537_v46 = vsub.f32 %v287_v37, %v351_v47 }
  0x7e   : > { %v303_v61 = vld [vmem:[%s3320_s4 + $0x1c0] sm:$0xff]  ;;  %v304_v49 = vld [vmem:[%s3320_s4 + $0x1c8] sm:$0xff]  ;;  %v354_v36 = vld [vmem:[%s3326_s3 + $0x158] sm:$0xff]  ;;  %v3539_v28 = vsub.f32 %v288_v38, %v352_v39  ;;  %v3541_v29 = vsub.f32 %v289_v44, %v353_v17 }
  0x7f   : > { %v355_v26 = vld [vmem:[%s3326_s3 + $0x160] sm:$0xff]  ;;  %v356_v27 = vld [vmem:[%s3326_s3 + $0x168] sm:$0xff]  ;;  %v305_v54 = vld [vmem:[%s3320_s4 + $0x1d0] sm:$0xff]  ;;  %v3553_v47 = vsub.f32 %v290_v55, %v354_v36 }
  0x80   : > { %7599 = vst [vmem:[#allocation23_spill] sm:$0xff] %v3541_v29  ;;  %v306_v7 = vld [vmem:[%s3320_s4 + $0x1d8] sm:$0xff]  ;;  %v307_v57 = vld [vmem:[%s3320_s4 + $0x1e0] sm:$0xff]  ;;  %v357_v16 = vld [vmem:[%s3326_s3 + $0x170] sm:$0xff]  ;;  %v3555_v38 = vsub.f32 %v291_v56, %v355_v26  ;;  %v3557_v44 = vsub.f32 %v292_v0, %v356_v27  ;;  %v3571_v26 = vmul.f32 %v3403_v4, %v3403_v4 }
  0x81   : > { %v358_v6 = vld [vmem:[%s3326_s3 + $0x178] sm:$0xff]  ;;  %v359_v37 = vld [vmem:[%s3326_s3 + $0x180] sm:$0xff]  ;;  %7601 = vst [vmem:[#allocation25_spill] sm:$0xff] %v3553_v47  ;;  %v308_v39 = vld [vmem:[%s3320_s4 + $0x1e8] sm:$0xff]  ;;  %v421_v36 = vsub.f32 %v293_v11, %v357_v16 }
  0x82   : > { %7602 = vst [vmem:[#allocation26_spill] sm:$0xff] %v3555_v38  ;;  %7603 = vst [vmem:[#allocation27_spill] sm:$0xff] %v3557_v44  ;;  %v309_v17 = vld [vmem:[%s3320_s4 + $0x1f0] sm:$0xff]  ;;  %v310_v58 = vld [vmem:[%s3320_s4 + $0x1f8] sm:$0xff]  ;;  %v422_v55 = vsub.f32 %v294_v12, %v358_v6  ;;  %v423_v47 = vsub.f32 %v295_v20, %v359_v37  ;;  %v3578_v38 = vmul.f32 %v3405_v5, %v3405_v5 }
  0x83   : > { %v360_v60 = vld [vmem:[%s3326_s3 + $0x188] sm:$0xff]  ;;  %v361_v50 = vld [vmem:[%s3326_s3 + $0x190] sm:$0xff]  ;;  %v362_v40 = vld [vmem:[%s3326_s3 + $0x198] sm:$0xff]  ;;  %7605 = vst [vmem:[#allocation29_spill] sm:$0xff] %v3571_v26  ;;  %v3585_v37 = vmul.f32 %v3415_v13, %v3415_v13  ;;  %v3592_v5 = vmul.f32 %v3417_v14, %v3417_v14  ;;  %v3599_v13 = vmul.f32 %v3419_v15, %v3419_v15  ;;  %v3607_v14 = vmul.f32 %v3431_v23, %v3431_v23 }
  0x84   : > { %v363_v3 = vld [vmem:[%s3326_s3 + $0x1a0] sm:$0xff]  ;;  %v364_v56 = vld [vmem:[%s3326_s3 + $0x1a8] sm:$0xff]  ;;  %v365_v0 = vld [vmem:[%s3326_s3 + $0x1b0] sm:$0xff]  ;;  %v424_v27 = vsub.f32 %v296_v34, %v360_v60  ;;  %v425_v59 = vsub.f32 %v297_v35, %v361_v50  ;;  %v426_v44 = vsub.f32 %v298_v45, %v362_v40  ;;  %7606 = vst [vmem:[#allocation30_spill] sm:$0xff] %v3578_v38  ;;  %v3619_v15 = vmul.f32 %v3445_v32, %v3445_v32 }
  0x85   : > { %v366_v6 = vld [vmem:[%s3326_s3 + $0x1b8] sm:$0xff]  ;;  %v367_v16 = vld [vmem:[%s3326_s3 + $0x1c0] sm:$0xff]  ;;  %v368_v11 = vld [vmem:[%s3326_s3 + $0x1c8] sm:$0xff]  ;;  %v427_v4 = vsub.f32 %v299_v2, %v363_v3  ;;  %v428_v12 = vsub.f32 %v300_v51, %v364_v56  ;;  %v429_v20 = vsub.f32 %v301_v48, %v365_v0  ;;  %v3627_v23 = vmul.f32 %v3457_v41, %v3457_v41 }
  0x86   : > { %v369_v60 = vld [vmem:[%s3326_s3 + $0x1d0] sm:$0xff]  ;;  %v370_v50 = vld [vmem:[%s3326_s3 + $0x1d8] sm:$0xff]  ;;  %v371_v40 = vld [vmem:[%s3326_s3 + $0x1e0] sm:$0xff]  ;;  %v430_v34 = vsub.f32 %v302_v25, %v366_v6  ;;  %v431_v35 = vsub.f32 %v303_v61, %v367_v16  ;;  %v432_v45 = vsub.f32 %v304_v49, %v368_v11  ;;  %v3603_v49 = vmul.f32 %v3429_v22, %v3429_v22 }
  0x87   : > { %v372_v38 = vld [vmem:[%s3326_s3 + $0x1e8] sm:$0xff]  ;;  %v373_v26 = vld [vmem:[%s3326_s3 + $0x1f0] sm:$0xff]  ;;  %v374_v29 = vld [vmem:[%s3326_s3 + $0x1f8] sm:$0xff]  ;;  %v433_v2 = vsub.f32 %v305_v54, %v369_v60  ;;  %v434_v51 = vsub.f32 %v306_v7, %v370_v50  ;;  %v435_v48 = vsub.f32 %v307_v57, %v371_v40  ;;  %v3611_v25 = vmul.f32 %v3433_v24, %v3433_v24 }
  0x88   : > { %v436_v3 = vsub.f32 %v308_v39, %v372_v38  ;;  %v437_v56 = vsub.f32 %v309_v17, %v373_v26  ;;  %v438_v0 = vsub.f32 %v310_v58, %v374_v29  ;;  %v3615_v57 = vmul.f32 %v3443_v31, %v3443_v31  ;;  %v7612_v58 = vld [vmem:[#allocation23_spill] sm:$0xff]  ;;  %v7613_v54 = vld [vmem:[#allocation25_spill] sm:$0xff] }
  0x89   : > { %v3623_v22 = vmul.f32 %v3447_v33, %v3447_v33  ;;  %v3631_v24 = vmul.f32 %v3459_v42, %v3459_v42  ;;  %v3635_v31 = vmul.f32 %v3461_v43, %v3461_v43  ;;  %v3639_v32 = vmul.f32 %v3473_v10, %v3473_v10  ;;  %v7614_v7 = vld [vmem:[#allocation26_spill] sm:$0xff]  ;;  %v7615_v38 = vld [vmem:[#allocation27_spill] sm:$0xff] }
  0x8a   : > { %v3643_v33 = vmul.f32 %v3475_v52, %v3475_v52  ;;  %v3647_v41 = vmul.f32 %v3477_v53, %v3477_v53  ;;  %v3651_v42 = vmul.f32 %v3489_v30, %v3489_v30  ;;  %v471_v43 = vmul.f32 %v3491_v62, %v3491_v62 }
  0x8b   : > { %7607 = vst [vmem:[#allocation31_spill] sm:$0xff] %v3635_v31  ;;  %7608 = vst [vmem:[#allocation32_spill] sm:$0xff] %v3639_v32  ;;  %v472_v61 = vmul.f32 %v3493_v63, %v3493_v63  ;;  %v473_v10 = vmul.f32 %v3505_v1, %v3505_v1  ;;  %v474_v52 = vmul.f32 %v3507_v8, %v3507_v8  ;;  %v7616_v32 = vld [vmem:[#allocation11_spill] sm:$0xff]  ;;  %v7626_v31 = vld [vmem:[#allocation21_spill] sm:$0xff] }
  0x8c   : > { %7609 = vst [vmem:[#allocation33_spill] sm:$0xff] %v3643_v33  ;;  %7610 = vst [vmem:[#allocation34_spill] sm:$0xff] %v3647_v41  ;;  %v475_v53 = vmul.f32 %v3509_v9, %v3509_v9  ;;  %v476_v29 = vmul.f32 %v3521_v21, %v3521_v21  ;;  %v477_v30 = vmul.f32 %v3523_v18, %v3523_v18 }
  0x8d   : > { %7611 = vst [vmem:[#allocation35_spill] sm:$0xff] %v3651_v42  ;;  %v478_v62 = vmul.f32 %v3525_v19, %v3525_v19  ;;  %v479_v63 = vmul.f32 %v3537_v46, %v3537_v46  ;;  %v480_v1 = vmul.f32 %v3539_v28, %v3539_v28  ;;  %v481_v8 = vmul.f32 %v7612_v58, %v7612_v58 }
  0x8e   : > { %v482_v9 = vmul.f32 %v7613_v54, %v7613_v54  ;;  %v483_v21 = vmul.f32 %v7614_v7, %v7614_v7  ;;  %v484_v18 = vmul.f32 %v7615_v38, %v7615_v38  ;;  %v485_v39 = vmul.f32 %v421_v36, %v421_v36  ;;  %v7617_v36 = vld [vmem:[#allocation12_spill] sm:$0xff] }
  0x8f   : > { %v486_v19 = vmul.f32 %v422_v55, %v422_v55  ;;  %v487_v17 = vmul.f32 %v423_v47, %v423_v47  ;;  %v488_v26 = vmul.f32 %v424_v27, %v424_v27  ;;  %v489_v46 = vmul.f32 %v425_v59, %v425_v59  ;;  %v7618_v47 = vld [vmem:[#allocation13_spill] sm:$0xff]  ;;  %v7619_v59 = vld [vmem:[#allocation14_spill] sm:$0xff] }
  0x90   : > { %v490_v6 = vmul.f32 %v426_v44, %v426_v44  ;;  %v491_v16 = vmul.f32 %v427_v4, %v427_v4  ;;  %v492_v28 = vmul.f32 %v428_v12, %v428_v12  ;;  %v493_v11 = vmul.f32 %v429_v20, %v429_v20  ;;  %v7620_v4 = vld [vmem:[#allocation15_spill] sm:$0xff]  ;;  %v7621_v20 = vld [vmem:[#allocation16_spill] sm:$0xff] }
  0x91   : > { %v494_v60 = vmul.f32 %v430_v34, %v430_v34  ;;  %v495_v50 = vmul.f32 %v431_v35, %v431_v35  ;;  %v496_v40 = vmul.f32 %v432_v45, %v432_v45  ;;  %v497_v58 = vmul.f32 %v433_v2, %v433_v2  ;;  %v7622_v35 = vld [vmem:[#allocation17_spill] sm:$0xff]  ;;  %v7623_v2 = vld [vmem:[#allocation18_spill] sm:$0xff] }
  0x92   : > { %v498_v54 = vmul.f32 %v434_v51, %v434_v51  ;;  %v499_v42 = vmul.f32 %v435_v48, %v435_v48  ;;  %v500_v41 = vmul.f32 %v436_v3, %v436_v3  ;;  %v501_v7 = vmul.f32 %v437_v56, %v437_v56  ;;  %v7624_v48 = vld [vmem:[#allocation19_spill] sm:$0xff]  ;;  %v7625_v56 = vld [vmem:[#allocation20_spill] sm:$0xff] }
  0x93   : > { %v502_v33 = vmul.f32 %v438_v0, %v438_v0  ;;  %v503_v38 = vadd.f32 %v471_v43, %v7616_v32  ;;  %v504_v55 = vadd.f32 %v472_v61, %v7617_v36  ;;  %v505_v27 = vadd.f32 %v473_v10, %v7618_v47  ;;  %v7627_v43 = vld [vmem:[#allocation22_spill] sm:$0xff]  ;;  %v7628_v36 = vld [vmem:[#allocation24_spill] sm:$0xff] }
  0x94   : > { %v506_v44 = vadd.f32 %v474_v52, %v7619_v59  ;;  %v507_v12 = vadd.f32 %v475_v53, %v7620_v4  ;;  %v508_v34 = vadd.f32 %v476_v29, %v7621_v20  ;;  %v509_v45 = vadd.f32 %v477_v30, %v7622_v35  ;;  %v7629_v47 = vld [vmem:[#allocation28_spill] sm:$0xff]  ;;  %v7630_v59 = vld [vmem:[#allocation29_spill] sm:$0xff]  ;;  %v7631_v4 = vld [vmem:[#allocation30_spill] sm:$0xff] }
  0x95   : > { %v510_v51 = vadd.f32 %v478_v62, %v7623_v2  ;;  %v511_v3 = vadd.f32 %v479_v63, %v7624_v48  ;;  %v512_v0 = vadd.f32 %v480_v1, %v7625_v56  ;;  %v513_v32 = vadd.f32 %v481_v8, %v7626_v31  ;;  %v570_v20 = vld [vmem:[%s3320_s4 + $0x218] sm:$0xff]  ;;  %v572_v35 = vld [vmem:[%s3320_s4 + $0x228] sm:$0xff] }
  0x96   : > { %v514_v61 = vadd.f32 %v482_v9, %v7627_v43  ;;  %v515_v10 = vadd.f32 %v483_v21, %v7628_v36  ;;  %v516_v52 = vadd.f32 %v484_v18, %v7629_v47  ;;  %v517_v53 = vadd.f32 %v485_v39, %v7630_v59  ;;  %v634_v2 = vld [vmem:[%s3326_s3 + $0x218] sm:$0xff]  ;;  %v636_v48 = vld [vmem:[%s3326_s3 + $0x228] sm:$0xff]  ;;  %v637_v36 = vld [vmem:[%s3326_s3 + $0x230] sm:$0xff] }
  0x97   : > { %v518_v29 = vadd.f32 %v486_v19, %v7631_v4  ;;  %v519_v30 = vadd.f32 %v487_v17, %v3585_v37  ;;  %v520_v62 = vadd.f32 %v488_v26, %v3592_v5  ;;  %v521_v63 = vadd.f32 %v489_v46, %v3599_v13  ;;  %v7632_v5 = vld [vmem:[#allocation31_spill] sm:$0xff]  ;;  %v574_v43 = vld [vmem:[%s3320_s4 + $0x238] sm:$0xff]  ;;  %v639_v47 = vld [vmem:[%s3326_s3 + $0x240] sm:$0xff] }
  0x98   : > { %v522_v1 = vadd.f32 %v490_v6, %v3603_v49  ;;  %v523_v31 = vadd.f32 %v491_v16, %v3607_v14  ;;  %v524_v8 = vadd.f32 %v492_v28, %v3611_v25  ;;  %v525_v9 = vadd.f32 %v493_v11, %v3615_v57  ;;  %v7633_v49 = vld [vmem:[#allocation32_spill] sm:$0xff]  ;;  %v7634_v14 = vld [vmem:[#allocation33_spill] sm:$0xff]  ;;  %v7635_v25 = vld [vmem:[#allocation34_spill] sm:$0xff] }
  0x99   : > { %v526_v21 = vadd.f32 %v494_v60, %v3619_v15  ;;  %v527_v18 = vadd.f32 %v495_v50, %v3623_v22  ;;  %v528_v39 = vadd.f32 %v496_v40, %v3627_v23  ;;  %v529_v37 = vadd.f32 %v497_v58, %v3631_v24  ;;  %v7636_v57 = vld [vmem:[#allocation35_spill] sm:$0xff]  ;;  %v569_v60 = vld [vmem:[%s3320_s4 + $0x210] sm:$0xff] }
  0x9a   : > { %v530_v13 = vadd.f32 %v498_v54, %v7632_v5  ;;  %v531_v19 = vadd.f32 %v499_v42, %v7633_v49  ;;  %v532_v17 = vadd.f32 %v500_v41, %v7634_v14  ;;  %v533_v26 = vadd.f32 %v501_v7, %v7635_v25  ;;  %v567_v42 = vld [vmem:[%s3320_s4 + $0x200] sm:$0xff]  ;;  %v568_v41 = vld [vmem:[%s3320_s4 + $0x208] sm:$0xff]  ;;  %v646_v49 = vld [vmem:[%s3326_s3 + $0x278] sm:$0xff] }
  0x9b   : > { %v534_v46 = vadd.f32 %v502_v33, %v7636_v57  ;;  %v535_v15 = vadd.f32 %v519_v30, %v503_v38  ;;  %v536_v22 = vadd.f32 %v520_v62, %v504_v55  ;;  %v537_v23 = vadd.f32 %v521_v63, %v505_v27  ;;  %v631_v54 = vld [vmem:[%s3326_s3 + $0x200] sm:$0xff]  ;;  %v632_v7 = vld [vmem:[%s3326_s3 + $0x208] sm:$0xff]  ;;  %v633_v38 = vld [vmem:[%s3326_s3 + $0x210] sm:$0xff] }
  0x9c   : > { %v538_v6 = vadd.f32 %v522_v1, %v506_v44  ;;  %v539_v16 = vadd.f32 %v523_v31, %v507_v12  ;;  %v540_v24 = vadd.f32 %v524_v8, %v508_v34  ;;  %v541_v28 = vadd.f32 %v525_v9, %v509_v45  ;;  %v571_v34 = vld [vmem:[%s3320_s4 + $0x220] sm:$0xff]  ;;  %v573_v45 = vld [vmem:[%s3320_s4 + $0x230] sm:$0xff]  ;;  %v578_v62 = vld [vmem:[%s3320_s4 + $0x258] sm:$0xff] }
  0x9d   : > { %v542_v11 = vadd.f32 %v526_v21, %v510_v51  ;;  %v543_v33 = vadd.f32 %v527_v18, %v511_v3  ;;  %v544_v50 = vadd.f32 %v528_v39, %v512_v0  ;;  %v545_v40 = vadd.f32 %v529_v37, %v513_v32  ;;  %v635_v51 = vld [vmem:[%s3326_s3 + $0x220] sm:$0xff]  ;;  %v577_v30 = vld [vmem:[%s3320_s4 + $0x250] sm:$0xff]  ;;  %v640_v1 = vld [vmem:[%s3326_s3 + $0x248] sm:$0xff] }
  0x9e   : > { %v546_v58 = vadd.f32 %v530_v13, %v514_v61  ;;  %v547_v55 = vadd.f32 %v531_v19, %v515_v10  ;;  %v548_v27 = vadd.f32 %v532_v17, %v516_v52  ;;  %v549_v44 = vadd.f32 %v533_v26, %v517_v53  ;;  %v575_v61 = vld [vmem:[%s3320_s4 + $0x240] sm:$0xff]  ;;  %v638_v10 = vld [vmem:[%s3326_s3 + $0x238] sm:$0xff]  ;;  %v641_v31 = vld [vmem:[%s3326_s3 + $0x250] sm:$0xff] }
  0x9f   : > { %v550_v12 = vadd.f32 %v534_v46, %v518_v29  ;;  %v551_v3 = vadd.f32 %v543_v33, %v535_v15  ;;  %v552_v56 = vadd.f32 %v544_v50, %v536_v22  ;;  %v553_v0 = vadd.f32 %v545_v40, %v537_v23  ;;  %v576_v29 = vld [vmem:[%s3320_s4 + $0x248] sm:$0xff]  ;;  %v579_v63 = vld [vmem:[%s3320_s4 + $0x260] sm:$0xff]  ;;  %v642_v8 = vld [vmem:[%s3326_s3 + $0x258] sm:$0xff] }
  0xa0   : > { %v554_v32 = vadd.f32 %v546_v58, %v538_v6  ;;  %v555_v52 = vadd.f32 %v547_v55, %v539_v16  ;;  %v556_v59 = vadd.f32 %v548_v27, %v540_v24  ;;  %v557_v53 = vadd.f32 %v549_v44, %v541_v28  ;;  %v643_v9 = vld [vmem:[%s3326_s3 + $0x260] sm:$0xff]  ;;  %v580_v21 = vld [vmem:[%s3320_s4 + $0x268] sm:$0xff]  ;;  %v581_v18 = vld [vmem:[%s3320_s4 + $0x270] sm:$0xff] }
  0xa1   : > { %v558_v4 = vadd.f32 %v550_v12, %v542_v11  ;;  %v582_v39 = vld [vmem:[%s3320_s4 + $0x278] sm:$0xff]  ;;  %v583_v37 = vld [vmem:[%s3320_s4 + $0x280] sm:$0xff]  ;;  %v644_v5 = vld [vmem:[%s3326_s3 + $0x268] sm:$0xff]  ;;  %v3747_v14 = vsub.f32 %v567_v42, %v631_v54  ;;  %v3749_v17 = vsub.f32 %v568_v41, %v632_v7  ;;  %v3751_v25 = vsub.f32 %v569_v60, %v633_v38 }
  0xa2   : > { %v645_v13 = vld [vmem:[%s3326_s3 + $0x270] sm:$0xff]  ;;  %v647_v19 = vld [vmem:[%s3326_s3 + $0x280] sm:$0xff]  ;;  %v559_v26 = vadd.f32 %v555_v52, %v551_v3  ;;  %v560_v57 = vadd.f32 %v556_v59, %v552_v56  ;;  %v561_v46 = vadd.f32 %v557_v53, %v553_v0  ;;  %v584_v22 = vld [vmem:[%s3320_s4 + $0x288] sm:$0xff]  ;;  %v3767_v54 = vsub.f32 %v570_v20, %v634_v2 }
  0xa3   : > { %v562_v15 = vadd.f32 %v558_v4, %v554_v32  ;;  %v585_v23 = vld [vmem:[%s3320_s4 + $0x290] sm:$0xff]  ;;  %v586_v6 = vld [vmem:[%s3320_s4 + $0x298] sm:$0xff]  ;;  %v587_v16 = vld [vmem:[%s3320_s4 + $0x2a0] sm:$0xff]  ;;  %v3769_v7 = vsub.f32 %v571_v34, %v635_v51  ;;  %v3771_v38 = vsub.f32 %v572_v35, %v636_v48  ;;  %v3773_v55 = vsub.f32 %v573_v45, %v637_v36 }
  0xa4   : > { %v648_v24 = vld [vmem:[%s3326_s3 + $0x288] sm:$0xff]  ;;  %v649_v28 = vld [vmem:[%s3326_s3 + $0x290] sm:$0xff]  ;;  %v650_v11 = vld [vmem:[%s3326_s3 + $0x298] sm:$0xff]  ;;  %v3775_v27 = vadd.f32 %v561_v46, %v559_v26  ;;  %v3786_v51 = vsub.f32 %v574_v43, %v638_v10  ;;  %v3788_v45 = vsub.f32 %v575_v61, %v639_v47  ;;  %v3797_v4 = vsub.f32 %v576_v29, %v640_v1 }
  0xa5   : > { %v588_v42 = vld [vmem:[%s3320_s4 + $0x2a8] sm:$0xff]  ;;  %v589_v41 = vld [vmem:[%s3320_s4 + $0x2b0] sm:$0xff]  ;;  %v590_v60 = vld [vmem:[%s3320_s4 + $0x2b8] sm:$0xff]  ;;  %v3777_v44 = vadd.f32 %v562_v15, %v560_v57  ;;  %v3799_v26 = vsub.f32 %v577_v30, %v641_v31  ;;  %v3801_v43 = vsub.f32 %v578_v62, %v642_v8  ;;  %v3803_v61 = vsub.f32 %v579_v63, %v643_v9 }
  0xa6   : > { %v591_v33 = vld [vmem:[%s3320_s4 + $0x2c0] sm:$0xff]  ;;  %v652_v40 = vld [vmem:[%s3326_s3 + $0x2a8] sm:$0xff]  ;;  %v653_v58 = vld [vmem:[%s3326_s3 + $0x2b0] sm:$0xff]  ;;  %7637 = vst [vmem:[#allocation23_spill] sm:$0xff] %v3775_v27  ;;  %v3812_v1 = vsub.f32 %v580_v21, %v644_v5  ;;  %v3814_v30 = vsub.f32 %v581_v18, %v645_v13  ;;  %v3816_v62 = vsub.f32 %v582_v39, %v646_v49  ;;  %v3818_v63 = vsub.f32 %v583_v37, %v647_v19 }
  0xa7   : > { %v651_v50 = vld [vmem:[%s3326_s3 + $0x2a0] sm:$0xff]  ;;  %7638 = vst [vmem:[#allocation25_spill] sm:$0xff] %v3777_v44  ;;  %v592_v12 = vld [vmem:[%s3320_s4 + $0x2c8] sm:$0xff]  ;;  %v593_v3 = vld [vmem:[%s3320_s4 + $0x2d0] sm:$0xff]  ;;  %v3827_v5 = vsub.f32 %v584_v22, %v648_v24  ;;  %v3829_v18 = vsub.f32 %v585_v23, %v649_v28  ;;  %v3831_v39 = vsub.f32 %v586_v6, %v650_v11  ;;  %v3842_v24 = vsub.f32 %v588_v42, %v652_v40 }
  0xa8   : > { %v594_v20 = vld [vmem:[%s3320_s4 + $0x2d8] sm:$0xff]  ;;  %v595_v2 = vld [vmem:[%s3320_s4 + $0x2e0] sm:$0xff]  ;;  %v656_v35 = vld [vmem:[%s3326_s3 + $0x2c8] sm:$0xff]  ;;  %7639 = vst [vmem:[#allocation26_spill] sm:$0xff] %v3801_v43  ;;  %v3833_v37 = vsub.f32 %v587_v16, %v651_v50  ;;  %v3844_v23 = vsub.f32 %v589_v41, %v653_v58 }
  0xa9   : > { %v654_v56 = vld [vmem:[%s3326_s3 + $0x2b8] sm:$0xff]  ;;  %v655_v34 = vld [vmem:[%s3326_s3 + $0x2c0] sm:$0xff]  ;;  %v596_v48 = vld [vmem:[%s3320_s4 + $0x2e8] sm:$0xff]  ;;  %7640 = vst [vmem:[#allocation27_spill] sm:$0xff] %v3803_v61  ;;  %v3857_v40 = vsub.f32 %v592_v12, %v656_v35 }
  0xaa   : > { %v597_v0 = vld [vmem:[%s3320_s4 + $0x2f0] sm:$0xff]  ;;  %v598_v32 = vld [vmem:[%s3320_s4 + $0x2f8] sm:$0xff]  ;;  %v599_v36 = vld [vmem:[%s3320_s4 + $0x300] sm:$0xff]  ;;  %7641 = vst [vmem:[#allocation11_spill] sm:$0xff] %v3814_v30  ;;  %v3846_v6 = vsub.f32 %v590_v60, %v654_v56  ;;  %v3848_v16 = vsub.f32 %v591_v33, %v655_v34 }
  0xab   : > { %v657_v52 = vld [vmem:[%s3326_s3 + $0x2d0] sm:$0xff]  ;;  %v658_v59 = vld [vmem:[%s3326_s3 + $0x2d8] sm:$0xff]  ;;  %v659_v53 = vld [vmem:[%s3326_s3 + $0x2e0] sm:$0xff]  ;;  %7642 = vst [vmem:[#allocation12_spill] sm:$0xff] %v3816_v62 }
  0xac   : > { %v600_v10 = vld [vmem:[%s3320_s4 + $0x308] sm:$0xff]  ;;  %v601_v47 = vld [vmem:[%s3320_s4 + $0x310] sm:$0xff]  ;;  %v602_v57 = vld [vmem:[%s3320_s4 + $0x318] sm:$0xff]  ;;  %7643 = vst [vmem:[#allocation13_spill] sm:$0xff] %v3818_v63  ;;  %v3859_v41 = vsub.f32 %v593_v3, %v657_v52  ;;  %v3861_v60 = vsub.f32 %v594_v20, %v658_v59  ;;  %v3863_v33 = vsub.f32 %v595_v2, %v659_v53 }
  0xad   : > { %v603_v46 = vld [vmem:[%s3320_s4 + $0x320] sm:$0xff]  ;;  %v660_v15 = vld [vmem:[%s3326_s3 + $0x2e8] sm:$0xff]  ;;  %v661_v44 = vld [vmem:[%s3326_s3 + $0x2f0] sm:$0xff]  ;;  %7644 = vst [vmem:[#allocation14_spill] sm:$0xff] %v3829_v18 }
  0xae   : > { %v662_v29 = vld [vmem:[%s3326_s3 + $0x2f8] sm:$0xff]  ;;  %v604_v31 = vld [vmem:[%s3320_s4 + $0x328] sm:$0xff]  ;;  %v605_v8 = vld [vmem:[%s3320_s4 + $0x330] sm:$0xff]  ;;  %7645 = vst [vmem:[#allocation15_spill] sm:$0xff] %v3831_v39  ;;  %v3872_v35 = vsub.f32 %v596_v48, %v660_v15  ;;  %v3874_v3 = vsub.f32 %v597_v0, %v661_v44 }
  0xaf   : > { %v606_v9 = vld [vmem:[%s3320_s4 + $0x338] sm:$0xff]  ;;  %v607_v27 = vld [vmem:[%s3320_s4 + $0x340] sm:$0xff]  ;;  %v664_v43 = vld [vmem:[%s3326_s3 + $0x308] sm:$0xff]  ;;  %7646 = vst [vmem:[#allocation16_spill] sm:$0xff] %v3833_v37  ;;  %v3876_v20 = vsub.f32 %v598_v32, %v662_v29 }
  0xb0   : > { %v663_v61 = vld [vmem:[%s3326_s3 + $0x300] sm:$0xff]  ;;  %v665_v21 = vld [vmem:[%s3326_s3 + $0x310] sm:$0xff]  ;;  %v608_v13 = vld [vmem:[%s3320_s4 + $0x348] sm:$0xff]  ;;  %7647 = vst [vmem:[#allocation17_spill] sm:$0xff] %v3844_v23  ;;  %v3887_v15 = vsub.f32 %v600_v10, %v664_v43 }
  0xb1   : > { %v609_v49 = vld [vmem:[%s3320_s4 + $0x350] sm:$0xff]  ;;  %v610_v19 = vld [vmem:[%s3320_s4 + $0x358] sm:$0xff]  ;;  %v611_v63 = vld [vmem:[%s3320_s4 + $0x360] sm:$0xff]  ;;  %7648 = vst [vmem:[#allocation18_spill] sm:$0xff] %v3846_v6  ;;  %v3878_v2 = vsub.f32 %v599_v36, %v663_v61  ;;  %v3889_v44 = vsub.f32 %v601_v47, %v665_v21 }
  0xb2   : > { %v666_v62 = vld [vmem:[%s3326_s3 + $0x318] sm:$0xff]  ;;  %v667_v30 = vld [vmem:[%s3326_s3 + $0x320] sm:$0xff]  ;;  %v668_v22 = vld [vmem:[%s3326_s3 + $0x328] sm:$0xff]  ;;  %7649 = vst [vmem:[#allocation19_spill] sm:$0xff] %v3848_v16 }
  0xb3   : > { %v612_v28 = vld [vmem:[%s3320_s4 + $0x368] sm:$0xff]  ;;  %v613_v11 = vld [vmem:[%s3320_s4 + $0x370] sm:$0xff]  ;;  %v614_v50 = vld [vmem:[%s3320_s4 + $0x378] sm:$0xff]  ;;  %7650 = vst [vmem:[#allocation20_spill] sm:$0xff] %v3859_v41  ;;  %v3891_v0 = vsub.f32 %v602_v57, %v666_v62  ;;  %v3893_v32 = vsub.f32 %v603_v46, %v667_v30  ;;  %v3902_v10 = vsub.f32 %v604_v31, %v668_v22 }
  0xb4   : > { %v615_v37 = vld [vmem:[%s3320_s4 + $0x380] sm:$0xff]  ;;  %v669_v39 = vld [vmem:[%s3326_s3 + $0x330] sm:$0xff]  ;;  %v670_v18 = vld [vmem:[%s3326_s3 + $0x338] sm:$0xff]  ;;  %7651 = vst [vmem:[#allocation21_spill] sm:$0xff] %v3861_v60 }
  0xb5   : > { %v671_v42 = vld [vmem:[%s3326_s3 + $0x340] sm:$0xff]  ;;  %7652 = vst [vmem:[#allocation22_spill] sm:$0xff] %v3863_v33  ;;  %v616_v58 = vld [vmem:[%s3320_s4 + $0x388] sm:$0xff]  ;;  %v617_v56 = vld [vmem:[%s3320_s4 + $0x390] sm:$0xff]  ;;  %v3904_v47 = vsub.f32 %v605_v8, %v669_v39  ;;  %v3906_v57 = vsub.f32 %v606_v9, %v670_v18 }
  0xb6   : > { %v618_v34 = vld [vmem:[%s3320_s4 + $0x398] sm:$0xff]  ;;  %v619_v16 = vld [vmem:[%s3320_s4 + $0x3a0] sm:$0xff]  ;;  %v672_v6 = vld [vmem:[%s3326_s3 + $0x348] sm:$0xff]  ;;  %7653 = vst [vmem:[#allocation24_spill] sm:$0xff] %v3874_v3  ;;  %v3908_v46 = vsub.f32 %v607_v27, %v671_v42 }
  0xb7   : > { %v673_v23 = vld [vmem:[%s3326_s3 + $0x350] sm:$0xff]  ;;  %v674_v12 = vld [vmem:[%s3326_s3 + $0x358] sm:$0xff]  ;;  %7654 = vst [vmem:[#allocation28_spill] sm:$0xff] %v3876_v20  ;;  %7655 = vst [vmem:[#allocation29_spill] sm:$0xff] %v3878_v2 }
  0xb8   : > { %v620_v52 = vld [vmem:[%s3320_s4 + $0x3a8] sm:$0xff]  ;;  %v621_v59 = vld [vmem:[%s3320_s4 + $0x3b0] sm:$0xff]  ;;  %v622_v53 = vld [vmem:[%s3320_s4 + $0x3b8] sm:$0xff]  ;;  %7656 = vst [vmem:[#allocation30_spill] sm:$0xff] %v3887_v15  ;;  %v3916_v15 = vsub.f32 %v608_v13, %v672_v6  ;;  %v3918_v31 = vsub.f32 %v609_v49, %v673_v23  ;;  %v3920_v22 = vsub.f32 %v610_v19, %v674_v12 }
  0xb9   : > { %v623_v33 = vld [vmem:[%s3320_s4 + $0x3c0] sm:$0xff]  ;;  %v676_v41 = vld [vmem:[%s3326_s3 + $0x368] sm:$0xff]  ;;  %v677_v48 = vld [vmem:[%s3326_s3 + $0x370] sm:$0xff]  ;;  %7657 = vst [vmem:[#allocation31_spill] sm:$0xff] %v3889_v44 }
  0xba   : > { %v675_v60 = vld [vmem:[%s3326_s3 + $0x360] sm:$0xff]  ;;  %7658 = vst [vmem:[#allocation32_spill] sm:$0xff] %v3891_v0  ;;  %7659 = vst [vmem:[#allocation33_spill] sm:$0xff] %v3893_v32  ;;  %v624_v36 = vld [vmem:[%s3320_s4 + $0x3c8] sm:$0xff]  ;;  %v3927_v39 = vsub.f32 %v612_v28, %v676_v41  ;;  %v3929_v42 = vsub.f32 %v613_v11, %v677_v48 }
  0xbb   : > { %v625_v61 = vld [vmem:[%s3320_s4 + $0x3d0] sm:$0xff]  ;;  %v626_v29 = vld [vmem:[%s3320_s4 + $0x3d8] sm:$0xff]  ;;  %v627_v2 = vld [vmem:[%s3320_s4 + $0x3e0] sm:$0xff]  ;;  %7660 = vst [vmem:[#allocation34_spill] sm:$0xff] %v3908_v46  ;;  %v3922_v8 = vsub.f32 %v611_v63, %v675_v60 }
  0xbc   : > { %v678_v20 = vld [vmem:[%s3326_s3 + $0x378] sm:$0xff]  ;;  %v679_v3 = vld [vmem:[%s3326_s3 + $0x380] sm:$0xff]  ;;  %v680_v43 = vld [vmem:[%s3326_s3 + $0x388] sm:$0xff] }
  0xbd   : > { %v628_v30 = vld [vmem:[%s3320_s4 + $0x3e8] sm:$0xff]  ;;  %v629_v62 = vld [vmem:[%s3320_s4 + $0x3f0] sm:$0xff]  ;;  %v630_v21 = vld [vmem:[%s3320_s4 + $0x3f8] sm:$0xff]  ;;  %v3931_v46 = vsub.f32 %v614_v50, %v678_v20  ;;  %v3933_v13 = vsub.f32 %v615_v37, %v679_v3  ;;  %v3938_v63 = vsub.f32 %v616_v58, %v680_v43 }
  0xbe   : > { %v681_v32 = vld [vmem:[%s3326_s3 + $0x390] sm:$0xff]  ;;  %v682_v0 = vld [vmem:[%s3326_s3 + $0x398] sm:$0xff]  ;;  %v683_v44 = vld [vmem:[%s3326_s3 + $0x3a0] sm:$0xff] }
  0xbf   : > { %v684_v27 = vld [vmem:[%s3326_s3 + $0x3a8] sm:$0xff]  ;;  %v685_v9 = vld [vmem:[%s3326_s3 + $0x3b0] sm:$0xff]  ;;  %v686_v18 = vld [vmem:[%s3326_s3 + $0x3b8] sm:$0xff]  ;;  %v3940_v6 = vsub.f32 %v617_v56, %v681_v32  ;;  %v3942_v60 = vsub.f32 %v618_v34, %v682_v0  ;;  %v3944_v12 = vsub.f32 %v619_v16, %v683_v44  ;;  %v3983_v0 = vmul.f32 %v3751_v25, %v3751_v25 }
  0xc0   : > { %v687_v49 = vld [vmem:[%s3326_s3 + $0x3c0] sm:$0xff]  ;;  %v688_v19 = vld [vmem:[%s3326_s3 + $0x3c8] sm:$0xff]  ;;  %v689_v23 = vld [vmem:[%s3326_s3 + $0x3d0] sm:$0xff]  ;;  %v3949_v50 = vsub.f32 %v620_v52, %v684_v27  ;;  %v3951_v20 = vsub.f32 %v621_v59, %v685_v9  ;;  %v3953_v37 = vsub.f32 %v622_v53, %v686_v18  ;;  %v3979_v53 = vmul.f32 %v3749_v17, %v3749_v17 }
  0xc1   : > { %v690_v28 = vld [vmem:[%s3326_s3 + $0x3d8] sm:$0xff]  ;;  %v691_v11 = vld [vmem:[%s3326_s3 + $0x3e0] sm:$0xff]  ;;  %v692_v41 = vld [vmem:[%s3326_s3 + $0x3e8] sm:$0xff]  ;;  %v3955_v3 = vsub.f32 %v623_v33, %v687_v49  ;;  %v3959_v43 = vsub.f32 %v624_v36, %v688_v19  ;;  %v3961_v56 = vsub.f32 %v625_v61, %v689_v23  ;;  %v3975_v33 = vmul.f32 %v3747_v14, %v3747_v14 }
  0xc2   : > { %v693_v48 = vld [vmem:[%s3326_s3 + $0x3f0] sm:$0xff]  ;;  %v694_v58 = vld [vmem:[%s3326_s3 + $0x3f8] sm:$0xff]  ;;  %v3963_v34 = vsub.f32 %v626_v29, %v690_v28  ;;  %v3965_v16 = vsub.f32 %v627_v2, %v691_v11  ;;  %v3967_v44 = vsub.f32 %v628_v30, %v692_v41  ;;  %v3987_v2 = vmul.f32 %v3767_v54, %v3767_v54  ;;  %v7661_v36 = vld [vmem:[#allocation26_spill] sm:$0xff] }
  0xc3   : > { %v3969_v52 = vsub.f32 %v629_v62, %v693_v48  ;;  %v3971_v59 = vsub.f32 %v630_v21, %v694_v58  ;;  %v3991_v32 = vmul.f32 %v3769_v7, %v3769_v7  ;;  %v3995_v14 = vmul.f32 %v3771_v38, %v3771_v38  ;;  %v7662_v61 = vld [vmem:[#allocation27_spill] sm:$0xff]  ;;  %v7664_v30 = vld [vmem:[#allocation12_spill] sm:$0xff]  ;;  %v7665_v62 = vld [vmem:[#allocation13_spill] sm:$0xff] }
  0xc4   : > { %v3999_v17 = vmul.f32 %v3773_v55, %v3773_v55  ;;  %v4003_v25 = vmul.f32 %v3786_v51, %v3786_v51  ;;  %v4007_v54 = vmul.f32 %v3788_v45, %v3788_v45  ;;  %v4011_v7 = vmul.f32 %v3797_v4, %v3797_v4  ;;  %v7663_v29 = vld [vmem:[#allocation11_spill] sm:$0xff]  ;;  %v7666_v9 = vld [vmem:[#allocation14_spill] sm:$0xff]  ;;  %v7668_v19 = vld [vmem:[#allocation16_spill] sm:$0xff] }
  0xc5   : > { %v4015_v38 = vmul.f32 %v3799_v26, %v3799_v26  ;;  %v4019_v55 = vmul.f32 %v7661_v36, %v7661_v36  ;;  %v4023_v51 = vmul.f32 %v7662_v61, %v7662_v61  ;;  %v4027_v45 = vmul.f32 %v3812_v1, %v3812_v1  ;;  %v7667_v18 = vld [vmem:[#allocation15_spill] sm:$0xff]  ;;  %v7669_v11 = vld [vmem:[#allocation17_spill] sm:$0xff]  ;;  %v7671_v41 = vld [vmem:[#allocation18_spill] sm:$0xff] }
  0xc6   : > { %v4031_v4 = vmul.f32 %v7663_v29, %v7663_v29  ;;  %v4035_v26 = vmul.f32 %v7664_v30, %v7664_v30  ;;  %v4039_v21 = vmul.f32 %v7665_v62, %v7665_v62  ;;  %v4043_v27 = vmul.f32 %v3827_v5, %v3827_v5  ;;  %v7673_v58 = vld [vmem:[#allocation19_spill] sm:$0xff]  ;;  %v7676_v29 = vld [vmem:[#allocation20_spill] sm:$0xff]  ;;  %v7678_v30 = vld [vmem:[#allocation21_spill] sm:$0xff] }
  0xc7   : > { %v4047_v1 = vmul.f32 %v7666_v9, %v7666_v9  ;;  %v4051_v49 = vmul.f32 %v7667_v18, %v7667_v18  ;;  %v4055_v23 = vmul.f32 %v7668_v19, %v7668_v19  ;;  %v4059_v28 = vmul.f32 %v3842_v24, %v3842_v24  ;;  %v7680_v9 = vld [vmem:[#allocation22_spill] sm:$0xff] }
  0xc8   : > { %v4063_v5 = vmul.f32 %v7669_v11, %v7669_v11  ;;  %v4067_v48 = vmul.f32 %v7671_v41, %v7671_v41  ;;  %v4071_v36 = vmul.f32 %v7673_v58, %v7673_v58  ;;  %v4075_v61 = vmul.f32 %v3857_v40, %v3857_v40  ;;  %v7683_v11 = vld [vmem:[#allocation24_spill] sm:$0xff] }
  0xc9   : > { %v4079_v24 = vmul.f32 %v7676_v29, %v7676_v29  ;;  %v4083_v62 = vmul.f32 %v7678_v30, %v7678_v30  ;;  %v4087_v18 = vmul.f32 %v7680_v9, %v7680_v9  ;;  %v4091_v19 = vmul.f32 %v3872_v35, %v3872_v35  ;;  %v7685_v41 = vld [vmem:[#allocation28_spill] sm:$0xff]  ;;  %v7687_v29 = vld [vmem:[#allocation29_spill] sm:$0xff]  ;;  %v7689_v9 = vld [vmem:[#allocation31_spill] sm:$0xff] }
  0xca   : > { %7670 = vst [vmem:[#allocation35_spill] sm:$0xff] %v4063_v5  ;;  %7672 = vst [vmem:[#allocation26_spill] sm:$0xff] %v4067_v48  ;;  %v4095_v40 = vmul.f32 %v7683_v11, %v7683_v11  ;;  %v4099_v58 = vmul.f32 %v7685_v41, %v7685_v41  ;;  %v791_v30 = vmul.f32 %v7687_v29, %v7687_v29 }
  0xcb   : > { %7674 = vst [vmem:[#allocation27_spill] sm:$0xff] %v4071_v36  ;;  %7675 = vst [vmem:[#allocation11_spill] sm:$0xff] %v4075_v61  ;;  %v7690_v61 = vld [vmem:[#allocation32_spill] sm:$0xff]  ;;  %v797_v41 = vmul.f32 %v3904_v47, %v3904_v47  ;;  %v798_v29 = vmul.f32 %v3906_v57, %v3906_v57  ;;  %v804_v47 = vmul.f32 %v3927_v39, %v3927_v39 }
  0xcc   : > { %7677 = vst [vmem:[#allocation12_spill] sm:$0xff] %v4079_v24  ;;  %7679 = vst [vmem:[#allocation13_spill] sm:$0xff] %v4083_v62  ;;  %v7688_v62 = vld [vmem:[#allocation30_spill] sm:$0xff]  ;;  %v794_v35 = vmul.f32 %v7690_v61, %v7690_v61  ;;  %v801_v61 = vmul.f32 %v3918_v31, %v3918_v31  ;;  %v805_v57 = vmul.f32 %v3929_v42, %v3929_v42 }
  0xcd   : > { %7681 = vst [vmem:[#allocation14_spill] sm:$0xff] %v4087_v18  ;;  %7682 = vst [vmem:[#allocation15_spill] sm:$0xff] %v4091_v19  ;;  %v792_v24 = vmul.f32 %v7688_v62, %v7688_v62  ;;  %v793_v18 = vmul.f32 %v7689_v9, %v7689_v9  ;;  %v7691_v19 = vld [vmem:[#allocation33_spill] sm:$0xff]  ;;  %v800_v9 = vmul.f32 %v3916_v15, %v3916_v15 }
  0xce   : > { %7684 = vst [vmem:[#allocation16_spill] sm:$0xff] %v4095_v40  ;;  %7686 = vst [vmem:[#allocation17_spill] sm:$0xff] %v4099_v58  ;;  %v795_v11 = vmul.f32 %v7691_v19, %v7691_v19  ;;  %v796_v40 = vmul.f32 %v3902_v10, %v3902_v10  ;;  %v7692_v58 = vld [vmem:[#allocation34_spill] sm:$0xff]  ;;  %v802_v19 = vmul.f32 %v3920_v22, %v3920_v22 }
  0xcf   : > { %v799_v62 = vmul.f32 %v7692_v58, %v7692_v58  ;;  %v803_v10 = vmul.f32 %v3922_v8, %v3922_v8  ;;  %v806_v58 = vmul.f32 %v3931_v46, %v3931_v46  ;;  %v807_v15 = vmul.f32 %v3933_v13, %v3933_v13 }
  0xd0   : > { %v808_v31 = vmul.f32 %v3938_v63, %v3938_v63  ;;  %v809_v22 = vmul.f32 %v3940_v6, %v3940_v6  ;;  %v810_v8 = vmul.f32 %v3942_v60, %v3942_v60  ;;  %v811_v39 = vmul.f32 %v3944_v12, %v3944_v12 }
  0xd1   : > { %v812_v42 = vmul.f32 %v3949_v50, %v3949_v50  ;;  %v813_v46 = vmul.f32 %v3951_v20, %v3951_v20  ;;  %v814_v13 = vmul.f32 %v3953_v37, %v3953_v37  ;;  %v815_v63 = vmul.f32 %v3955_v3, %v3955_v3 }
  0xd2   : > { %v816_v6 = vmul.f32 %v3959_v43, %v3959_v43  ;;  %v817_v60 = vmul.f32 %v3961_v56, %v3961_v56  ;;  %v818_v12 = vmul.f32 %v3963_v34, %v3963_v34  ;;  %v819_v50 = vmul.f32 %v3965_v16, %v3965_v16 }
  0xd3   : > { %v820_v20 = vmul.f32 %v3967_v44, %v3967_v44  ;;  %v821_v37 = vmul.f32 %v3969_v52, %v3969_v52  ;;  %v822_v3 = vmul.f32 %v3971_v59, %v3971_v59  ;;  %v823_v43 = vadd.f32 %v791_v30, %v3975_v33  ;;  %v7696_v30 = vld [vmem:[#allocation11_spill] sm:$0xff] }
  0xd4   : > { %v824_v36 = vadd.f32 %v792_v24, %v3979_v53  ;;  %v825_v56 = vadd.f32 %v793_v18, %v3983_v0  ;;  %v826_v34 = vadd.f32 %v794_v35, %v3987_v2  ;;  %v827_v48 = vadd.f32 %v795_v11, %v3991_v32  ;;  %v7693_v24 = vld [vmem:[#allocation35_spill] sm:$0xff]  ;;  %v7694_v18 = vld [vmem:[#allocation26_spill] sm:$0xff]  ;;  %v7697_v35 = vld [vmem:[#allocation12_spill] sm:$0xff] }
  0xd5   : > { %v828_v16 = vadd.f32 %v796_v40, %v3995_v14  ;;  %v829_v44 = vadd.f32 %v797_v41, %v3999_v17  ;;  %v830_v5 = vadd.f32 %v798_v29, %v4003_v25  ;;  %v831_v52 = vadd.f32 %v799_v62, %v4007_v54  ;;  %v7695_v40 = vld [vmem:[#allocation27_spill] sm:$0xff]  ;;  %v7699_v11 = vld [vmem:[#allocation14_spill] sm:$0xff]  ;;  %v7701_v41 = vld [vmem:[#allocation16_spill] sm:$0xff] }
  0xd6   : > { %v832_v59 = vadd.f32 %v800_v9, %v4011_v7  ;;  %v833_v33 = vadd.f32 %v801_v61, %v4015_v38  ;;  %v834_v53 = vadd.f32 %v802_v19, %v4019_v55  ;;  %v835_v0 = vadd.f32 %v803_v10, %v4023_v51  ;;  %v7702_v62 = vld [vmem:[#allocation17_spill] sm:$0xff] }
  0xd7   : > { %v836_v2 = vadd.f32 %v804_v47, %v4027_v45  ;;  %v837_v32 = vadd.f32 %v805_v57, %v4031_v4  ;;  %v838_v14 = vadd.f32 %v806_v58, %v4035_v26  ;;  %v839_v17 = vadd.f32 %v807_v15, %v4039_v21 }
  0xd8   : > { %v840_v25 = vadd.f32 %v808_v31, %v4043_v27  ;;  %v841_v54 = vadd.f32 %v809_v22, %v4047_v1  ;;  %v842_v7 = vadd.f32 %v810_v8, %v4051_v49  ;;  %v843_v38 = vadd.f32 %v811_v39, %v4055_v23  ;;  %v7698_v27 = vld [vmem:[#allocation13_spill] sm:$0xff]  ;;  %v7700_v23 = vld [vmem:[#allocation15_spill] sm:$0xff]  ;;  %v887_v8 = vld [vmem:[%s3320_s4 + $0x400] sm:$0xff] }
  0xd9   : > { %v844_v55 = vadd.f32 %v812_v42, %v4059_v28  ;;  %v845_v51 = vadd.f32 %v813_v46, %v7693_v24  ;;  %v846_v45 = vadd.f32 %v814_v13, %v7694_v18  ;;  %v847_v4 = vadd.f32 %v815_v63, %v7695_v40  ;;  %v888_v39 = vld [vmem:[%s3320_s4 + $0x408] sm:$0xff]  ;;  %v889_v42 = vld [vmem:[%s3320_s4 + $0x410] sm:$0xff]  ;;  %v951_v46 = vld [vmem:[%s3326_s3 + $0x400] sm:$0xff] }
  0xda   : > { %v848_v26 = vadd.f32 %v816_v6, %v7696_v30  ;;  %v849_v21 = vadd.f32 %v817_v60, %v7697_v35  ;;  %v850_v1 = vadd.f32 %v818_v12, %v7698_v27  ;;  %v851_v49 = vadd.f32 %v819_v50, %v7699_v11  ;;  %v890_v6 = vld [vmem:[%s3320_s4 + $0x418] sm:$0xff]  ;;  %v952_v60 = vld [vmem:[%s3326_s3 + $0x408] sm:$0xff]  ;;  %v953_v12 = vld [vmem:[%s3326_s3 + $0x410] sm:$0xff] }
  0xdb   : > { %v852_v28 = vadd.f32 %v820_v20, %v7700_v23  ;;  %v853_v29 = vadd.f32 %v821_v37, %v7701_v41  ;;  %v854_v9 = vadd.f32 %v822_v3, %v7702_v62  ;;  %v855_v61 = vadd.f32 %v839_v17, %v823_v43  ;;  %v891_v43 = vld [vmem:[%s3320_s4 + $0x420] sm:$0xff]  ;;  %v958_v17 = vld [vmem:[%s3326_s3 + $0x438] sm:$0xff]  ;;  %v900_v30 = vld [vmem:[%s3320_s4 + $0x468] sm:$0xff] }
  0xdc   : > { %v856_v19 = vadd.f32 %v840_v25, %v824_v36  ;;  %v857_v10 = vadd.f32 %v841_v54, %v825_v56  ;;  %v858_v47 = vadd.f32 %v842_v7, %v826_v34  ;;  %v859_v57 = vadd.f32 %v843_v38, %v827_v48  ;;  %v892_v56 = vld [vmem:[%s3320_s4 + $0x428] sm:$0xff]  ;;  %v893_v34 = vld [vmem:[%s3320_s4 + $0x430] sm:$0xff]  ;;  %v959_v25 = vld [vmem:[%s3326_s3 + $0x440] sm:$0xff] }
  0xdd   : > { %v860_v58 = vadd.f32 %v844_v55, %v828_v16  ;;  %v861_v15 = vadd.f32 %v845_v51, %v829_v44  ;;  %v862_v31 = vadd.f32 %v846_v45, %v830_v5  ;;  %v863_v22 = vadd.f32 %v847_v4, %v831_v52  ;;  %v954_v5 = vld [vmem:[%s3326_s3 + $0x418] sm:$0xff]  ;;  %v955_v44 = vld [vmem:[%s3326_s3 + $0x420] sm:$0xff]  ;;  %v956_v52 = vld [vmem:[%s3326_s3 + $0x428] sm:$0xff] }
  0xde   : > { %v864_v36 = vadd.f32 %v848_v26, %v832_v59  ;;  %v865_v13 = vadd.f32 %v849_v21, %v833_v33  ;;  %v866_v63 = vadd.f32 %v850_v1, %v834_v53  ;;  %v867_v48 = vadd.f32 %v851_v49, %v835_v0  ;;  %v894_v16 = vld [vmem:[%s3320_s4 + $0x438] sm:$0xff]  ;;  %v957_v59 = vld [vmem:[%s3326_s3 + $0x430] sm:$0xff]  ;;  %v960_v54 = vld [vmem:[%s3326_s3 + $0x448] sm:$0xff] }
  0xdf   : > { %v868_v50 = vadd.f32 %v852_v28, %v836_v2  ;;  %v869_v20 = vadd.f32 %v853_v29, %v837_v32  ;;  %v870_v37 = vadd.f32 %v854_v9, %v838_v14  ;;  %v871_v3 = vadd.f32 %v863_v22, %v855_v61  ;;  %v895_v32 = vld [vmem:[%s3320_s4 + $0x440] sm:$0xff]  ;;  %v896_v14 = vld [vmem:[%s3320_s4 + $0x448] sm:$0xff]  ;;  %v7704_v38 = vld [vmem:[#allocation25_spill] sm:$0xff] }
  0xe0   : > { %v872_v33 = vadd.f32 %v864_v36, %v856_v19  ;;  %v873_v53 = vadd.f32 %v865_v13, %v857_v10  ;;  %v874_v0 = vadd.f32 %v866_v63, %v858_v47  ;;  %v875_v2 = vadd.f32 %v867_v48, %v859_v57  ;;  %v7703_v7 = vld [vmem:[#allocation23_spill] sm:$0xff]  ;;  %v897_v45 = vld [vmem:[%s3320_s4 + $0x450] sm:$0xff]  ;;  %v898_v40 = vld [vmem:[%s3320_s4 + $0x458] sm:$0xff] }
  0xe1   : > { %v4219_v55 = vadd.f32 %v7704_v38, %v7703_v7  ;;  %v876_v24 = vadd.f32 %v868_v50, %v860_v58  ;;  %v877_v51 = vadd.f32 %v869_v20, %v861_v15  ;;  %v878_v18 = vadd.f32 %v870_v37, %v862_v31  ;;  %v899_v4 = vld [vmem:[%s3320_s4 + $0x460] sm:$0xff]  ;;  %v961_v26 = vld [vmem:[%s3326_s3 + $0x450] sm:$0xff]  ;;  %v962_v35 = vld [vmem:[%s3326_s3 + $0x458] sm:$0xff] }
  0xe2   : > { %v963_v21 = vld [vmem:[%s3326_s3 + $0x460] sm:$0xff]  ;;  %v964_v27 = vld [vmem:[%s3326_s3 + $0x468] sm:$0xff]  ;;  %v879_v1 = vadd.f32 %v875_v2, %v871_v3  ;;  %v4230_v11 = vld [vmem:[%s3320_s4 + $0x470] sm:$0xff]  ;;  %v4247_v62 = vsub.f32 %v887_v8, %v951_v46  ;;  %v4249_v9 = vsub.f32 %v888_v39, %v952_v60  ;;  %v4251_v61 = vsub.f32 %v889_v42, %v953_v12 }
  0xe3   : > { %7705 = vst [vmem:[#allocation18_spill] sm:$0xff] %v4219_v55  ;;  %v4233_v49 = vld [vmem:[%s3320_s4 + $0x478] sm:$0xff]  ;;  %v4236_v23 = vld [vmem:[%s3320_s4 + $0x480] sm:$0xff]  ;;  %v4239_v28 = vld [vmem:[%s3326_s3 + $0x470] sm:$0xff]  ;;  %v880_v19 = vadd.f32 %v876_v24, %v872_v33  ;;  %v881_v10 = vadd.f32 %v877_v51, %v873_v53  ;;  %v882_v47 = vadd.f32 %v878_v18, %v874_v0  ;;  %v4269_v46 = vsub.f32 %v890_v6, %v954_v5 }
  0xe4   : > { %v4242_v41 = vld [vmem:[%s3326_s3 + $0x478] sm:$0xff]  ;;  %v4245_v29 = vld [vmem:[%s3326_s3 + $0x480] sm:$0xff]  ;;  %v4254_v57 = vld [vmem:[%s3320_s4 + $0x488] sm:$0xff]  ;;  %v4287_v5 = vsub.f32 %v891_v43, %v955_v44  ;;  %v4289_v20 = vsub.f32 %v892_v56, %v956_v52  ;;  %v4291_v37 = vsub.f32 %v893_v34, %v957_v59  ;;  %v4293_v3 = vsub.f32 %v894_v16, %v958_v17 }
  0xe5   : > { %v4257_v58 = vld [vmem:[%s3320_s4 + $0x490] sm:$0xff]  ;;  %v4260_v15 = vld [vmem:[%s3320_s4 + $0x498] sm:$0xff]  ;;  %v4263_v31 = vld [vmem:[%s3320_s4 + $0x4a0] sm:$0xff]  ;;  %v883_v33 = vadd.f32 %v881_v10, %v879_v1  ;;  %v884_v53 = vadd.f32 %v882_v47, %v880_v19  ;;  %v4311_v59 = vsub.f32 %v895_v32, %v959_v25  ;;  %v4313_v17 = vsub.f32 %v896_v14, %v960_v54 }
  0xe6   : > { %v968_v22 = vld [vmem:[%s3326_s3 + $0x488] sm:$0xff]  ;;  %v969_v8 = vld [vmem:[%s3326_s3 + $0x490] sm:$0xff]  ;;  %v970_v39 = vld [vmem:[%s3326_s3 + $0x498] sm:$0xff]  ;;  %v4331_v14 = vsub.f32 %v897_v45, %v961_v26  ;;  %v4333_v54 = vsub.f32 %v898_v40, %v962_v35  ;;  %v4335_v19 = vsub.f32 %v899_v4, %v963_v21  ;;  %v4337_v10 = vsub.f32 %v900_v30, %v964_v27 }
  0xe7   : > { %v971_v42 = vld [vmem:[%s3326_s3 + $0x4a0] sm:$0xff]  ;;  %v4272_v36 = vld [vmem:[%s3320_s4 + $0x4a8] sm:$0xff]  ;;  %v4275_v13 = vld [vmem:[%s3320_s4 + $0x4b0] sm:$0xff]  ;;  %7706 = vst [vmem:[#allocation19_spill] sm:$0xff] %v4311_v59  ;;  %v4339_v47 = vadd.f32 %v884_v53, %v883_v33  ;;  %v4351_v4 = vsub.f32 %v4230_v11, %v4239_v28  ;;  %v4355_v30 = vsub.f32 %v4233_v49, %v4242_v41  ;;  %v4359_v21 = vsub.f32 %v4236_v23, %v4245_v29 }
  0xe8   : > { %v4278_v63 = vld [vmem:[%s3320_s4 + $0x4b8] sm:$0xff]  ;;  %v4281_v48 = vld [vmem:[%s3320_s4 + $0x4c0] sm:$0xff]  ;;  %v972_v60 = vld [vmem:[%s3326_s3 + $0x4a8] sm:$0xff]  ;;  %7707 = vst [vmem:[#allocation20_spill] sm:$0xff] %v4313_v17  ;;  %v4372_v49 = vsub.f32 %v4257_v58, %v969_v8  ;;  %v4375_v23 = vsub.f32 %v4260_v15, %v970_v39  ;;  %v4378_v41 = vsub.f32 %v4263_v31, %v971_v42 }
  0xe9   : > { %v973_v12 = vld [vmem:[%s3326_s3 + $0x4b0] sm:$0xff]  ;;  %v974_v50 = vld [vmem:[%s3326_s3 + $0x4b8] sm:$0xff]  ;;  %v975_v6 = vld [vmem:[%s3326_s3 + $0x4c0] sm:$0xff]  ;;  %7708 = vst [vmem:[#allocation21_spill] sm:$0xff] %v4331_v14  ;;  %v4388_v58 = vsub.f32 %v4272_v36, %v972_v60 }
  0xea   : > { %v4296_v0 = vld [vmem:[%s3320_s4 + $0x4c8] sm:$0xff]  ;;  %v4299_v2 = vld [vmem:[%s3320_s4 + $0x4d0] sm:$0xff]  ;;  %v4302_v43 = vld [vmem:[%s3320_s4 + $0x4d8] sm:$0xff]  ;;  %7709 = vst [vmem:[#allocation22_spill] sm:$0xff] %v4335_v19  ;;  %v4391_v15 = vsub.f32 %v4275_v13, %v973_v12  ;;  %v4394_v31 = vsub.f32 %v4278_v63, %v974_v50  ;;  %v4397_v8 = vsub.f32 %v4281_v48, %v975_v6 }
  0xeb   : > { %v4305_v56 = vld [vmem:[%s3320_s4 + $0x4e0] sm:$0xff]  ;;  %v976_v34 = vld [vmem:[%s3326_s3 + $0x4c8] sm:$0xff]  ;;  %v977_v44 = vld [vmem:[%s3326_s3 + $0x4d0] sm:$0xff]  ;;  %7710 = vst [vmem:[#allocation24_spill] sm:$0xff] %v4337_v10 }
  0xec   : > { %v978_v52 = vld [vmem:[%s3326_s3 + $0x4d8] sm:$0xff]  ;;  %v979_v16 = vld [vmem:[%s3326_s3 + $0x4e0] sm:$0xff]  ;;  %v4316_v7 = vld [vmem:[%s3320_s4 + $0x4e8] sm:$0xff]  ;;  %7711 = vst [vmem:[#allocation28_spill] sm:$0xff] %v4339_v47  ;;  %v4407_v13 = vsub.f32 %v4296_v0, %v976_v34  ;;  %v4410_v63 = vsub.f32 %v4299_v2, %v977_v44 }
  0xed   : > { %v4319_v38 = vld [vmem:[%s3320_s4 + $0x4f0] sm:$0xff]  ;;  %v4322_v24 = vld [vmem:[%s3320_s4 + $0x4f8] sm:$0xff]  ;;  %v4325_v51 = vld [vmem:[%s3320_s4 + $0x500] sm:$0xff]  ;;  %7712 = vst [vmem:[#allocation29_spill] sm:$0xff] %v4351_v4  ;;  %v4369_v4 = vsub.f32 %v4254_v57, %v968_v22  ;;  %v4413_v48 = vsub.f32 %v4302_v43, %v978_v52  ;;  %v4416_v12 = vsub.f32 %v4305_v56, %v979_v16 }
  0xee   : > { %v980_v18 = vld [vmem:[%s3326_s3 + $0x4e8] sm:$0xff]  ;;  %v981_v32 = vld [vmem:[%s3326_s3 + $0x4f0] sm:$0xff]  ;;  %v982_v25 = vld [vmem:[%s3326_s3 + $0x4f8] sm:$0xff]  ;;  %7713 = vst [vmem:[#allocation30_spill] sm:$0xff] %v4355_v30 }
  0xef   : > { %v983_v1 = vld [vmem:[%s3326_s3 + $0x500] sm:$0xff]  ;;  %v920_v55 = vld [vmem:[%s3320_s4 + $0x508] sm:$0xff]  ;;  %v921_v17 = vld [vmem:[%s3320_s4 + $0x510] sm:$0xff]  ;;  %7714 = vst [vmem:[#allocation31_spill] sm:$0xff] %v4359_v21  ;;  %v4426_v2 = vsub.f32 %v4316_v7, %v980_v18  ;;  %v4429_v43 = vsub.f32 %v4319_v38, %v981_v32  ;;  %v4432_v56 = vsub.f32 %v4322_v24, %v982_v25 }
  0xf0   : > { %v922_v59 = vld [vmem:[%s3320_s4 + $0x518] sm:$0xff]  ;;  %v923_v45 = vld [vmem:[%s3320_s4 + $0x520] sm:$0xff]  ;;  %v984_v26 = vld [vmem:[%s3326_s3 + $0x508] sm:$0xff]  ;;  %7715 = vst [vmem:[#allocation32_spill] sm:$0xff] %v4369_v4  ;;  %v4435_v44 = vsub.f32 %v4325_v51, %v983_v1 }
  0xf1   : > { %v985_v14 = vld [vmem:[%s3326_s3 + $0x510] sm:$0xff]  ;;  %v986_v40 = vld [vmem:[%s3326_s3 + $0x518] sm:$0xff]  ;;  %v987_v35 = vld [vmem:[%s3326_s3 + $0x520] sm:$0xff]  ;;  %7716 = vst [vmem:[#allocation33_spill] sm:$0xff] %v4375_v23  ;;  %v4444_v38 = vsub.f32 %v920_v55, %v984_v26 }
  0xf2   : > { %v924_v27 = vld [vmem:[%s3320_s4 + $0x528] sm:$0xff]  ;;  %v925_v33 = vld [vmem:[%s3320_s4 + $0x530] sm:$0xff]  ;;  %v926_v53 = vld [vmem:[%s3320_s4 + $0x538] sm:$0xff]  ;;  %7717 = vst [vmem:[#allocation34_spill] sm:$0xff] %v4378_v41  ;;  %v4446_v24 = vsub.f32 %v921_v17, %v985_v14  ;;  %v4448_v32 = vsub.f32 %v922_v59, %v986_v40  ;;  %v4450_v51 = vsub.f32 %v923_v45, %v987_v35 }
  0xf3   : > { %v927_v47 = vld [vmem:[%s3320_s4 + $0x540] sm:$0xff]  ;;  %v988_v10 = vld [vmem:[%s3326_s3 + $0x528] sm:$0xff]  ;;  %v989_v11 = vld [vmem:[%s3326_s3 + $0x530] sm:$0xff]  ;;  %7718 = vst [vmem:[#allocation35_spill] sm:$0xff] %v4388_v58 }
  0xf4   : > { %v990_v28 = vld [vmem:[%s3326_s3 + $0x538] sm:$0xff]  ;;  %v928_v29 = vld [vmem:[%s3320_s4 + $0x548] sm:$0xff]  ;;  %v929_v21 = vld [vmem:[%s3320_s4 + $0x550] sm:$0xff]  ;;  %7719 = vst [vmem:[#allocation26_spill] sm:$0xff] %v4394_v31  ;;  %v4459_v26 = vsub.f32 %v924_v27, %v988_v10  ;;  %v4461_v17 = vsub.f32 %v925_v33, %v989_v11 }
  0xf5   : > { %v930_v30 = vld [vmem:[%s3320_s4 + $0x558] sm:$0xff]  ;;  %v931_v57 = vld [vmem:[%s3320_s4 + $0x560] sm:$0xff]  ;;  %v992_v4 = vld [vmem:[%s3326_s3 + $0x548] sm:$0xff]  ;;  %7720 = vst [vmem:[#allocation27_spill] sm:$0xff] %v4397_v8  ;;  %v4463_v59 = vsub.f32 %v926_v53, %v990_v28 }
  0xf6   : > { %v991_v22 = vld [vmem:[%s3326_s3 + $0x540] sm:$0xff]  ;;  %v993_v19 = vld [vmem:[%s3326_s3 + $0x550] sm:$0xff]  ;;  %v932_v39 = vld [vmem:[%s3320_s4 + $0x568] sm:$0xff]  ;;  %7721 = vst [vmem:[#allocation11_spill] sm:$0xff] %v4407_v13 }
  0xf7   : > { %v933_v42 = vld [vmem:[%s3320_s4 + $0x570] sm:$0xff]  ;;  %v934_v41 = vld [vmem:[%s3320_s4 + $0x578] sm:$0xff]  ;;  %v935_v36 = vld [vmem:[%s3320_s4 + $0x580] sm:$0xff]  ;;  %7722 = vst [vmem:[#allocation12_spill] sm:$0xff] %v4410_v63  ;;  %v4465_v14 = vsub.f32 %v927_v47, %v991_v22  ;;  %v4475_v10 = vsub.f32 %v929_v21, %v993_v19 }
  0xf8   : > { %v994_v60 = vld [vmem:[%s3326_s3 + $0x558] sm:$0xff]  ;;  %v995_v58 = vld [vmem:[%s3326_s3 + $0x560] sm:$0xff]  ;;  %v996_v23 = vld [vmem:[%s3326_s3 + $0x568] sm:$0xff]  ;;  %7723 = vst [vmem:[#allocation13_spill] sm:$0xff] %v4413_v48 }
  0xf9   : > { %7724 = vst [vmem:[#allocation14_spill] sm:$0xff] %v4416_v12  ;;  %v936_v50 = vld [vmem:[%s3320_s4 + $0x588] sm:$0xff]  ;;  %v937_v6 = vld [vmem:[%s3320_s4 + $0x590] sm:$0xff]  ;;  %v938_v8 = vld [vmem:[%s3320_s4 + $0x598] sm:$0xff]  ;;  %v4477_v27 = vsub.f32 %v930_v30, %v994_v60  ;;  %v4479_v33 = vsub.f32 %v931_v57, %v995_v58  ;;  %v4484_v28 = vsub.f32 %v932_v39, %v996_v23 }
  0xfa   : > { %v939_v0 = vld [vmem:[%s3320_s4 + $0x5a0] sm:$0xff]  ;;  %v997_v34 = vld [vmem:[%s3326_s3 + $0x570] sm:$0xff]  ;;  %v998_v13 = vld [vmem:[%s3326_s3 + $0x578] sm:$0xff]  ;;  %7725 = vst [vmem:[#allocation15_spill] sm:$0xff] %v4426_v2 }
  0xfb   : > { %v999_v31 = vld [vmem:[%s3326_s3 + $0x580] sm:$0xff]  ;;  %7726 = vst [vmem:[#allocation16_spill] sm:$0xff] %v4429_v43  ;;  %7727 = vst [vmem:[#allocation17_spill] sm:$0xff] %v4432_v56  ;;  %v940_v52 = vld [vmem:[%s3320_s4 + $0x5a8] sm:$0xff]  ;;  %v4486_v22 = vsub.f32 %v933_v42, %v997_v34 }
  0xfc   : > { %7728 = vst [vmem:[#allocation23_spill] sm:$0xff] %v4435_v44  ;;  %v941_v16 = vld [vmem:[%s3320_s4 + $0x5b0] sm:$0xff]  ;;  %v942_v12 = vld [vmem:[%s3320_s4 + $0x5b8] sm:$0xff]  ;;  %v943_v7 = vld [vmem:[%s3320_s4 + $0x5c0] sm:$0xff] }
  0xfd   : > { %v1000_v18 = vld [vmem:[%s3326_s3 + $0x588] sm:$0xff]  ;;  %v1001_v2 = vld [vmem:[%s3326_s3 + $0x590] sm:$0xff]  ;;  %v1002_v48 = vld [vmem:[%s3326_s3 + $0x598] sm:$0xff]  ;;  %7729 = vst [vmem:[#allocation25_spill] sm:$0xff] %v4444_v38  ;;  %v4473_v38 = vsub.f32 %v928_v29, %v992_v4 }
  0xfe   : > { %7730 = vst [vmem:[#allocation36_spill] sm:$0xff] %v4446_v24  ;;  %7731 = vst [vmem:[#allocation37_spill] sm:$0xff] %v4448_v32  ;;  %v944_v25 = vld [vmem:[%s3320_s4 + $0x5c8] sm:$0xff]  ;;  %v945_v1 = vld [vmem:[%s3320_s4 + $0x5d0] sm:$0xff]  ;;  %v4495_v19 = vsub.f32 %v936_v50, %v1000_v18  ;;  %v4497_v30 = vsub.f32 %v937_v6, %v1001_v2  ;;  %v4499_v21 = vsub.f32 %v938_v8, %v1002_v48 }
  0xff   : > { %7732 = vst [vmem:[#allocation38_spill] sm:$0xff] %v4450_v51  ;;  %v946_v44 = vld [vmem:[%s3320_s4 + $0x5d8] sm:$0xff]  ;;  %v947_v56 = vld [vmem:[%s3320_s4 + $0x5e0] sm:$0xff]  ;;  %v1004_v63 = vld [vmem:[%s3326_s3 + $0x5a8] sm:$0xff]  ;;  %v4527_v48 = vmul.f32 %v4247_v62, %v4247_v62  ;;  %v4535_v50 = vmul.f32 %v4251_v61, %v4251_v61  ;;  %v4539_v6 = vmul.f32 %v4269_v46, %v4269_v46  ;;  %v4547_v62 = vmul.f32 %v4289_v20, %v4289_v20 }
 0x100   : > { %v1003_v43 = vld [vmem:[%s3326_s3 + $0x5a0] sm:$0xff]  ;;  %v1005_v55 = vld [vmem:[%s3326_s3 + $0x5b0] sm:$0xff]  ;;  %7733 = vst [vmem:[#allocation39_spill] sm:$0xff] %v4461_v17  ;;  %7734 = vst [vmem:[#allocation40_spill] sm:$0xff] %v4463_v59  ;;  %v4490_v59 = vsub.f32 %v935_v36, %v999_v31  ;;  %v4503_v58 = vsub.f32 %v940_v52, %v1004_v63  ;;  %v4555_v61 = vmul.f32 %v4293_v3, %v4293_v3 }
 0x101   : > { %7735 = vst [vmem:[#allocation41_spill] sm:$0xff] %v4465_v14  ;;  %v948_v45 = vld [vmem:[%s3320_s4 + $0x5e8] sm:$0xff]  ;;  %v949_v40 = vld [vmem:[%s3320_s4 + $0x5f0] sm:$0xff]  ;;  %v950_v35 = vld [vmem:[%s3320_s4 + $0x5f8] sm:$0xff]  ;;  %v4488_v14 = vsub.f32 %v934_v41, %v998_v13  ;;  %v4501_v57 = vsub.f32 %v939_v0, %v1003_v43  ;;  %v4505_v23 = vsub.f32 %v941_v16, %v1005_v55  ;;  %v4543_v0 = vmul.f32 %v4287_v5, %v4287_v5 }
 0x102   : > { %v1006_v51 = vld [vmem:[%s3326_s3 + $0x5b8] sm:$0xff]  ;;  %v1007_v32 = vld [vmem:[%s3326_s3 + $0x5c0] sm:$0xff]  ;;  %v1008_v24 = vld [vmem:[%s3326_s3 + $0x5c8] sm:$0xff] }
 0x103   : > { %v1009_v53 = vld [vmem:[%s3326_s3 + $0x5d0] sm:$0xff]  ;;  %v1010_v47 = vld [vmem:[%s3326_s3 + $0x5d8] sm:$0xff]  ;;  %v1011_v11 = vld [vmem:[%s3326_s3 + $0x5e0] sm:$0xff]  ;;  %v4507_v39 = vsub.f32 %v942_v12, %v1006_v51  ;;  %v4509_v41 = vsub.f32 %v943_v7, %v1007_v32  ;;  %v4511_v31 = vsub.f32 %v944_v25, %v1008_v24  ;;  %v4531_v12 = vmul.f32 %v4249_v9, %v4249_v9 }
 0x104   : > { %v1012_v17 = vld [vmem:[%s3326_s3 + $0x5e8] sm:$0xff]  ;;  %v1013_v4 = vld [vmem:[%s3326_s3 + $0x5f0] sm:$0xff]  ;;  %v1014_v29 = vld [vmem:[%s3326_s3 + $0x5f8] sm:$0xff]  ;;  %v4513_v42 = vsub.f32 %v945_v1, %v1009_v53  ;;  %v4515_v36 = vsub.f32 %v946_v44, %v1010_v47  ;;  %v4517_v60 = vsub.f32 %v947_v56, %v1011_v11  ;;  %v4551_v9 = vmul.f32 %v4291_v37, %v4291_v37 }
 0x105   : > { %v4519_v8 = vsub.f32 %v948_v45, %v1012_v17  ;;  %v4521_v13 = vsub.f32 %v949_v40, %v1013_v4  ;;  %v4523_v63 = vsub.f32 %v950_v35, %v1014_v29  ;;  %v7736_v34 = vld [vmem:[#allocation19_spill] sm:$0xff]  ;;  %v7737_v2 = vld [vmem:[#allocation20_spill] sm:$0xff]  ;;  %v7738_v43 = vld [vmem:[#allocation21_spill] sm:$0xff]  ;;  %v4571_v37 = vmul.f32 %v4333_v54, %v4333_v54 }
 0x106   : > { %v4559_v46 = vmul.f32 %v7736_v34, %v7736_v34  ;;  %v4563_v5 = vmul.f32 %v7737_v2, %v7737_v2  ;;  %v4567_v20 = vmul.f32 %v7738_v43, %v7738_v43  ;;  %v7739_v56 = vld [vmem:[#allocation22_spill] sm:$0xff]  ;;  %v7740_v44 = vld [vmem:[#allocation24_spill] sm:$0xff]  ;;  %v7741_v16 = vld [vmem:[#allocation29_spill] sm:$0xff]  ;;  %v4599_v1 = vmul.f32 %v4372_v49, %v4372_v49 }
 0x107   : > { %v4575_v3 = vmul.f32 %v7739_v56, %v7739_v56  ;;  %v4579_v52 = vmul.f32 %v7740_v44, %v7740_v44  ;;  %v4583_v7 = vmul.f32 %v7741_v16, %v7741_v16  ;;  %v7742_v18 = vld [vmem:[#allocation30_spill] sm:$0xff]  ;;  %v7743_v32 = vld [vmem:[#allocation31_spill] sm:$0xff]  ;;  %v7744_v51 = vld [vmem:[#allocation32_spill] sm:$0xff]  ;;  %v4615_v47 = vmul.f32 %v4391_v15, %v4391_v15 }
 0x108   : > { %v4587_v24 = vmul.f32 %v7742_v18, %v7742_v18  ;;  %v4591_v54 = vmul.f32 %v7743_v32, %v7743_v32  ;;  %v4595_v25 = vmul.f32 %v7744_v51, %v7744_v51  ;;  %v7745_v55 = vld [vmem:[#allocation33_spill] sm:$0xff]  ;;  %v7746_v45 = vld [vmem:[#allocation34_spill] sm:$0xff]  ;;  %v7747_v35 = vld [vmem:[#allocation35_spill] sm:$0xff] }
 0x109   : > { %v4603_v17 = vmul.f32 %v7745_v55, %v7745_v55  ;;  %v4607_v40 = vmul.f32 %v7746_v45, %v7746_v45  ;;  %v4611_v53 = vmul.f32 %v7747_v35, %v7747_v35  ;;  %7748 = vst [vmem:[#allocation19_spill] sm:$0xff] %v4615_v47  ;;  %v7749_v11 = vld [vmem:[#allocation26_spill] sm:$0xff]  ;;  %v7751_v4 = vld [vmem:[#allocation27_spill] sm:$0xff]  ;;  %v7755_v43 = vld [vmem:[#allocation12_spill] sm:$0xff] }
 0x10a   : > { %v4619_v49 = vmul.f32 %v7749_v11, %v7749_v11  ;;  %v4623_v29 = vmul.f32 %v7751_v4, %v7751_v4  ;;  %v7753_v34 = vld [vmem:[#allocation11_spill] sm:$0xff]  ;;  %v4631_v56 = vmul.f32 %v7755_v43, %v7755_v43  ;;  %v7757_v44 = vld [vmem:[#allocation13_spill] sm:$0xff]  ;;  %v7759_v16 = vld [vmem:[#allocation14_spill] sm:$0xff] }
 0x10b   : > { %v4627_v2 = vmul.f32 %v7753_v34, %v7753_v34  ;;  %v4635_v15 = vmul.f32 %v7757_v44, %v7757_v44  ;;  %v4639_v18 = vmul.f32 %v7759_v16, %v7759_v16  ;;  %v7761_v32 = vld [vmem:[#allocation15_spill] sm:$0xff]  ;;  %v7763_v55 = vld [vmem:[#allocation16_spill] sm:$0xff]  ;;  %v7765_v35 = vld [vmem:[#allocation17_spill] sm:$0xff] }
 0x10c   : > { %7750 = vst [vmem:[#allocation20_spill] sm:$0xff] %v4619_v49  ;;  %7752 = vst [vmem:[#allocation21_spill] sm:$0xff] %v4623_v29  ;;  %v4643_v51 = vmul.f32 %v7761_v32, %v7761_v32  ;;  %v4647_v45 = vmul.f32 %v7763_v55, %v7763_v55  ;;  %v4651_v11 = vmul.f32 %v7765_v35, %v7765_v35  ;;  %v7767_v4 = vld [vmem:[#allocation23_spill] sm:$0xff]  ;;  %v7768_v43 = vld [vmem:[#allocation25_spill] sm:$0xff] }
 0x10d   : > { %7754 = vst [vmem:[#allocation22_spill] sm:$0xff] %v4627_v2  ;;  %7756 = vst [vmem:[#allocation24_spill] sm:$0xff] %v4631_v56  ;;  %v1111_v34 = vmul.f32 %v7767_v4, %v7767_v4  ;;  %v1112_v44 = vmul.f32 %v7768_v43, %v7768_v43  ;;  %v7769_v16 = vld [vmem:[#allocation36_spill] sm:$0xff]  ;;  %v7772_v35 = vld [vmem:[#allocation39_spill] sm:$0xff] }
 0x10e   : > { %7758 = vst [vmem:[#allocation29_spill] sm:$0xff] %v4635_v15  ;;  %7760 = vst [vmem:[#allocation30_spill] sm:$0xff] %v4639_v18  ;;  %v1113_v18 = vmul.f32 %v7769_v16, %v7769_v16  ;;  %v7770_v15 = vld [vmem:[#allocation37_spill] sm:$0xff]  ;;  %v7773_v56 = vld [vmem:[#allocation40_spill] sm:$0xff]  ;;  %v1120_v16 = vmul.f32 %v4473_v38, %v4473_v38  ;;  %v1127_v38 = vmul.f32 %v4490_v59, %v4490_v59 }
 0x10f   : > { %7762 = vst [vmem:[#allocation31_spill] sm:$0xff] %v4643_v51  ;;  %7764 = vst [vmem:[#allocation32_spill] sm:$0xff] %v4647_v45  ;;  %v1114_v32 = vmul.f32 %v7770_v15, %v7770_v15  ;;  %v7771_v51 = vld [vmem:[#allocation38_spill] sm:$0xff]  ;;  %v1116_v45 = vmul.f32 %v4459_v26, %v4459_v26  ;;  %v1118_v4 = vmul.f32 %v7773_v56, %v7773_v56  ;;  %v7774_v2 = vld [vmem:[#allocation41_spill] sm:$0xff] }
 0x110   : > { %7766 = vst [vmem:[#allocation33_spill] sm:$0xff] %v4651_v11  ;;  %v1115_v55 = vmul.f32 %v7771_v51, %v7771_v51  ;;  %v1117_v11 = vmul.f32 %v7772_v35, %v7772_v35  ;;  %v1119_v43 = vmul.f32 %v7774_v2, %v7774_v2  ;;  %v1121_v15 = vmul.f32 %v4475_v10, %v4475_v10 }
 0x111   : > { %v1122_v51 = vmul.f32 %v4477_v27, %v4477_v27  ;;  %v1123_v26 = vmul.f32 %v4479_v33, %v4479_v33  ;;  %v1124_v35 = vmul.f32 %v4484_v28, %v4484_v28  ;;  %v1125_v56 = vmul.f32 %v4486_v22, %v4486_v22 }
 0x112   : > { %v1126_v2 = vmul.f32 %v4488_v14, %v4488_v14  ;;  %v1128_v10 = vmul.f32 %v4495_v19, %v4495_v19  ;;  %v1129_v27 = vmul.f32 %v4497_v30, %v4497_v30  ;;  %v1130_v33 = vmul.f32 %v4499_v21, %v4499_v21 }
 0x113   : > { %v1131_v28 = vmul.f32 %v4501_v57, %v4501_v57  ;;  %v1132_v22 = vmul.f32 %v4503_v58, %v4503_v58  ;;  %v1133_v14 = vmul.f32 %v4505_v23, %v4505_v23  ;;  %v1134_v59 = vmul.f32 %v4507_v39, %v4507_v39 }
 0x114   : > { %v1135_v19 = vmul.f32 %v4509_v41, %v4509_v41  ;;  %v1136_v30 = vmul.f32 %v4511_v31, %v4511_v31  ;;  %v1137_v21 = vmul.f32 %v4513_v42, %v4513_v42  ;;  %v1138_v57 = vmul.f32 %v4515_v36, %v4515_v36 }
 0x115   : > { %v1139_v58 = vmul.f32 %v4517_v60, %v4517_v60  ;;  %v1140_v23 = vmul.f32 %v4519_v8, %v4519_v8  ;;  %v1141_v39 = vmul.f32 %v4521_v13, %v4521_v13  ;;  %v1142_v41 = vmul.f32 %v4523_v63, %v4523_v63 }
 0x116   : > { %v1143_v31 = vadd.f32 %v1111_v34, %v4527_v48  ;;  %v1144_v29 = vadd.f32 %v1112_v44, %v4531_v12  ;;  %v1145_v42 = vadd.f32 %v1113_v18, %v4535_v50  ;;  %v1146_v36 = vadd.f32 %v1114_v32, %v4539_v6  ;;  %v7775_v18 = vld [vmem:[#allocation19_spill] sm:$0xff]  ;;  %v7778_v34 = vld [vmem:[#allocation22_spill] sm:$0xff]  ;;  %v7779_v44 = vld [vmem:[#allocation24_spill] sm:$0xff] }
 0x117   : > { %v1147_v49 = vadd.f32 %v1115_v55, %v4543_v0  ;;  %v1148_v60 = vadd.f32 %v1116_v45, %v4547_v62  ;;  %v1149_v8 = vadd.f32 %v1117_v11, %v4551_v9  ;;  %v1150_v47 = vadd.f32 %v1118_v4, %v4555_v61  ;;  %v7776_v45 = vld [vmem:[#allocation20_spill] sm:$0xff]  ;;  %v7777_v11 = vld [vmem:[#allocation21_spill] sm:$0xff]  ;;  %v7781_v32 = vld [vmem:[#allocation30_spill] sm:$0xff] }
 0x118   : > { %v1151_v13 = vadd.f32 %v1119_v43, %v4559_v46  ;;  %v1152_v63 = vadd.f32 %v1120_v16, %v4563_v5  ;;  %v1153_v48 = vadd.f32 %v1121_v15, %v4567_v20  ;;  %v1154_v12 = vadd.f32 %v1122_v51, %v4571_v37  ;;  %v7783_v55 = vld [vmem:[#allocation32_spill] sm:$0xff]  ;;  %v7784_v43 = vld [vmem:[#allocation33_spill] sm:$0xff] }
 0x119   : > { %v1155_v50 = vadd.f32 %v1123_v26, %v4575_v3  ;;  %v1156_v6 = vadd.f32 %v1124_v35, %v4579_v52  ;;  %v1157_v0 = vadd.f32 %v1125_v56, %v4583_v7  ;;  %v1158_v62 = vadd.f32 %v1126_v2, %v4587_v24 }
 0x11a   : > { %v1159_v9 = vadd.f32 %v1127_v38, %v4591_v54  ;;  %v1160_v61 = vadd.f32 %v1128_v10, %v4595_v25  ;;  %v1161_v46 = vadd.f32 %v1129_v27, %v4599_v1  ;;  %v1162_v5 = vadd.f32 %v1130_v33, %v4603_v17  ;;  %v7780_v25 = vld [vmem:[#allocation29_spill] sm:$0xff]  ;;  %v1207_v33 = vld [vmem:[%s3320_s4 + $0x600] sm:$0xff] }
 0x11b   : > { %v1163_v20 = vadd.f32 %v1131_v28, %v4607_v40  ;;  %v1164_v37 = vadd.f32 %v1132_v22, %v4611_v53  ;;  %v1165_v3 = vadd.f32 %v1133_v14, %v7775_v18  ;;  %v1166_v52 = vadd.f32 %v1134_v59, %v7776_v45  ;;  %v7782_v40 = vld [vmem:[#allocation31_spill] sm:$0xff]  ;;  %v1209_v22 = vld [vmem:[%s3320_s4 + $0x610] sm:$0xff]  ;;  %v1271_v14 = vld [vmem:[%s3326_s3 + $0x600] sm:$0xff] }
 0x11c   : > { %v1167_v7 = vadd.f32 %v1135_v19, %v7777_v11  ;;  %v1168_v24 = vadd.f32 %v1136_v30, %v7778_v34  ;;  %v1169_v54 = vadd.f32 %v1137_v21, %v7779_v44  ;;  %v1170_v1 = vadd.f32 %v1138_v57, %v7780_v25  ;;  %v1208_v28 = vld [vmem:[%s3320_s4 + $0x608] sm:$0xff]  ;;  %v1210_v30 = vld [vmem:[%s3320_s4 + $0x618] sm:$0xff]  ;;  %v1273_v57 = vld [vmem:[%s3326_s3 + $0x610] sm:$0xff] }
 0x11d   : > { %v1171_v17 = vadd.f32 %v1139_v58, %v7781_v32  ;;  %v1172_v53 = vadd.f32 %v1140_v23, %v7782_v40  ;;  %v1173_v4 = vadd.f32 %v1141_v39, %v7783_v55  ;;  %v1174_v16 = vadd.f32 %v1142_v41, %v7784_v43  ;;  %v1272_v21 = vld [vmem:[%s3326_s3 + $0x608] sm:$0xff]  ;;  %v1218_v11 = vld [vmem:[%s3320_s4 + $0x658] sm:$0xff]  ;;  %v4782_v32 = vld [vmem:[%s3320_s4 + $0x670] sm:$0xff] }
 0x11e   : > { %v1175_v15 = vadd.f32 %v1159_v9, %v1143_v31  ;;  %v1176_v51 = vadd.f32 %v1160_v61, %v1144_v29  ;;  %v1177_v26 = vadd.f32 %v1161_v46, %v1145_v42  ;;  %v1178_v35 = vadd.f32 %v1162_v5, %v1146_v36  ;;  %v1211_v31 = vld [vmem:[%s3320_s4 + $0x620] sm:$0xff]  ;;  %v1212_v42 = vld [vmem:[%s3320_s4 + $0x628] sm:$0xff]  ;;  %v1213_v36 = vld [vmem:[%s3320_s4 + $0x630] sm:$0xff] }
 0x11f   : > { %v1179_v56 = vadd.f32 %v1163_v20, %v1147_v49  ;;  %v1180_v2 = vadd.f32 %v1164_v37, %v1148_v60  ;;  %v1181_v38 = vadd.f32 %v1165_v3, %v1149_v8  ;;  %v1182_v10 = vadd.f32 %v1166_v52, %v1150_v47  ;;  %v1274_v47 = vld [vmem:[%s3326_s3 + $0x618] sm:$0xff]  ;;  %v1275_v8 = vld [vmem:[%s3326_s3 + $0x620] sm:$0xff]  ;;  %v1280_v46 = vld [vmem:[%s3326_s3 + $0x648] sm:$0xff] }
 0x120   : > { %v1183_v27 = vadd.f32 %v1167_v7, %v1151_v13  ;;  %v1184_v29 = vadd.f32 %v1168_v24, %v1152_v63  ;;  %v1185_v59 = vadd.f32 %v1169_v54, %v1153_v48  ;;  %v1186_v19 = vadd.f32 %v1170_v1, %v1154_v12  ;;  %v1214_v60 = vld [vmem:[%s3320_s4 + $0x638] sm:$0xff]  ;;  %v1276_v13 = vld [vmem:[%s3326_s3 + $0x628] sm:$0xff]  ;;  %v1277_v63 = vld [vmem:[%s3326_s3 + $0x630] sm:$0xff] }
 0x121   : > { %v1187_v49 = vadd.f32 %v1171_v17, %v1155_v50  ;;  %v1188_v58 = vadd.f32 %v1172_v53, %v1156_v6  ;;  %v1189_v23 = vadd.f32 %v1173_v4, %v1157_v0  ;;  %v1190_v39 = vadd.f32 %v1174_v16, %v1158_v62  ;;  %v1215_v0 = vld [vmem:[%s3320_s4 + $0x640] sm:$0xff]  ;;  %v1216_v62 = vld [vmem:[%s3320_s4 + $0x648] sm:$0xff]  ;;  %v1278_v9 = vld [vmem:[%s3326_s3 + $0x638] sm:$0xff] }
 0x122   : > { %v1191_v41 = vadd.f32 %v1183_v27, %v1175_v15  ;;  %v1192_v48 = vadd.f32 %v1184_v29, %v1176_v51  ;;  %v1193_v12 = vadd.f32 %v1185_v59, %v1177_v26  ;;  %v1194_v50 = vadd.f32 %v1186_v19, %v1178_v35  ;;  %v1279_v61 = vld [vmem:[%s3326_s3 + $0x640] sm:$0xff]  ;;  %v7786_v20 = vld [vmem:[#allocation28_spill] sm:$0xff]  ;;  %v1220_v34 = vld [vmem:[%s3320_s4 + $0x668] sm:$0xff] }
 0x123   : > { %v1195_v6 = vadd.f32 %v1187_v49, %v1179_v56  ;;  %v7785_v5 = vld [vmem:[#allocation18_spill] sm:$0xff]  ;;  %v1196_v18 = vadd.f32 %v1188_v58, %v1180_v2  ;;  %v1197_v3 = vadd.f32 %v1189_v23, %v1181_v38  ;;  %v1198_v45 = vadd.f32 %v1190_v39, %v1182_v10  ;;  %v1217_v52 = vld [vmem:[%s3320_s4 + $0x650] sm:$0xff]  ;;  %v1282_v44 = vld [vmem:[%s3326_s3 + $0x658] sm:$0xff] }
 0x124   : > { %v4771_v37 = vadd.f32 %v7786_v20, %v7785_v5  ;;  %v1219_v7 = vld [vmem:[%s3320_s4 + $0x660] sm:$0xff]  ;;  %v1281_v24 = vld [vmem:[%s3326_s3 + $0x650] sm:$0xff]  ;;  %v1284_v25 = vld [vmem:[%s3326_s3 + $0x668] sm:$0xff]  ;;  %v4799_v43 = vsub.f32 %v1207_v33, %v1271_v14  ;;  %v4801_v16 = vsub.f32 %v1208_v28, %v1272_v21  ;;  %v4803_v15 = vsub.f32 %v1209_v22, %v1273_v57 }
 0x125   : > { %v1283_v54 = vld [vmem:[%s3326_s3 + $0x660] sm:$0xff]  ;;  %v1199_v1 = vadd.f32 %v1195_v6, %v1191_v41  ;;  %v4785_v17 = vld [vmem:[%s3320_s4 + $0x678] sm:$0xff]  ;;  %v4791_v53 = vld [vmem:[%s3326_s3 + $0x670] sm:$0xff]  ;;  %v1200_v51 = vadd.f32 %v1196_v18, %v1192_v48  ;;  %v1201_v26 = vadd.f32 %v1197_v3, %v1193_v12  ;;  %v1202_v35 = vadd.f32 %v1198_v45, %v1194_v50 }
 0x126   : > { %7787 = vst [vmem:[#allocation34_spill] sm:$0xff] %v4771_v37  ;;  %v4788_v40 = vld [vmem:[%s3320_s4 + $0x680] sm:$0xff]  ;;  %v4794_v55 = vld [vmem:[%s3326_s3 + $0x678] sm:$0xff]  ;;  %v4806_v56 = vld [vmem:[%s3320_s4 + $0x688] sm:$0xff]  ;;  %v4821_v14 = vsub.f32 %v1210_v30, %v1274_v47  ;;  %v4839_v47 = vsub.f32 %v1211_v31, %v1275_v8  ;;  %v4841_v23 = vsub.f32 %v1212_v42, %v1276_v13  ;;  %v4843_v39 = vsub.f32 %v1213_v36, %v1277_v63 }
 0x127   : > { %v4797_v4 = vld [vmem:[%s3326_s3 + $0x680] sm:$0xff]  ;;  %v4809_v2 = vld [vmem:[%s3320_s4 + $0x690] sm:$0xff]  ;;  %v4812_v38 = vld [vmem:[%s3320_s4 + $0x698] sm:$0xff]  ;;  %v4845_v41 = vsub.f32 %v1214_v60, %v1278_v9  ;;  %v1203_v48 = vadd.f32 %v1201_v26, %v1199_v1  ;;  %v1204_v12 = vadd.f32 %v1202_v35, %v1200_v51  ;;  %v4863_v63 = vsub.f32 %v1215_v0, %v1279_v61 }
 0x128   : > { %v4815_v10 = vld [vmem:[%s3320_s4 + $0x6a0] sm:$0xff]  ;;  %v1288_v27 = vld [vmem:[%s3326_s3 + $0x688] sm:$0xff]  ;;  %v1289_v33 = vld [vmem:[%s3326_s3 + $0x690] sm:$0xff]  ;;  %v4865_v9 = vsub.f32 %v1216_v62, %v1280_v46  ;;  %v4883_v62 = vsub.f32 %v1217_v52, %v1281_v24  ;;  %v4885_v46 = vsub.f32 %v1218_v11, %v1282_v44  ;;  %v4887_v51 = vsub.f32 %v1219_v7, %v1283_v54 }
 0x129   : > { %v1290_v28 = vld [vmem:[%s3326_s3 + $0x698] sm:$0xff]  ;;  %v1291_v22 = vld [vmem:[%s3326_s3 + $0x6a0] sm:$0xff]  ;;  %v4824_v29 = vld [vmem:[%s3320_s4 + $0x6a8] sm:$0xff]  ;;  %7788 = vst [vmem:[#allocation35_spill] sm:$0xff] %v4863_v63  ;;  %v4889_v26 = vsub.f32 %v1220_v34, %v1284_v25  ;;  %v4891_v35 = vadd.f32 %v1204_v12, %v1203_v48  ;;  %v4903_v7 = vsub.f32 %v4782_v32, %v4791_v53  ;;  %v4907_v34 = vsub.f32 %v4785_v17, %v4794_v55 }
 0x12a   : > { %v4827_v59 = vld [vmem:[%s3320_s4 + $0x6b0] sm:$0xff]  ;;  %v4830_v19 = vld [vmem:[%s3320_s4 + $0x6b8] sm:$0xff]  ;;  %v4833_v49 = vld [vmem:[%s3320_s4 + $0x6c0] sm:$0xff]  ;;  %7789 = vst [vmem:[#allocation26_spill] sm:$0xff] %v4865_v9  ;;  %v4911_v54 = vsub.f32 %v4788_v40, %v4797_v4  ;;  %v4924_v17 = vsub.f32 %v4809_v2, %v1289_v33  ;;  %v4927_v40 = vsub.f32 %v4812_v38, %v1290_v28  ;;  %v4930_v55 = vsub.f32 %v4815_v10, %v1291_v22 }
 0x12b   : > { %v1292_v21 = vld [vmem:[%s3326_s3 + $0x6a8] sm:$0xff]  ;;  %v1293_v57 = vld [vmem:[%s3326_s3 + $0x6b0] sm:$0xff]  ;;  %v1294_v58 = vld [vmem:[%s3326_s3 + $0x6b8] sm:$0xff]  ;;  %7790 = vst [vmem:[#allocation27_spill] sm:$0xff] %v4883_v62 }
 0x12c   : > { %v1295_v30 = vld [vmem:[%s3326_s3 + $0x6c0] sm:$0xff]  ;;  %v4848_v50 = vld [vmem:[%s3320_s4 + $0x6c8] sm:$0xff]  ;;  %v4851_v6 = vld [vmem:[%s3320_s4 + $0x6d0] sm:$0xff]  ;;  %7791 = vst [vmem:[#allocation11_spill] sm:$0xff] %v4887_v51  ;;  %v4940_v2 = vsub.f32 %v4824_v29, %v1292_v21  ;;  %v4943_v38 = vsub.f32 %v4827_v59, %v1293_v57  ;;  %v4946_v10 = vsub.f32 %v4830_v19, %v1294_v58 }
 0x12d   : > { %v4854_v31 = vld [vmem:[%s3320_s4 + $0x6d8] sm:$0xff]  ;;  %v4857_v42 = vld [vmem:[%s3320_s4 + $0x6e0] sm:$0xff]  ;;  %v1296_v36 = vld [vmem:[%s3326_s3 + $0x6c8] sm:$0xff]  ;;  %7792 = vst [vmem:[#allocation12_spill] sm:$0xff] %v4889_v26  ;;  %v4949_v33 = vsub.f32 %v4833_v49, %v1295_v30 }
 0x12e   : > { %v1297_v8 = vld [vmem:[%s3326_s3 + $0x6d0] sm:$0xff]  ;;  %v1298_v13 = vld [vmem:[%s3326_s3 + $0x6d8] sm:$0xff]  ;;  %v1299_v60 = vld [vmem:[%s3326_s3 + $0x6e0] sm:$0xff]  ;;  %7793 = vst [vmem:[#allocation13_spill] sm:$0xff] %v4891_v35  ;;  %v4959_v59 = vsub.f32 %v4848_v50, %v1296_v36 }
 0x12f   : > { %v4868_v5 = vld [vmem:[%s3320_s4 + $0x6e8] sm:$0xff]  ;;  %v4871_v20 = vld [vmem:[%s3320_s4 + $0x6f0] sm:$0xff]  ;;  %v4874_v18 = vld [vmem:[%s3320_s4 + $0x6f8] sm:$0xff]  ;;  %7794 = vst [vmem:[#allocation14_spill] sm:$0xff] %v4903_v7  ;;  %v4921_v7 = vsub.f32 %v4806_v56, %v1288_v27  ;;  %v4962_v19 = vsub.f32 %v4851_v6, %v1297_v8  ;;  %v4965_v49 = vsub.f32 %v4854_v31, %v1298_v13  ;;  %v4968_v57 = vsub.f32 %v4857_v42, %v1299_v60 }
 0x130   : > { %v4877_v3 = vld [vmem:[%s3320_s4 + $0x700] sm:$0xff]  ;;  %v1300_v45 = vld [vmem:[%s3326_s3 + $0x6e8] sm:$0xff]  ;;  %v1301_v0 = vld [vmem:[%s3326_s3 + $0x6f0] sm:$0xff]  ;;  %7795 = vst [vmem:[#allocation15_spill] sm:$0xff] %v4907_v34 }
 0x131   : > { %v1302_v61 = vld [vmem:[%s3326_s3 + $0x6f8] sm:$0xff]  ;;  %v1303_v1 = vld [vmem:[%s3326_s3 + $0x700] sm:$0xff]  ;;  %v1240_v37 = vld [vmem:[%s3320_s4 + $0x708] sm:$0xff]  ;;  %7796 = vst [vmem:[#allocation16_spill] sm:$0xff] %v4911_v54  ;;  %v4978_v6 = vsub.f32 %v4868_v5, %v1300_v45  ;;  %v4981_v31 = vsub.f32 %v4871_v20, %v1301_v0 }
 0x132   : > { %v1241_v9 = vld [vmem:[%s3320_s4 + $0x710] sm:$0xff]  ;;  %v1242_v63 = vld [vmem:[%s3320_s4 + $0x718] sm:$0xff]  ;;  %v1243_v52 = vld [vmem:[%s3320_s4 + $0x720] sm:$0xff]  ;;  %7797 = vst [vmem:[#allocation17_spill] sm:$0xff] %v4921_v7  ;;  %v4984_v42 = vsub.f32 %v4874_v18, %v1302_v61  ;;  %v4987_v8 = vsub.f32 %v4877_v3, %v1303_v1 }
 0x133   : > { %v1304_v24 = vld [vmem:[%s3326_s3 + $0x708] sm:$0xff]  ;;  %v1305_v62 = vld [vmem:[%s3326_s3 + $0x710] sm:$0xff]  ;;  %v1306_v11 = vld [vmem:[%s3326_s3 + $0x718] sm:$0xff]  ;;  %7798 = vst [vmem:[#allocation23_spill] sm:$0xff] %v4927_v40 }
 0x134   : > { %v1307_v44 = vld [vmem:[%s3326_s3 + $0x720] sm:$0xff]  ;;  %v1244_v25 = vld [vmem:[%s3320_s4 + $0x728] sm:$0xff]  ;;  %v1245_v48 = vld [vmem:[%s3320_s4 + $0x730] sm:$0xff]  ;;  %7799 = vst [vmem:[#allocation25_spill] sm:$0xff] %v4930_v55  ;;  %v4996_v20 = vsub.f32 %v1240_v37, %v1304_v24  ;;  %v4998_v18 = vsub.f32 %v1241_v9, %v1305_v62  ;;  %v5000_v0 = vsub.f32 %v1242_v63, %v1306_v11 }
 0x135   : > { %v1246_v12 = vld [vmem:[%s3320_s4 + $0x738] sm:$0xff]  ;;  %v1247_v35 = vld [vmem:[%s3320_s4 + $0x740] sm:$0xff]  ;;  %v1308_v26 = vld [vmem:[%s3326_s3 + $0x728] sm:$0xff]  ;;  %7800 = vst [vmem:[#allocation36_spill] sm:$0xff] %v4940_v2  ;;  %v5002_v3 = vsub.f32 %v1243_v52, %v1307_v44 }
 0x136   : > { %v1309_v32 = vld [vmem:[%s3326_s3 + $0x730] sm:$0xff]  ;;  %v1310_v53 = vld [vmem:[%s3326_s3 + $0x738] sm:$0xff]  ;;  %v1248_v4 = vld [vmem:[%s3320_s4 + $0x748] sm:$0xff]  ;;  %7801 = vst [vmem:[#allocation37_spill] sm:$0xff] %v4946_v10  ;;  %v5011_v24 = vsub.f32 %v1244_v25, %v1308_v26 }
 0x137   : > { %v1249_v54 = vld [vmem:[%s3320_s4 + $0x750] sm:$0xff]  ;;  %v1250_v34 = vld [vmem:[%s3320_s4 + $0x758] sm:$0xff]  ;;  %v1251_v56 = vld [vmem:[%s3320_s4 + $0x760] sm:$0xff]  ;;  %7802 = vst [vmem:[#allocation38_spill] sm:$0xff] %v4949_v33  ;;  %v5013_v9 = vsub.f32 %v1245_v48, %v1309_v32  ;;  %v5015_v63 = vsub.f32 %v1246_v12, %v1310_v53 }
 0x138   : > { %v1311_v27 = vld [vmem:[%s3326_s3 + $0x740] sm:$0xff]  ;;  %v1312_v7 = vld [vmem:[%s3326_s3 + $0x748] sm:$0xff]  ;;  %v1313_v51 = vld [vmem:[%s3326_s3 + $0x750] sm:$0xff]  ;;  %7803 = vst [vmem:[#allocation39_spill] sm:$0xff] %v4959_v59 }
 0x139   : > { %v1252_v28 = vld [vmem:[%s3320_s4 + $0x768] sm:$0xff]  ;;  %v1253_v22 = vld [vmem:[%s3320_s4 + $0x770] sm:$0xff]  ;;  %v1254_v55 = vld [vmem:[%s3320_s4 + $0x778] sm:$0xff]  ;;  %7804 = vst [vmem:[#allocation40_spill] sm:$0xff] %v4962_v19  ;;  %v5017_v62 = vsub.f32 %v1247_v35, %v1311_v27  ;;  %v5027_v26 = vsub.f32 %v1249_v54, %v1313_v51 }
 0x13a   : > { %v1255_v29 = vld [vmem:[%s3320_s4 + $0x780] sm:$0xff]  ;;  %v1314_v21 = vld [vmem:[%s3326_s3 + $0x758] sm:$0xff]  ;;  %v1316_v40 = vld [vmem:[%s3326_s3 + $0x768] sm:$0xff]  ;;  %7805 = vst [vmem:[#allocation41_spill] sm:$0xff] %v4965_v49 }
 0x13b   : > { %v1315_v2 = vld [vmem:[%s3326_s3 + $0x760] sm:$0xff]  ;;  %7806 = vst [vmem:[#allocation19_spill] sm:$0xff] %v4968_v57  ;;  %v1256_v58 = vld [vmem:[%s3320_s4 + $0x788] sm:$0xff]  ;;  %v1257_v30 = vld [vmem:[%s3320_s4 + $0x790] sm:$0xff]  ;;  %v5029_v25 = vsub.f32 %v1250_v34, %v1314_v21  ;;  %v5036_v53 = vsub.f32 %v1252_v28, %v1316_v40 }
 0x13c   : > { %v1258_v33 = vld [vmem:[%s3320_s4 + $0x798] sm:$0xff]  ;;  %v1259_v50 = vld [vmem:[%s3320_s4 + $0x7a0] sm:$0xff]  ;;  %v1317_v36 = vld [vmem:[%s3326_s3 + $0x770] sm:$0xff]  ;;  %7807 = vst [vmem:[#allocation20_spill] sm:$0xff] %v4978_v6  ;;  %v5031_v48 = vsub.f32 %v1251_v56, %v1315_v2 }
 0x13d   : > { %v1318_v59 = vld [vmem:[%s3326_s3 + $0x778] sm:$0xff]  ;;  %v1319_v10 = vld [vmem:[%s3326_s3 + $0x780] sm:$0xff]  ;;  %7808 = vst [vmem:[#allocation21_spill] sm:$0xff] %v4981_v31  ;;  %7809 = vst [vmem:[#allocation22_spill] sm:$0xff] %v4984_v42  ;;  %v5038_v27 = vsub.f32 %v1253_v22, %v1317_v36 }
 0x13e   : > { %7810 = vst [vmem:[#allocation24_spill] sm:$0xff] %v4987_v8  ;;  %v1260_v13 = vld [vmem:[%s3320_s4 + $0x7a8] sm:$0xff]  ;;  %v1261_v60 = vld [vmem:[%s3320_s4 + $0x7b0] sm:$0xff]  ;;  %v1262_v57 = vld [vmem:[%s3320_s4 + $0x7b8] sm:$0xff] }
 0x13f   : > { %v1263_v5 = vld [vmem:[%s3320_s4 + $0x7c0] sm:$0xff]  ;;  %v1320_v45 = vld [vmem:[%s3326_s3 + $0x788] sm:$0xff]  ;;  %v1321_v6 = vld [vmem:[%s3326_s3 + $0x790] sm:$0xff]  ;;  %7811 = vst [vmem:[#allocation29_spill] sm:$0xff] %v4996_v20  ;;  %v5025_v20 = vsub.f32 %v1248_v4, %v1312_v7 }
 0x140   : > { %v1322_v49 = vld [vmem:[%s3326_s3 + $0x798] sm:$0xff]  ;;  %7812 = vst [vmem:[#allocation30_spill] sm:$0xff] %v4998_v18  ;;  %7813 = vst [vmem:[#allocation31_spill] sm:$0xff] %v5000_v0  ;;  %v1264_v61 = vld [vmem:[%s3320_s4 + $0x7c8] sm:$0xff]  ;;  %v5047_v51 = vsub.f32 %v1256_v58, %v1320_v45  ;;  %v5049_v34 = vsub.f32 %v1257_v30, %v1321_v6  ;;  %v5087_v58 = vmul.f32 %v4803_v15, %v4803_v15 }
 0x141   : > { %7814 = vst [vmem:[#allocation32_spill] sm:$0xff] %v5002_v3  ;;  %v1265_v1 = vld [vmem:[%s3320_s4 + $0x7d0] sm:$0xff]  ;;  %v1266_v8 = vld [vmem:[%s3320_s4 + $0x7d8] sm:$0xff]  ;;  %v1267_v42 = vld [vmem:[%s3320_s4 + $0x7e0] sm:$0xff]  ;;  %v5051_v54 = vsub.f32 %v1258_v33, %v1322_v49  ;;  %v5079_v49 = vmul.f32 %v4799_v43, %v4799_v43  ;;  %v5091_v30 = vmul.f32 %v4821_v14, %v4821_v14  ;;  %v5099_v43 = vmul.f32 %v4841_v23, %v4841_v23 }
 0x142   : > { %v1323_v31 = vld [vmem:[%s3326_s3 + $0x7a0] sm:$0xff]  ;;  %v1324_v19 = vld [vmem:[%s3326_s3 + $0x7a8] sm:$0xff]  ;;  %v1325_v37 = vld [vmem:[%s3326_s3 + $0x7b0] sm:$0xff]  ;;  %7815 = vst [vmem:[#allocation33_spill] sm:$0xff] %v5013_v9  ;;  %v5107_v15 = vmul.f32 %v4845_v41, %v4845_v41 }
 0x143   : > { %7816 = vst [vmem:[#allocation18_spill] sm:$0xff] %v5015_v63  ;;  %7817 = vst [vmem:[#allocation28_spill] sm:$0xff] %v5017_v62  ;;  %v1268_v52 = vld [vmem:[%s3320_s4 + $0x7e8] sm:$0xff]  ;;  %v1269_v11 = vld [vmem:[%s3320_s4 + $0x7f0] sm:$0xff]  ;;  %v5040_v62 = vsub.f32 %v1254_v55, %v1318_v59  ;;  %v5042_v63 = vsub.f32 %v1255_v29, %v1319_v10  ;;  %v5053_v56 = vsub.f32 %v1259_v50, %v1323_v31 }
 0x144   : > { %v1270_v44 = vld [vmem:[%s3320_s4 + $0x7f8] sm:$0xff]  ;;  %v1327_v0 = vld [vmem:[%s3326_s3 + $0x7c0] sm:$0xff]  ;;  %v1328_v18 = vld [vmem:[%s3326_s3 + $0x7c8] sm:$0xff]  ;;  %v5055_v2 = vsub.f32 %v1260_v13, %v1324_v19  ;;  %v5057_v40 = vsub.f32 %v1261_v60, %v1325_v37  ;;  %v5095_v50 = vmul.f32 %v4839_v47, %v4839_v47 }
 0x145   : > { %v1326_v3 = vld [vmem:[%s3326_s3 + $0x7b8] sm:$0xff]  ;;  %v1329_v12 = vld [vmem:[%s3326_s3 + $0x7d0] sm:$0xff]  ;;  %v1331_v32 = vld [vmem:[%s3326_s3 + $0x7e0] sm:$0xff]  ;;  %v5061_v55 = vsub.f32 %v1263_v5, %v1327_v0  ;;  %v5063_v10 = vsub.f32 %v1264_v61, %v1328_v18 }
 0x146   : > { %v1330_v35 = vld [vmem:[%s3326_s3 + $0x7d8] sm:$0xff]  ;;  %v1332_v9 = vld [vmem:[%s3326_s3 + $0x7e8] sm:$0xff]  ;;  %v1333_v7 = vld [vmem:[%s3326_s3 + $0x7f0] sm:$0xff]  ;;  %v5059_v28 = vsub.f32 %v1262_v57, %v1326_v3  ;;  %v5065_v22 = vsub.f32 %v1265_v1, %v1329_v12  ;;  %v5069_v21 = vsub.f32 %v1267_v42, %v1331_v32  ;;  %v5083_v57 = vmul.f32 %v4801_v16, %v4801_v16 }
 0x147   : > { %v1334_v4 = vld [vmem:[%s3326_s3 + $0x7f8] sm:$0xff]  ;;  %v5067_v29 = vsub.f32 %v1266_v8, %v1330_v35  ;;  %v5071_v33 = vsub.f32 %v1268_v52, %v1332_v9  ;;  %v5073_v59 = vsub.f32 %v1269_v11, %v1333_v7  ;;  %v5103_v16 = vmul.f32 %v4843_v39, %v4843_v39  ;;  %v7818_v36 = vld [vmem:[#allocation35_spill] sm:$0xff]  ;;  %v7819_v6 = vld [vmem:[#allocation26_spill] sm:$0xff] }
 0x148   : > { %v5075_v19 = vsub.f32 %v1270_v44, %v1334_v4  ;;  %v5111_v14 = vmul.f32 %v7818_v36, %v7818_v36  ;;  %v5115_v47 = vmul.f32 %v7819_v6, %v7819_v6  ;;  %v7820_v31 = vld [vmem:[#allocation27_spill] sm:$0xff]  ;;  %v5123_v39 = vmul.f32 %v4885_v46, %v4885_v46  ;;  %v7822_v8 = vld [vmem:[#allocation12_spill] sm:$0xff]  ;;  %v7823_v60 = vld [vmem:[#allocation14_spill] sm:$0xff] }
 0x149   : > { %v5119_v23 = vmul.f32 %v7820_v31, %v7820_v31  ;;  %v7821_v42 = vld [vmem:[#allocation11_spill] sm:$0xff]  ;;  %v5131_v13 = vmul.f32 %v7822_v8, %v7822_v8  ;;  %v5135_v5 = vmul.f32 %v7823_v60, %v7823_v60  ;;  %v7825_v0 = vld [vmem:[#allocation16_spill] sm:$0xff]  ;;  %v7826_v3 = vld [vmem:[#allocation17_spill] sm:$0xff]  ;;  %v5151_v1 = vmul.f32 %v4924_v17, %v4924_v17 }
 0x14a   : > { %v5127_v41 = vmul.f32 %v7821_v42, %v7821_v42  ;;  %v7824_v45 = vld [vmem:[#allocation15_spill] sm:$0xff]  ;;  %v5143_v46 = vmul.f32 %v7825_v0, %v7825_v0  ;;  %v5147_v61 = vmul.f32 %v7826_v3, %v7826_v3  ;;  %v7828_v52 = vld [vmem:[#allocation25_spill] sm:$0xff]  ;;  %v7829_v44 = vld [vmem:[#allocation36_spill] sm:$0xff]  ;;  %v5167_v35 = vmul.f32 %v4943_v38, %v4943_v38 }
 0x14b   : > { %v5139_v18 = vmul.f32 %v7824_v45, %v7824_v45  ;;  %v7827_v37 = vld [vmem:[#allocation23_spill] sm:$0xff]  ;;  %v5159_v11 = vmul.f32 %v7828_v52, %v7828_v52  ;;  %v5163_v12 = vmul.f32 %v7829_v44, %v7829_v44  ;;  %v7831_v32 = vld [vmem:[#allocation37_spill] sm:$0xff]  ;;  %v7833_v7 = vld [vmem:[#allocation38_spill] sm:$0xff] }
 0x14c   : > { %v5155_v9 = vmul.f32 %v7827_v37, %v7827_v37  ;;  %7830 = vst [vmem:[#allocation35_spill] sm:$0xff] %v5167_v35  ;;  %v5171_v17 = vmul.f32 %v7831_v32, %v7831_v32  ;;  %v5175_v4 = vmul.f32 %v7833_v7, %v7833_v7  ;;  %v7835_v36 = vld [vmem:[#allocation39_spill] sm:$0xff]  ;;  %v7837_v31 = vld [vmem:[#allocation40_spill] sm:$0xff]  ;;  %v7839_v8 = vld [vmem:[#allocation41_spill] sm:$0xff] }
 0x14d   : > { %v5179_v6 = vmul.f32 %v7835_v36, %v7835_v36  ;;  %v5183_v42 = vmul.f32 %v7837_v31, %v7837_v31  ;;  %v5187_v38 = vmul.f32 %v7839_v8, %v7839_v8  ;;  %v7841_v60 = vld [vmem:[#allocation19_spill] sm:$0xff]  ;;  %v7843_v0 = vld [vmem:[#allocation20_spill] sm:$0xff]  ;;  %v7845_v37 = vld [vmem:[#allocation21_spill] sm:$0xff] }
 0x14e   : > { %7832 = vst [vmem:[#allocation26_spill] sm:$0xff] %v5171_v17  ;;  %7834 = vst [vmem:[#allocation27_spill] sm:$0xff] %v5175_v4  ;;  %v5191_v45 = vmul.f32 %v7841_v60, %v7841_v60  ;;  %v5195_v3 = vmul.f32 %v7843_v0, %v7843_v0  ;;  %v5199_v52 = vmul.f32 %v7845_v37, %v7845_v37  ;;  %v7847_v44 = vld [vmem:[#allocation22_spill] sm:$0xff]  ;;  %v7849_v7 = vld [vmem:[#allocation24_spill] sm:$0xff] }
 0x14f   : > { %7836 = vst [vmem:[#allocation11_spill] sm:$0xff] %v5179_v6  ;;  %7838 = vst [vmem:[#allocation12_spill] sm:$0xff] %v5183_v42  ;;  %v5203_v32 = vmul.f32 %v7847_v44, %v7847_v44  ;;  %v1431_v36 = vmul.f32 %v7849_v7, %v7849_v7  ;;  %v7850_v31 = vld [vmem:[#allocation29_spill] sm:$0xff]  ;;  %v7851_v60 = vld [vmem:[#allocation30_spill] sm:$0xff] }
 0x150   : > { %7840 = vst [vmem:[#allocation14_spill] sm:$0xff] %v5187_v38  ;;  %7842 = vst [vmem:[#allocation15_spill] sm:$0xff] %v5191_v45  ;;  %v1432_v8 = vmul.f32 %v7850_v31, %v7850_v31  ;;  %v1433_v45 = vmul.f32 %v7851_v60, %v7851_v60  ;;  %v7852_v38 = vld [vmem:[#allocation31_spill] sm:$0xff]  ;;  %v7854_v44 = vld [vmem:[#allocation33_spill] sm:$0xff]  ;;  %v1440_v60 = vmul.f32 %v5025_v20, %v5025_v20 }
 0x151   : > { %7844 = vst [vmem:[#allocation16_spill] sm:$0xff] %v5195_v3  ;;  %7846 = vst [vmem:[#allocation17_spill] sm:$0xff] %v5199_v52  ;;  %v1434_v0 = vmul.f32 %v7852_v38, %v7852_v38  ;;  %v7853_v3 = vld [vmem:[#allocation32_spill] sm:$0xff]  ;;  %v1436_v52 = vmul.f32 %v5011_v24, %v5011_v24  ;;  %v7855_v42 = vld [vmem:[#allocation18_spill] sm:$0xff]  ;;  %v1441_v38 = vmul.f32 %v5027_v26, %v5027_v26 }
 0x152   : > { %7848 = vst [vmem:[#allocation23_spill] sm:$0xff] %v5203_v32  ;;  %v1435_v37 = vmul.f32 %v7853_v3, %v7853_v3  ;;  %v1437_v32 = vmul.f32 %v7854_v44, %v7854_v44  ;;  %v1438_v7 = vmul.f32 %v7855_v42, %v7855_v42  ;;  %v7856_v6 = vld [vmem:[#allocation28_spill] sm:$0xff]  ;;  %v1442_v3 = vmul.f32 %v5029_v25, %v5029_v25 }
 0x153   : > { %v1439_v31 = vmul.f32 %v7856_v6, %v7856_v6  ;;  %v1443_v24 = vmul.f32 %v5031_v48, %v5031_v48  ;;  %v1444_v44 = vmul.f32 %v5036_v53, %v5036_v53  ;;  %v1445_v42 = vmul.f32 %v5038_v27, %v5038_v27 }
 0x154   : > { %v1446_v6 = vmul.f32 %v5040_v62, %v5040_v62  ;;  %v1447_v20 = vmul.f32 %v5042_v63, %v5042_v63  ;;  %v1448_v26 = vmul.f32 %v5047_v51, %v5047_v51  ;;  %v1449_v25 = vmul.f32 %v5049_v34, %v5049_v34 }
 0x155   : > { %v1450_v48 = vmul.f32 %v5051_v54, %v5051_v54  ;;  %v1451_v53 = vmul.f32 %v5053_v56, %v5053_v56  ;;  %v1452_v27 = vmul.f32 %v5055_v2, %v5055_v2  ;;  %v1453_v62 = vmul.f32 %v5057_v40, %v5057_v40 }
 0x156   : > { %v1454_v63 = vmul.f32 %v5059_v28, %v5059_v28  ;;  %v1455_v51 = vmul.f32 %v5061_v55, %v5061_v55  ;;  %v1456_v34 = vmul.f32 %v5063_v10, %v5063_v10  ;;  %v1457_v54 = vmul.f32 %v5065_v22, %v5065_v22 }
 0x157   : > { %v1458_v56 = vmul.f32 %v5067_v29, %v5067_v29  ;;  %v1459_v2 = vmul.f32 %v5069_v21, %v5069_v21  ;;  %v1460_v40 = vmul.f32 %v5071_v33, %v5071_v33  ;;  %v1461_v28 = vmul.f32 %v5073_v59, %v5073_v59 }
 0x158   : > { %v1462_v55 = vmul.f32 %v5075_v19, %v5075_v19  ;;  %v1463_v10 = vadd.f32 %v1431_v36, %v5079_v49  ;;  %v1464_v4 = vadd.f32 %v1432_v8, %v5083_v57  ;;  %v1465_v22 = vadd.f32 %v1433_v45, %v5087_v58  ;;  %v7857_v45 = vld [vmem:[#allocation35_spill] sm:$0xff]  ;;  %v7861_v8 = vld [vmem:[#allocation12_spill] sm:$0xff] }
 0x159   : > { %v1466_v29 = vadd.f32 %v1434_v0, %v5091_v30  ;;  %v1467_v17 = vadd.f32 %v1435_v37, %v5095_v50  ;;  %v1468_v21 = vadd.f32 %v1436_v52, %v5099_v43  ;;  %v1469_v33 = vadd.f32 %v1437_v32, %v5103_v16  ;;  %v7858_v52 = vld [vmem:[#allocation26_spill] sm:$0xff]  ;;  %v7859_v32 = vld [vmem:[#allocation27_spill] sm:$0xff]  ;;  %v7865_v37 = vld [vmem:[#allocation17_spill] sm:$0xff] }
 0x15a   : > { %v1470_v35 = vadd.f32 %v1438_v7, %v5107_v15  ;;  %v1471_v59 = vadd.f32 %v1439_v31, %v5111_v14  ;;  %v1472_v19 = vadd.f32 %v1440_v60, %v5115_v47  ;;  %v1473_v49 = vadd.f32 %v1441_v38, %v5119_v23  ;;  %v7860_v36 = vld [vmem:[#allocation11_spill] sm:$0xff] }
 0x15b   : > { %v1474_v57 = vadd.f32 %v1442_v3, %v5123_v39  ;;  %v1475_v58 = vadd.f32 %v1443_v24, %v5127_v41  ;;  %v1476_v30 = vadd.f32 %v1444_v44, %v5131_v13  ;;  %v1477_v50 = vadd.f32 %v1445_v42, %v5135_v5  ;;  %v7863_v0 = vld [vmem:[#allocation15_spill] sm:$0xff] }
 0x15c   : > { %v1478_v43 = vadd.f32 %v1446_v6, %v5139_v18  ;;  %v1479_v16 = vadd.f32 %v1447_v20, %v5143_v46  ;;  %v1480_v15 = vadd.f32 %v1448_v26, %v5147_v61  ;;  %v1481_v14 = vadd.f32 %v1449_v25, %v5151_v1  ;;  %v7862_v61 = vld [vmem:[#allocation14_spill] sm:$0xff]  ;;  %v7866_v31 = vld [vmem:[#allocation23_spill] sm:$0xff] }
 0x15d   : > { %v1482_v47 = vadd.f32 %v1450_v48, %v5155_v9  ;;  %v1483_v23 = vadd.f32 %v1451_v53, %v5159_v11  ;;  %v1484_v39 = vadd.f32 %v1452_v27, %v5163_v12  ;;  %v1485_v41 = vadd.f32 %v1453_v62, %v7857_v45  ;;  %v7864_v11 = vld [vmem:[#allocation16_spill] sm:$0xff]  ;;  %v1527_v48 = vld [vmem:[%s3320_s4 + $0x800] sm:$0xff]  ;;  %v1528_v53 = vld [vmem:[%s3320_s4 + $0x808] sm:$0xff] }
 0x15e   : > { %v1486_v13 = vadd.f32 %v1454_v63, %v7858_v52  ;;  %v1487_v5 = vadd.f32 %v1455_v51, %v7859_v32  ;;  %v1488_v18 = vadd.f32 %v1456_v34, %v7860_v36  ;;  %v1489_v46 = vadd.f32 %v1457_v54, %v7861_v8  ;;  %v1529_v27 = vld [vmem:[%s3320_s4 + $0x810] sm:$0xff]  ;;  %v1591_v62 = vld [vmem:[%s3326_s3 + $0x800] sm:$0xff]  ;;  %v1530_v34 = vld [vmem:[%s3320_s4 + $0x818] sm:$0xff] }
 0x15f   : > { %v1490_v1 = vadd.f32 %v1458_v56, %v7862_v61  ;;  %v1491_v9 = vadd.f32 %v1459_v2, %v7863_v0  ;;  %v1492_v12 = vadd.f32 %v1460_v40, %v7864_v11  ;;  %v1493_v7 = vadd.f32 %v1461_v28, %v7865_v37  ;;  %v1592_v54 = vld [vmem:[%s3326_s3 + $0x808] sm:$0xff]  ;;  %v1593_v56 = vld [vmem:[%s3326_s3 + $0x810] sm:$0xff]  ;;  %v1538_v32 = vld [vmem:[%s3320_s4 + $0x858] sm:$0xff] }
 0x160   : > { %v1494_v60 = vadd.f32 %v1462_v55, %v7866_v31  ;;  %v1495_v38 = vadd.f32 %v1479_v16, %v1463_v10  ;;  %v1496_v3 = vadd.f32 %v1480_v15, %v1464_v4  ;;  %v1497_v24 = vadd.f32 %v1481_v14, %v1465_v22  ;;  %v1531_v10 = vld [vmem:[%s3320_s4 + $0x820] sm:$0xff]  ;;  %v1532_v22 = vld [vmem:[%s3320_s4 + $0x828] sm:$0xff]  ;;  %v1598_v16 = vld [vmem:[%s3326_s3 + $0x838] sm:$0xff] }
 0x161   : > { %v1498_v44 = vadd.f32 %v1482_v47, %v1466_v29  ;;  %v1499_v42 = vadd.f32 %v1483_v23, %v1467_v17  ;;  %v1500_v6 = vadd.f32 %v1484_v39, %v1468_v21  ;;  %v1501_v20 = vadd.f32 %v1485_v41, %v1469_v33  ;;  %v1533_v29 = vld [vmem:[%s3320_s4 + $0x830] sm:$0xff]  ;;  %v1534_v21 = vld [vmem:[%s3320_s4 + $0x838] sm:$0xff]  ;;  %v1595_v33 = vld [vmem:[%s3326_s3 + $0x820] sm:$0xff] }
 0x162   : > { %v1502_v26 = vadd.f32 %v1486_v13, %v1470_v35  ;;  %v1503_v25 = vadd.f32 %v1487_v5, %v1471_v59  ;;  %v1504_v4 = vadd.f32 %v1488_v18, %v1472_v19  ;;  %v1505_v63 = vadd.f32 %v1489_v46, %v1473_v49  ;;  %v1594_v35 = vld [vmem:[%s3326_s3 + $0x818] sm:$0xff]  ;;  %v1596_v59 = vld [vmem:[%s3326_s3 + $0x828] sm:$0xff]  ;;  %v1597_v19 = vld [vmem:[%s3326_s3 + $0x830] sm:$0xff] }
 0x163   : > { %v1506_v51 = vadd.f32 %v1490_v1, %v1474_v57  ;;  %v1507_v17 = vadd.f32 %v1491_v9, %v1475_v58  ;;  %v1508_v2 = vadd.f32 %v1492_v12, %v1476_v30  ;;  %v1509_v40 = vadd.f32 %v1493_v7, %v1477_v50  ;;  %v1535_v50 = vld [vmem:[%s3320_s4 + $0x840] sm:$0xff]  ;;  %v1600_v14 = vld [vmem:[%s3326_s3 + $0x848] sm:$0xff]  ;;  %v7868_v23 = vld [vmem:[#allocation13_spill] sm:$0xff] }
 0x164   : > { %v1510_v28 = vadd.f32 %v1494_v60, %v1478_v43  ;;  %v1511_v55 = vadd.f32 %v1503_v25, %v1495_v38  ;;  %v1512_v49 = vadd.f32 %v1504_v4, %v1496_v3  ;;  %v1513_v57 = vadd.f32 %v1505_v63, %v1497_v24  ;;  %v1536_v43 = vld [vmem:[%s3320_s4 + $0x848] sm:$0xff]  ;;  %v1599_v15 = vld [vmem:[%s3326_s3 + $0x840] sm:$0xff]  ;;  %v1537_v13 = vld [vmem:[%s3320_s4 + $0x850] sm:$0xff] }
 0x165   : > { %v1514_v58 = vadd.f32 %v1506_v51, %v1498_v44  ;;  %v1515_v30 = vadd.f32 %v1507_v17, %v1499_v42  ;;  %v7867_v47 = vld [vmem:[#allocation34_spill] sm:$0xff]  ;;  %v1516_v45 = vadd.f32 %v1508_v2, %v1500_v6  ;;  %v1517_v41 = vadd.f32 %v1509_v40, %v1501_v20  ;;  %v1540_v36 = vld [vmem:[%s3320_s4 + $0x868] sm:$0xff]  ;;  %v1601_v18 = vld [vmem:[%s3326_s3 + $0x850] sm:$0xff] }
 0x166   : > { %v5323_v39 = vadd.f32 %v7868_v23, %v7867_v47  ;;  %v1518_v52 = vadd.f32 %v1510_v28, %v1502_v26  ;;  %v1539_v5 = vld [vmem:[%s3320_s4 + $0x860] sm:$0xff]  ;;  %v1602_v8 = vld [vmem:[%s3326_s3 + $0x858] sm:$0xff]  ;;  %v1604_v61 = vld [vmem:[%s3326_s3 + $0x868] sm:$0xff]  ;;  %v5351_v31 = vsub.f32 %v1527_v48, %v1591_v62  ;;  %v5353_v60 = vsub.f32 %v1528_v53, %v1592_v54 }
 0x167   : > { %v1603_v46 = vld [vmem:[%s3326_s3 + $0x860] sm:$0xff]  ;;  %v1519_v1 = vadd.f32 %v1515_v30, %v1511_v55  ;;  %v5334_v0 = vld [vmem:[%s3320_s4 + $0x870] sm:$0xff]  ;;  %v5337_v9 = vld [vmem:[%s3320_s4 + $0x878] sm:$0xff]  ;;  %v5355_v38 = vsub.f32 %v1529_v27, %v1593_v56  ;;  %v1520_v3 = vadd.f32 %v1516_v45, %v1512_v49  ;;  %v1521_v24 = vadd.f32 %v1517_v41, %v1513_v57 }
 0x168   : > { %7869 = vst [vmem:[#allocation25_spill] sm:$0xff] %v5323_v39  ;;  %v5340_v11 = vld [vmem:[%s3320_s4 + $0x880] sm:$0xff]  ;;  %v5343_v12 = vld [vmem:[%s3326_s3 + $0x870] sm:$0xff]  ;;  %v5346_v37 = vld [vmem:[%s3326_s3 + $0x878] sm:$0xff]  ;;  %v1522_v44 = vadd.f32 %v1518_v52, %v1514_v58  ;;  %v5373_v62 = vsub.f32 %v1530_v34, %v1594_v35  ;;  %v5391_v35 = vsub.f32 %v1531_v10, %v1595_v33  ;;  %v5393_v40 = vsub.f32 %v1532_v22, %v1596_v59 }
 0x169   : > { %v5349_v7 = vld [vmem:[%s3326_s3 + $0x880] sm:$0xff]  ;;  %v5358_v42 = vld [vmem:[%s3320_s4 + $0x888] sm:$0xff]  ;;  %v5361_v6 = vld [vmem:[%s3320_s4 + $0x890] sm:$0xff]  ;;  %v5395_v28 = vsub.f32 %v1533_v29, %v1597_v19  ;;  %v5397_v55 = vsub.f32 %v1534_v21, %v1598_v16  ;;  %v1523_v49 = vadd.f32 %v1521_v24, %v1519_v1  ;;  %v5415_v19 = vsub.f32 %v1535_v50, %v1599_v15 }
 0x16a   : > { %v5364_v20 = vld [vmem:[%s3320_s4 + $0x898] sm:$0xff]  ;;  %v5367_v26 = vld [vmem:[%s3320_s4 + $0x8a0] sm:$0xff]  ;;  %v1608_v25 = vld [vmem:[%s3326_s3 + $0x888] sm:$0xff]  ;;  %v1524_v57 = vadd.f32 %v1522_v44, %v1520_v3  ;;  %v5417_v16 = vsub.f32 %v1536_v43, %v1600_v14  ;;  %v5435_v43 = vsub.f32 %v1537_v13, %v1601_v18  ;;  %v5437_v14 = vsub.f32 %v1538_v32, %v1602_v8 }
 0x16b   : > { %v1609_v48 = vld [vmem:[%s3326_s3 + $0x890] sm:$0xff]  ;;  %v1610_v53 = vld [vmem:[%s3326_s3 + $0x898] sm:$0xff]  ;;  %v1611_v27 = vld [vmem:[%s3326_s3 + $0x8a0] sm:$0xff]  ;;  %7870 = vst [vmem:[#allocation36_spill] sm:$0xff] %v5415_v19  ;;  %v5439_v3 = vsub.f32 %v1539_v5, %v1603_v46  ;;  %v5441_v24 = vsub.f32 %v1540_v36, %v1604_v61  ;;  %v5455_v5 = vsub.f32 %v5334_v0, %v5343_v12  ;;  %v5459_v36 = vsub.f32 %v5337_v9, %v5346_v37 }
 0x16c   : > { %v5376_v4 = vld [vmem:[%s3320_s4 + $0x8a8] sm:$0xff]  ;;  %v5379_v63 = vld [vmem:[%s3320_s4 + $0x8b0] sm:$0xff]  ;;  %v5382_v51 = vld [vmem:[%s3320_s4 + $0x8b8] sm:$0xff]  ;;  %7871 = vst [vmem:[#allocation37_spill] sm:$0xff] %v5417_v16  ;;  %v5443_v44 = vadd.f32 %v1524_v57, %v1523_v49  ;;  %v5463_v46 = vsub.f32 %v5340_v11, %v5349_v7  ;;  %v5476_v9 = vsub.f32 %v5361_v6, %v1609_v48  ;;  %v5479_v11 = vsub.f32 %v5364_v20, %v1610_v53 }
 0x16d   : > { %v5385_v17 = vld [vmem:[%s3320_s4 + $0x8c0] sm:$0xff]  ;;  %v1612_v54 = vld [vmem:[%s3326_s3 + $0x8a8] sm:$0xff]  ;;  %v1613_v56 = vld [vmem:[%s3326_s3 + $0x8b0] sm:$0xff]  ;;  %7872 = vst [vmem:[#allocation38_spill] sm:$0xff] %v5435_v43  ;;  %v5482_v37 = vsub.f32 %v5367_v26, %v1611_v27 }
 0x16e   : > { %v1614_v2 = vld [vmem:[%s3326_s3 + $0x8b8] sm:$0xff]  ;;  %v1615_v34 = vld [vmem:[%s3326_s3 + $0x8c0] sm:$0xff]  ;;  %v5400_v58 = vld [vmem:[%s3320_s4 + $0x8c8] sm:$0xff]  ;;  %7873 = vst [vmem:[#allocation39_spill] sm:$0xff] %v5439_v3  ;;  %v5492_v6 = vsub.f32 %v5376_v4, %v1612_v54  ;;  %v5495_v20 = vsub.f32 %v5379_v63, %v1613_v56 }
 0x16f   : > { %v5403_v30 = vld [vmem:[%s3320_s4 + $0x8d0] sm:$0xff]  ;;  %v5406_v10 = vld [vmem:[%s3320_s4 + $0x8d8] sm:$0xff]  ;;  %v5409_v22 = vld [vmem:[%s3320_s4 + $0x8e0] sm:$0xff]  ;;  %7874 = vst [vmem:[#allocation40_spill] sm:$0xff] %v5441_v24  ;;  %v5498_v26 = vsub.f32 %v5382_v51, %v1614_v2  ;;  %v5501_v48 = vsub.f32 %v5385_v17, %v1615_v34 }
 0x170   : > { %v1616_v29 = vld [vmem:[%s3326_s3 + $0x8c8] sm:$0xff]  ;;  %v1617_v33 = vld [vmem:[%s3326_s3 + $0x8d0] sm:$0xff]  ;;  %v1618_v59 = vld [vmem:[%s3326_s3 + $0x8d8] sm:$0xff]  ;;  %7875 = vst [vmem:[#allocation41_spill] sm:$0xff] %v5443_v44 }
 0x171   : > { %v1619_v21 = vld [vmem:[%s3326_s3 + $0x8e0] sm:$0xff]  ;;  %v5420_v47 = vld [vmem:[%s3320_s4 + $0x8e8] sm:$0xff]  ;;  %v5423_v23 = vld [vmem:[%s3320_s4 + $0x8f0] sm:$0xff]  ;;  %7876 = vst [vmem:[#allocation19_spill] sm:$0xff] %v5455_v5  ;;  %v5473_v5 = vsub.f32 %v5358_v42, %v1608_v25  ;;  %v5511_v63 = vsub.f32 %v5400_v58, %v1616_v29  ;;  %v5514_v51 = vsub.f32 %v5403_v30, %v1617_v33  ;;  %v5517_v17 = vsub.f32 %v5406_v10, %v1618_v59 }
 0x172   : > { %v5426_v45 = vld [vmem:[%s3320_s4 + $0x8f8] sm:$0xff]  ;;  %v5429_v41 = vld [vmem:[%s3320_s4 + $0x900] sm:$0xff]  ;;  %v1620_v52 = vld [vmem:[%s3326_s3 + $0x8e8] sm:$0xff]  ;;  %7877 = vst [vmem:[#allocation20_spill] sm:$0xff] %v5459_v36  ;;  %v5520_v56 = vsub.f32 %v5409_v22, %v1619_v21 }
 0x173   : > { %v1621_v50 = vld [vmem:[%s3326_s3 + $0x8f0] sm:$0xff]  ;;  %v1622_v15 = vld [vmem:[%s3326_s3 + $0x8f8] sm:$0xff]  ;;  %v1623_v1 = vld [vmem:[%s3326_s3 + $0x900] sm:$0xff]  ;;  %7878 = vst [vmem:[#allocation21_spill] sm:$0xff] %v5463_v46  ;;  %v5530_v30 = vsub.f32 %v5420_v47, %v1620_v52 }
 0x174   : > { %v1560_v39 = vld [vmem:[%s3320_s4 + $0x908] sm:$0xff]  ;;  %v1561_v16 = vld [vmem:[%s3320_s4 + $0x910] sm:$0xff]  ;;  %v1562_v19 = vld [vmem:[%s3320_s4 + $0x918] sm:$0xff]  ;;  %7879 = vst [vmem:[#allocation22_spill] sm:$0xff] %v5473_v5  ;;  %v5533_v10 = vsub.f32 %v5423_v23, %v1621_v50  ;;  %v5536_v22 = vsub.f32 %v5426_v45, %v1622_v15  ;;  %v5539_v33 = vsub.f32 %v5429_v41, %v1623_v1 }
 0x175   : > { %v1563_v13 = vld [vmem:[%s3320_s4 + $0x920] sm:$0xff]  ;;  %v1624_v18 = vld [vmem:[%s3326_s3 + $0x908] sm:$0xff]  ;;  %v1625_v43 = vld [vmem:[%s3326_s3 + $0x910] sm:$0xff]  ;;  %7880 = vst [vmem:[#allocation24_spill] sm:$0xff] %v5479_v11 }
 0x176   : > { %v1626_v32 = vld [vmem:[%s3326_s3 + $0x918] sm:$0xff]  ;;  %v1627_v8 = vld [vmem:[%s3326_s3 + $0x920] sm:$0xff]  ;;  %v1564_v61 = vld [vmem:[%s3320_s4 + $0x928] sm:$0xff]  ;;  %7881 = vst [vmem:[#allocation29_spill] sm:$0xff] %v5482_v37  ;;  %v5548_v23 = vsub.f32 %v1560_v39, %v1624_v18  ;;  %v5550_v45 = vsub.f32 %v1561_v16, %v1625_v43 }
 0x177   : > { %v1565_v49 = vld [vmem:[%s3320_s4 + $0x930] sm:$0xff]  ;;  %v1566_v57 = vld [vmem:[%s3320_s4 + $0x938] sm:$0xff]  ;;  %v1567_v44 = vld [vmem:[%s3320_s4 + $0x940] sm:$0xff]  ;;  %7882 = vst [vmem:[#allocation30_spill] sm:$0xff] %v5492_v6  ;;  %v5552_v50 = vsub.f32 %v1562_v19, %v1626_v32  ;;  %v5554_v41 = vsub.f32 %v1563_v13, %v1627_v8 }
 0x178   : > { %v1628_v24 = vld [vmem:[%s3326_s3 + $0x928] sm:$0xff]  ;;  %v1629_v0 = vld [vmem:[%s3326_s3 + $0x930] sm:$0xff]  ;;  %v1630_v12 = vld [vmem:[%s3326_s3 + $0x938] sm:$0xff]  ;;  %7883 = vst [vmem:[#allocation31_spill] sm:$0xff] %v5498_v26 }
 0x179   : > { %v1568_v7 = vld [vmem:[%s3320_s4 + $0x948] sm:$0xff]  ;;  %v1569_v46 = vld [vmem:[%s3320_s4 + $0x950] sm:$0xff]  ;;  %v1570_v36 = vld [vmem:[%s3320_s4 + $0x958] sm:$0xff]  ;;  %7884 = vst [vmem:[#allocation32_spill] sm:$0xff] %v5501_v48  ;;  %v5563_v18 = vsub.f32 %v1564_v61, %v1628_v24  ;;  %v5565_v16 = vsub.f32 %v1565_v49, %v1629_v0  ;;  %v5567_v19 = vsub.f32 %v1566_v57, %v1630_v12 }
 0x17a   : > { %v1571_v42 = vld [vmem:[%s3320_s4 + $0x960] sm:$0xff]  ;;  %v1632_v5 = vld [vmem:[%s3326_s3 + $0x948] sm:$0xff]  ;;  %v1633_v3 = vld [vmem:[%s3326_s3 + $0x950] sm:$0xff]  ;;  %7885 = vst [vmem:[#allocation33_spill] sm:$0xff] %v5511_v63 }
 0x17b   : > { %v1631_v25 = vld [vmem:[%s3326_s3 + $0x940] sm:$0xff]  ;;  %v1572_v53 = vld [vmem:[%s3320_s4 + $0x968] sm:$0xff]  ;;  %v1573_v27 = vld [vmem:[%s3320_s4 + $0x970] sm:$0xff]  ;;  %7886 = vst [vmem:[#allocation18_spill] sm:$0xff] %v5514_v51  ;;  %v5579_v24 = vsub.f32 %v1569_v46, %v1633_v3 }
 0x17c   : > { %v1574_v37 = vld [vmem:[%s3320_s4 + $0x978] sm:$0xff]  ;;  %v1575_v4 = vld [vmem:[%s3320_s4 + $0x980] sm:$0xff]  ;;  %v1636_v11 = vld [vmem:[%s3326_s3 + $0x968] sm:$0xff]  ;;  %7887 = vst [vmem:[#allocation28_spill] sm:$0xff] %v5517_v17  ;;  %v5569_v43 = vsub.f32 %v1567_v44, %v1631_v25 }
 0x17d   : > { %v1634_v54 = vld [vmem:[%s3326_s3 + $0x958] sm:$0xff]  ;;  %v1635_v6 = vld [vmem:[%s3326_s3 + $0x960] sm:$0xff]  ;;  %7888 = vst [vmem:[#allocation35_spill] sm:$0xff] %v5520_v56  ;;  %v1576_v2 = vld [vmem:[%s3320_s4 + $0x988] sm:$0xff]  ;;  %v5588_v12 = vsub.f32 %v1572_v53, %v1636_v11 }
 0x17e   : > { %v1577_v34 = vld [vmem:[%s3320_s4 + $0x990] sm:$0xff]  ;;  %v1578_v48 = vld [vmem:[%s3320_s4 + $0x998] sm:$0xff]  ;;  %v1579_v58 = vld [vmem:[%s3320_s4 + $0x9a0] sm:$0xff]  ;;  %7889 = vst [vmem:[#allocation26_spill] sm:$0xff] %v5530_v30  ;;  %v5581_v61 = vsub.f32 %v1570_v36, %v1634_v54  ;;  %v5583_v49 = vsub.f32 %v1571_v42, %v1635_v6 }
 0x17f   : > { %v1637_v29 = vld [vmem:[%s3326_s3 + $0x970] sm:$0xff]  ;;  %v1638_v63 = vld [vmem:[%s3326_s3 + $0x978] sm:$0xff]  ;;  %v1639_v26 = vld [vmem:[%s3326_s3 + $0x980] sm:$0xff]  ;;  %7890 = vst [vmem:[#allocation27_spill] sm:$0xff] %v5533_v10 }
 0x180   : > { %7891 = vst [vmem:[#allocation11_spill] sm:$0xff] %v5536_v22  ;;  %7892 = vst [vmem:[#allocation12_spill] sm:$0xff] %v5539_v33  ;;  %v1580_v59 = vld [vmem:[%s3320_s4 + $0x9a8] sm:$0xff]  ;;  %v1581_v21 = vld [vmem:[%s3320_s4 + $0x9b0] sm:$0xff]  ;;  %v5590_v25 = vsub.f32 %v1573_v27, %v1637_v29 }
 0x181   : > { %v1582_v56 = vld [vmem:[%s3320_s4 + $0x9b8] sm:$0xff]  ;;  %v1583_v47 = vld [vmem:[%s3320_s4 + $0x9c0] sm:$0xff]  ;;  %v1640_v52 = vld [vmem:[%s3326_s3 + $0x988] sm:$0xff]  ;;  %7893 = vst [vmem:[#allocation14_spill] sm:$0xff] %v5548_v23  ;;  %v5577_v23 = vsub.f32 %v1568_v7, %v1632_v5 }
 0x182   : > { %v1641_v30 = vld [vmem:[%s3326_s3 + $0x990] sm:$0xff]  ;;  %v1642_v17 = vld [vmem:[%s3326_s3 + $0x998] sm:$0xff]  ;;  %7894 = vst [vmem:[#allocation15_spill] sm:$0xff] %v5550_v45  ;;  %7895 = vst [vmem:[#allocation16_spill] sm:$0xff] %v5552_v50  ;;  %v5599_v3 = vsub.f32 %v1576_v2, %v1640_v52  ;;  %v5639_v2 = vmul.f32 %v5355_v38, %v5355_v38  ;;  %v5659_v38 = vmul.f32 %v5397_v55, %v5397_v55 }
 0x183   : > { %7896 = vst [vmem:[#allocation17_spill] sm:$0xff] %v5554_v41  ;;  %v1584_v15 = vld [vmem:[%s3320_s4 + $0x9c8] sm:$0xff]  ;;  %v1585_v1 = vld [vmem:[%s3320_s4 + $0x9d0] sm:$0xff]  ;;  %v1586_v33 = vld [vmem:[%s3320_s4 + $0x9d8] sm:$0xff]  ;;  %v5601_v36 = vsub.f32 %v1577_v34, %v1641_v30  ;;  %v5603_v46 = vsub.f32 %v1578_v48, %v1642_v17  ;;  %v5631_v17 = vmul.f32 %v5351_v31, %v5351_v31  ;;  %v5643_v34 = vmul.f32 %v5373_v62, %v5373_v62 }
 0x184   : > { %v1587_v22 = vld [vmem:[%s3320_s4 + $0x9e0] sm:$0xff]  ;;  %v1644_v51 = vld [vmem:[%s3326_s3 + $0x9a8] sm:$0xff]  ;;  %v1645_v39 = vld [vmem:[%s3326_s3 + $0x9b0] sm:$0xff]  ;;  %7897 = vst [vmem:[#allocation23_spill] sm:$0xff] %v5565_v16  ;;  %v5651_v31 = vmul.f32 %v5393_v40, %v5393_v40 }
 0x185   : > { %v1643_v10 = vld [vmem:[%s3326_s3 + $0x9a0] sm:$0xff]  ;;  %7898 = vst [vmem:[#allocation34_spill] sm:$0xff] %v5567_v19  ;;  %7899 = vst [vmem:[#allocation13_spill] sm:$0xff] %v5569_v43  ;;  %v1588_v13 = vld [vmem:[%s3320_s4 + $0x9e8] sm:$0xff]  ;;  %v5592_v43 = vsub.f32 %v1574_v37, %v1638_v63  ;;  %v5594_v19 = vsub.f32 %v1575_v4, %v1639_v26  ;;  %v5607_v6 = vsub.f32 %v1580_v59, %v1644_v51 }
 0x186   : > { %v1589_v32 = vld [vmem:[%s3320_s4 + $0x9f0] sm:$0xff]  ;;  %v1590_v8 = vld [vmem:[%s3320_s4 + $0x9f8] sm:$0xff]  ;;  %v1647_v50 = vld [vmem:[%s3326_s3 + $0x9c0] sm:$0xff]  ;;  %v5605_v42 = vsub.f32 %v1579_v58, %v1643_v10  ;;  %v5609_v11 = vsub.f32 %v1581_v21, %v1645_v39  ;;  %v5647_v58 = vmul.f32 %v5391_v35, %v5391_v35 }
 0x187   : > { %v1646_v41 = vld [vmem:[%s3326_s3 + $0x9b8] sm:$0xff]  ;;  %v1648_v45 = vld [vmem:[%s3326_s3 + $0x9c8] sm:$0xff]  ;;  %v1649_v57 = vld [vmem:[%s3326_s3 + $0x9d0] sm:$0xff]  ;;  %v5613_v37 = vsub.f32 %v1583_v47, %v1647_v50 }
 0x188   : > { %v1650_v44 = vld [vmem:[%s3326_s3 + $0x9d8] sm:$0xff]  ;;  %v1651_v0 = vld [vmem:[%s3326_s3 + $0x9e0] sm:$0xff]  ;;  %v1652_v16 = vld [vmem:[%s3326_s3 + $0x9e8] sm:$0xff]  ;;  %v5611_v53 = vsub.f32 %v1582_v56, %v1646_v41  ;;  %v5615_v26 = vsub.f32 %v1584_v15, %v1648_v45  ;;  %v5617_v27 = vsub.f32 %v1585_v1, %v1649_v57  ;;  %v5635_v56 = vmul.f32 %v5353_v60, %v5353_v60 }
 0x189   : > { %v1653_v5 = vld [vmem:[%s3326_s3 + $0x9f0] sm:$0xff]  ;;  %v1654_v7 = vld [vmem:[%s3326_s3 + $0x9f8] sm:$0xff]  ;;  %v5619_v4 = vsub.f32 %v1586_v33, %v1650_v44  ;;  %v5621_v54 = vsub.f32 %v1587_v22, %v1651_v0  ;;  %v5623_v48 = vsub.f32 %v1588_v13, %v1652_v16  ;;  %v5655_v60 = vmul.f32 %v5395_v28, %v5395_v28  ;;  %v7902_v10 = vld [vmem:[#allocation38_spill] sm:$0xff] }
 0x18a   : > { %v5625_v63 = vsub.f32 %v1589_v32, %v1653_v5  ;;  %v5627_v51 = vsub.f32 %v1590_v8, %v1654_v7  ;;  %v7900_v29 = vld [vmem:[#allocation36_spill] sm:$0xff]  ;;  %v7901_v30 = vld [vmem:[#allocation37_spill] sm:$0xff]  ;;  %v5671_v40 = vmul.f32 %v7902_v10, %v7902_v10  ;;  %v5675_v28 = vmul.f32 %v5437_v14, %v5437_v14  ;;  %v7903_v22 = vld [vmem:[#allocation39_spill] sm:$0xff] }
 0x18b   : > { %v5663_v62 = vmul.f32 %v7900_v29, %v7900_v29  ;;  %v5667_v35 = vmul.f32 %v7901_v30, %v7901_v30  ;;  %v5679_v55 = vmul.f32 %v7903_v22, %v7903_v22  ;;  %v7904_v33 = vld [vmem:[#allocation40_spill] sm:$0xff]  ;;  %v7905_v21 = vld [vmem:[#allocation19_spill] sm:$0xff]  ;;  %v7907_v50 = vld [vmem:[#allocation21_spill] sm:$0xff]  ;;  %v5703_v1 = vmul.f32 %v5476_v9, %v5476_v9 }
 0x18c   : > { %v5683_v59 = vmul.f32 %v7904_v33, %v7904_v33  ;;  %v5687_v47 = vmul.f32 %v7905_v21, %v7905_v21  ;;  %v7906_v52 = vld [vmem:[#allocation20_spill] sm:$0xff]  ;;  %v5695_v14 = vmul.f32 %v7907_v50, %v7907_v50  ;;  %v7908_v41 = vld [vmem:[#allocation22_spill] sm:$0xff]  ;;  %v7910_v13 = vld [vmem:[#allocation29_spill] sm:$0xff]  ;;  %v5719_v44 = vmul.f32 %v5495_v20, %v5495_v20 }
 0x18d   : > { %v5691_v45 = vmul.f32 %v7906_v52, %v7906_v52  ;;  %v5699_v15 = vmul.f32 %v7908_v41, %v7908_v41  ;;  %v7909_v39 = vld [vmem:[#allocation24_spill] sm:$0xff]  ;;  %v5711_v32 = vmul.f32 %v7910_v13, %v7910_v13  ;;  %v7911_v8 = vld [vmem:[#allocation30_spill] sm:$0xff]  ;;  %v7913_v0 = vld [vmem:[#allocation31_spill] sm:$0xff] }
 0x18e   : > { %v5707_v16 = vmul.f32 %v7909_v39, %v7909_v39  ;;  %v5715_v57 = vmul.f32 %v7911_v8, %v7911_v8  ;;  %7912 = vst [vmem:[#allocation36_spill] sm:$0xff] %v5719_v44  ;;  %v5723_v9 = vmul.f32 %v7913_v0, %v7913_v0  ;;  %v7915_v5 = vld [vmem:[#allocation32_spill] sm:$0xff]  ;;  %v7917_v29 = vld [vmem:[#allocation33_spill] sm:$0xff]  ;;  %v7919_v10 = vld [vmem:[#allocation18_spill] sm:$0xff] }
 0x18f   : > { %v5727_v7 = vmul.f32 %v7915_v5, %v7915_v5  ;;  %v5731_v30 = vmul.f32 %v7917_v29, %v7917_v29  ;;  %v5735_v22 = vmul.f32 %v7919_v10, %v7919_v10  ;;  %v7921_v33 = vld [vmem:[#allocation28_spill] sm:$0xff]  ;;  %v7923_v21 = vld [vmem:[#allocation35_spill] sm:$0xff]  ;;  %v7925_v50 = vld [vmem:[#allocation26_spill] sm:$0xff] }
 0x190   : > { %7914 = vst [vmem:[#allocation37_spill] sm:$0xff] %v5723_v9  ;;  %v5739_v20 = vmul.f32 %v7921_v33, %v7921_v33  ;;  %v5743_v52 = vmul.f32 %v7923_v21, %v7923_v21  ;;  %v5747_v41 = vmul.f32 %v7925_v50, %v7925_v50  ;;  %v7927_v39 = vld [vmem:[#allocation27_spill] sm:$0xff]  ;;  %v7931_v5 = vld [vmem:[#allocation12_spill] sm:$0xff]  ;;  %v7932_v10 = vld [vmem:[#allocation14_spill] sm:$0xff] }
 0x191   : > { %7916 = vst [vmem:[#allocation38_spill] sm:$0xff] %v5727_v7  ;;  %7918 = vst [vmem:[#allocation39_spill] sm:$0xff] %v5731_v30  ;;  %v5751_v13 = vmul.f32 %v7927_v39, %v7927_v39  ;;  %v7929_v8 = vld [vmem:[#allocation11_spill] sm:$0xff]  ;;  %v1751_v29 = vmul.f32 %v7931_v5, %v7931_v5  ;;  %v1752_v33 = vmul.f32 %v7932_v10, %v7932_v10  ;;  %v7938_v30 = vld [vmem:[#allocation13_spill] sm:$0xff] }
 0x192   : > { %7920 = vst [vmem:[#allocation40_spill] sm:$0xff] %v5735_v22  ;;  %7922 = vst [vmem:[#allocation19_spill] sm:$0xff] %v5739_v20  ;;  %v5755_v0 = vmul.f32 %v7929_v8, %v7929_v8  ;;  %v7933_v21 = vld [vmem:[#allocation15_spill] sm:$0xff]  ;;  %v7934_v20 = vld [vmem:[#allocation16_spill] sm:$0xff]  ;;  %v1759_v10 = vmul.f32 %v7938_v30, %v7938_v30  ;;  %v1766_v30 = vmul.f32 %v5592_v43, %v5592_v43 }
 0x193   : > { %7924 = vst [vmem:[#allocation20_spill] sm:$0xff] %v5743_v52  ;;  %7926 = vst [vmem:[#allocation21_spill] sm:$0xff] %v5747_v41  ;;  %v1753_v52 = vmul.f32 %v7933_v21, %v7933_v21  ;;  %v1754_v50 = vmul.f32 %v7934_v20, %v7934_v20  ;;  %v7935_v41 = vld [vmem:[#allocation17_spill] sm:$0xff]  ;;  %v7936_v8 = vld [vmem:[#allocation23_spill] sm:$0xff]  ;;  %v1760_v21 = vmul.f32 %v5577_v23, %v5577_v23 }
 0x194   : > { %7928 = vst [vmem:[#allocation22_spill] sm:$0xff] %v5751_v13  ;;  %7930 = vst [vmem:[#allocation24_spill] sm:$0xff] %v5755_v0  ;;  %v1755_v39 = vmul.f32 %v7935_v41, %v7935_v41  ;;  %v1756_v13 = vmul.f32 %v5563_v18, %v5563_v18  ;;  %v1757_v0 = vmul.f32 %v7936_v8, %v7936_v8  ;;  %v7937_v22 = vld [vmem:[#allocation34_spill] sm:$0xff] }
 0x195   : > { %v1758_v5 = vmul.f32 %v7937_v22, %v7937_v22  ;;  %v1761_v20 = vmul.f32 %v5579_v24, %v5579_v24  ;;  %v1762_v41 = vmul.f32 %v5581_v61, %v5581_v61  ;;  %v1763_v18 = vmul.f32 %v5583_v49, %v5583_v49 }
 0x196   : > { %v1764_v8 = vmul.f32 %v5588_v12, %v5588_v12  ;;  %v1765_v22 = vmul.f32 %v5590_v25, %v5590_v25  ;;  %v1767_v23 = vmul.f32 %v5594_v19, %v5594_v19  ;;  %v1768_v24 = vmul.f32 %v5599_v3, %v5599_v3 }
 0x197   : > { %v1769_v61 = vmul.f32 %v5601_v36, %v5601_v36  ;;  %v1770_v49 = vmul.f32 %v5603_v46, %v5603_v46  ;;  %v1771_v12 = vmul.f32 %v5605_v42, %v5605_v42  ;;  %v1772_v25 = vmul.f32 %v5607_v6, %v5607_v6 }
 0x198   : > { %v1773_v43 = vmul.f32 %v5609_v11, %v5609_v11  ;;  %v1774_v19 = vmul.f32 %v5611_v53, %v5611_v53  ;;  %v1775_v3 = vmul.f32 %v5613_v37, %v5613_v37  ;;  %v1776_v36 = vmul.f32 %v5615_v26, %v5615_v26 }
 0x199   : > { %v1777_v46 = vmul.f32 %v5617_v27, %v5617_v27  ;;  %v1778_v42 = vmul.f32 %v5619_v4, %v5619_v4  ;;  %v1779_v6 = vmul.f32 %v5621_v54, %v5621_v54  ;;  %v1780_v11 = vmul.f32 %v5623_v48, %v5623_v48 }
 0x19a   : > { %v1781_v53 = vmul.f32 %v5625_v63, %v5625_v63  ;;  %v1782_v37 = vmul.f32 %v5627_v51, %v5627_v51  ;;  %v1783_v26 = vadd.f32 %v1751_v29, %v5631_v17  ;;  %v1784_v7 = vadd.f32 %v1752_v33, %v5635_v56  ;;  %v7942_v29 = vld [vmem:[#allocation39_spill] sm:$0xff]  ;;  %v7943_v33 = vld [vmem:[#allocation40_spill] sm:$0xff] }
 0x19b   : > { %v1785_v27 = vadd.f32 %v1753_v52, %v5639_v2  ;;  %v1786_v4 = vadd.f32 %v1754_v50, %v5643_v34  ;;  %v1787_v9 = vadd.f32 %v1755_v39, %v5647_v58  ;;  %v1788_v54 = vadd.f32 %v1756_v13, %v5651_v31  ;;  %v7939_v52 = vld [vmem:[#allocation36_spill] sm:$0xff]  ;;  %v7940_v13 = vld [vmem:[#allocation37_spill] sm:$0xff]  ;;  %v7947_v39 = vld [vmem:[#allocation22_spill] sm:$0xff] }
 0x19c   : > { %v1789_v48 = vadd.f32 %v1757_v0, %v5655_v60  ;;  %v1790_v44 = vadd.f32 %v1758_v5, %v5659_v38  ;;  %v1791_v63 = vadd.f32 %v1759_v10, %v5663_v62  ;;  %v1792_v51 = vadd.f32 %v1760_v21, %v5667_v35  ;;  %v7941_v0 = vld [vmem:[#allocation38_spill] sm:$0xff]  ;;  %v7945_v50 = vld [vmem:[#allocation20_spill] sm:$0xff] }
 0x19d   : > { %v1793_v17 = vadd.f32 %v1761_v20, %v5671_v40  ;;  %v1794_v56 = vadd.f32 %v1762_v41, %v5675_v28  ;;  %v1795_v2 = vadd.f32 %v1763_v18, %v5679_v55  ;;  %v1796_v34 = vadd.f32 %v1764_v8, %v5683_v59  ;;  %v7948_v10 = vld [vmem:[#allocation24_spill] sm:$0xff] }
 0x19e   : > { %v1797_v58 = vadd.f32 %v1765_v22, %v5687_v47  ;;  %v1798_v31 = vadd.f32 %v1766_v30, %v5691_v45  ;;  %v1799_v60 = vadd.f32 %v1767_v23, %v5695_v14  ;;  %v1800_v38 = vadd.f32 %v1768_v24, %v5699_v15  ;;  %v7944_v15 = vld [vmem:[#allocation19_spill] sm:$0xff] }
 0x19f   : > { %v1801_v62 = vadd.f32 %v1769_v61, %v5703_v1  ;;  %v1802_v35 = vadd.f32 %v1770_v49, %v5707_v16  ;;  %v1803_v40 = vadd.f32 %v1771_v12, %v5711_v32  ;;  %v1804_v28 = vadd.f32 %v1772_v25, %v5715_v57  ;;  %v7946_v32 = vld [vmem:[#allocation21_spill] sm:$0xff]  ;;  %v1847_v49 = vld [vmem:[%s3320_s4 + $0xa00] sm:$0xff]  ;;  %v1848_v12 = vld [vmem:[%s3320_s4 + $0xa08] sm:$0xff] }
 0x1a0   : > { %v1805_v55 = vadd.f32 %v1773_v43, %v7939_v52  ;;  %v1806_v59 = vadd.f32 %v1774_v19, %v7940_v13  ;;  %v1807_v47 = vadd.f32 %v1775_v3, %v7941_v0  ;;  %v1808_v45 = vadd.f32 %v1776_v36, %v7942_v29  ;;  %v1849_v25 = vld [vmem:[%s3320_s4 + $0xa10] sm:$0xff]  ;;  %v1911_v43 = vld [vmem:[%s3326_s3 + $0xa00] sm:$0xff]  ;;  %v1850_v36 = vld [vmem:[%s3320_s4 + $0xa18] sm:$0xff] }
 0x1a1   : > { %v1809_v14 = vadd.f32 %v1777_v46, %v7943_v33  ;;  %v1810_v1 = vadd.f32 %v1778_v42, %v7944_v15  ;;  %v1811_v16 = vadd.f32 %v1779_v6, %v7945_v50  ;;  %v1812_v57 = vadd.f32 %v1780_v11, %v7946_v32  ;;  %v1912_v46 = vld [vmem:[%s3326_s3 + $0xa08] sm:$0xff]  ;;  %v1913_v42 = vld [vmem:[%s3326_s3 + $0xa10] sm:$0xff]  ;;  %v1858_v0 = vld [vmem:[%s3320_s4 + $0xa58] sm:$0xff] }
 0x1a2   : > { %v1813_v5 = vadd.f32 %v1781_v53, %v7947_v39  ;;  %v1814_v21 = vadd.f32 %v1782_v37, %v7948_v10  ;;  %v1815_v20 = vadd.f32 %v1799_v60, %v1783_v26  ;;  %v1816_v41 = vadd.f32 %v1800_v38, %v1784_v7  ;;  %v1851_v26 = vld [vmem:[%s3320_s4 + $0xa20] sm:$0xff]  ;;  %v1918_v60 = vld [vmem:[%s3326_s3 + $0xa38] sm:$0xff]  ;;  %v1860_v29 = vld [vmem:[%s3320_s4 + $0xa68] sm:$0xff] }
 0x1a3   : > { %v1817_v18 = vadd.f32 %v1801_v62, %v1785_v27  ;;  %v1818_v8 = vadd.f32 %v1802_v35, %v1786_v4  ;;  %v1819_v22 = vadd.f32 %v1803_v40, %v1787_v9  ;;  %v1820_v30 = vadd.f32 %v1804_v28, %v1788_v54  ;;  %v1852_v27 = vld [vmem:[%s3320_s4 + $0xa28] sm:$0xff]  ;;  %v1853_v4 = vld [vmem:[%s3320_s4 + $0xa30] sm:$0xff]  ;;  %v1854_v54 = vld [vmem:[%s3320_s4 + $0xa38] sm:$0xff] }
 0x1a4   : > { %v1821_v23 = vadd.f32 %v1805_v55, %v1789_v48  ;;  %v1822_v24 = vadd.f32 %v1806_v59, %v1790_v44  ;;  %v1823_v61 = vadd.f32 %v1807_v47, %v1791_v63  ;;  %v1824_v7 = vadd.f32 %v1808_v45, %v1792_v51  ;;  %v1914_v44 = vld [vmem:[%s3326_s3 + $0xa18] sm:$0xff]  ;;  %v1915_v48 = vld [vmem:[%s3326_s3 + $0xa20] sm:$0xff]  ;;  %v1916_v63 = vld [vmem:[%s3326_s3 + $0xa28] sm:$0xff] }
 0x1a5   : > { %v1825_v19 = vadd.f32 %v1809_v14, %v1793_v17  ;;  %v1826_v3 = vadd.f32 %v1810_v1, %v1794_v56  ;;  %v1827_v9 = vadd.f32 %v1811_v16, %v1795_v2  ;;  %v1828_v6 = vadd.f32 %v1812_v57, %v1796_v34  ;;  %v1917_v51 = vld [vmem:[%s3326_s3 + $0xa30] sm:$0xff]  ;;  %v1919_v38 = vld [vmem:[%s3326_s3 + $0xa40] sm:$0xff]  ;;  %v1920_v62 = vld [vmem:[%s3326_s3 + $0xa48] sm:$0xff] }
 0x1a6   : > { %v1829_v11 = vadd.f32 %v1813_v5, %v1797_v58  ;;  %v1830_v53 = vadd.f32 %v1814_v21, %v1798_v31  ;;  %v1831_v37 = vadd.f32 %v1823_v61, %v1815_v20  ;;  %v1832_v17 = vadd.f32 %v1824_v7, %v1816_v41  ;;  %v1855_v58 = vld [vmem:[%s3320_s4 + $0xa40] sm:$0xff]  ;;  %v1856_v31 = vld [vmem:[%s3320_s4 + $0xa48] sm:$0xff]  ;;  %v7949_v35 = vld [vmem:[#allocation25_spill] sm:$0xff] }
 0x1a7   : > { %v1833_v56 = vadd.f32 %v1825_v19, %v1817_v18  ;;  %v1834_v2 = vadd.f32 %v1826_v3, %v1818_v8  ;;  %v1835_v34 = vadd.f32 %v1827_v9, %v1819_v22  ;;  %v7950_v40 = vld [vmem:[#allocation41_spill] sm:$0xff]  ;;  %v1836_v52 = vadd.f32 %v1828_v6, %v1820_v30  ;;  %v1857_v59 = vld [vmem:[%s3320_s4 + $0xa50] sm:$0xff]  ;;  %v1859_v47 = vld [vmem:[%s3320_s4 + $0xa60] sm:$0xff] }
 0x1a8   : > { %v5875_v28 = vadd.f32 %v7950_v40, %v7949_v35  ;;  %v1837_v55 = vadd.f32 %v1829_v11, %v1821_v23  ;;  %v1838_v13 = vadd.f32 %v1830_v53, %v1822_v24  ;;  %v1921_v45 = vld [vmem:[%s3326_s3 + $0xa50] sm:$0xff]  ;;  %v1922_v33 = vld [vmem:[%s3326_s3 + $0xa58] sm:$0xff]  ;;  %v1923_v14 = vld [vmem:[%s3326_s3 + $0xa60] sm:$0xff]  ;;  %v5903_v10 = vsub.f32 %v1847_v49, %v1911_v43 }
 0x1a9   : > { %v1924_v15 = vld [vmem:[%s3326_s3 + $0xa68] sm:$0xff]  ;;  %v1839_v1 = vadd.f32 %v1835_v34, %v1831_v37  ;;  %v5886_v50 = vld [vmem:[%s3320_s4 + $0xa70] sm:$0xff]  ;;  %v5889_v16 = vld [vmem:[%s3320_s4 + $0xa78] sm:$0xff]  ;;  %v5905_v21 = vsub.f32 %v1848_v12, %v1912_v46  ;;  %v5907_v20 = vsub.f32 %v1849_v25, %v1913_v42  ;;  %v1840_v41 = vadd.f32 %v1836_v52, %v1832_v17 }
 0x1aa   : > { %7951 = vst [vmem:[#allocation29_spill] sm:$0xff] %v5875_v28  ;;  %v5892_v32 = vld [vmem:[%s3320_s4 + $0xa80] sm:$0xff]  ;;  %v5895_v57 = vld [vmem:[%s3326_s3 + $0xa70] sm:$0xff]  ;;  %v5898_v39 = vld [vmem:[%s3326_s3 + $0xa78] sm:$0xff]  ;;  %v1841_v18 = vadd.f32 %v1837_v55, %v1833_v56  ;;  %v1842_v8 = vadd.f32 %v1838_v13, %v1834_v2  ;;  %v5925_v43 = vsub.f32 %v1850_v36, %v1914_v44  ;;  %v5943_v44 = vsub.f32 %v1851_v26, %v1915_v48 }
 0x1ab   : > { %v5901_v5 = vld [vmem:[%s3326_s3 + $0xa80] sm:$0xff]  ;;  %v5910_v22 = vld [vmem:[%s3320_s4 + $0xa88] sm:$0xff]  ;;  %v5913_v30 = vld [vmem:[%s3320_s4 + $0xa90] sm:$0xff]  ;;  %v5945_v11 = vsub.f32 %v1852_v27, %v1916_v63  ;;  %v5947_v53 = vsub.f32 %v1853_v4, %v1917_v51  ;;  %v5949_v37 = vsub.f32 %v1854_v54, %v1918_v60  ;;  %v5967_v51 = vsub.f32 %v1855_v58, %v1919_v38 }
 0x1ac   : > { %v5916_v23 = vld [vmem:[%s3320_s4 + $0xa98] sm:$0xff]  ;;  %v5919_v24 = vld [vmem:[%s3320_s4 + $0xaa0] sm:$0xff]  ;;  %v1928_v61 = vld [vmem:[%s3326_s3 + $0xa88] sm:$0xff]  ;;  %v1843_v17 = vadd.f32 %v1841_v18, %v1839_v1  ;;  %v1844_v56 = vadd.f32 %v1842_v8, %v1840_v41  ;;  %v5969_v60 = vsub.f32 %v1856_v31, %v1920_v62  ;;  %v5987_v31 = vsub.f32 %v1857_v59, %v1921_v45 }
 0x1ad   : > { %v1929_v49 = vld [vmem:[%s3326_s3 + $0xa90] sm:$0xff]  ;;  %v1930_v12 = vld [vmem:[%s3326_s3 + $0xa98] sm:$0xff]  ;;  %v1931_v25 = vld [vmem:[%s3326_s3 + $0xaa0] sm:$0xff]  ;;  %7952 = vst [vmem:[#allocation30_spill] sm:$0xff] %v5967_v51  ;;  %v5989_v62 = vsub.f32 %v1858_v0, %v1922_v33  ;;  %v5991_v41 = vsub.f32 %v1859_v47, %v1923_v14  ;;  %v5993_v18 = vsub.f32 %v1860_v29, %v1924_v15  ;;  %v6007_v47 = vsub.f32 %v5886_v50, %v5895_v57 }
 0x1ae   : > { %v5928_v7 = vld [vmem:[%s3320_s4 + $0xaa8] sm:$0xff]  ;;  %v5931_v19 = vld [vmem:[%s3320_s4 + $0xab0] sm:$0xff]  ;;  %v5934_v3 = vld [vmem:[%s3320_s4 + $0xab8] sm:$0xff]  ;;  %7953 = vst [vmem:[#allocation31_spill] sm:$0xff] %v5969_v60  ;;  %v5995_v8 = vadd.f32 %v1844_v56, %v1843_v17  ;;  %v6011_v29 = vsub.f32 %v5889_v16, %v5898_v39  ;;  %v6015_v14 = vsub.f32 %v5892_v32, %v5901_v5  ;;  %v6028_v16 = vsub.f32 %v5913_v30, %v1929_v49 }
 0x1af   : > { %v5937_v9 = vld [vmem:[%s3320_s4 + $0xac0] sm:$0xff]  ;;  %v1932_v46 = vld [vmem:[%s3326_s3 + $0xaa8] sm:$0xff]  ;;  %v1933_v42 = vld [vmem:[%s3326_s3 + $0xab0] sm:$0xff]  ;;  %7954 = vst [vmem:[#allocation32_spill] sm:$0xff] %v5987_v31  ;;  %v6031_v32 = vsub.f32 %v5916_v23, %v1930_v12  ;;  %v6034_v39 = vsub.f32 %v5919_v24, %v1931_v25 }
 0x1b0   : > { %v1934_v6 = vld [vmem:[%s3326_s3 + $0xab8] sm:$0xff]  ;;  %v1935_v36 = vld [vmem:[%s3326_s3 + $0xac0] sm:$0xff]  ;;  %v5952_v2 = vld [vmem:[%s3320_s4 + $0xac8] sm:$0xff]  ;;  %7955 = vst [vmem:[#allocation33_spill] sm:$0xff] %v5991_v41  ;;  %v6044_v30 = vsub.f32 %v5928_v7, %v1932_v46  ;;  %v6047_v23 = vsub.f32 %v5931_v19, %v1933_v42 }
 0x1b1   : > { %v5955_v34 = vld [vmem:[%s3320_s4 + $0xad0] sm:$0xff]  ;;  %v5958_v26 = vld [vmem:[%s3320_s4 + $0xad8] sm:$0xff]  ;;  %v5961_v27 = vld [vmem:[%s3320_s4 + $0xae0] sm:$0xff]  ;;  %7956 = vst [vmem:[#allocation18_spill] sm:$0xff] %v5993_v18  ;;  %v6050_v24 = vsub.f32 %v5934_v3, %v1934_v6  ;;  %v6053_v49 = vsub.f32 %v5937_v9, %v1935_v36 }
 0x1b2   : > { %v1936_v4 = vld [vmem:[%s3326_s3 + $0xac8] sm:$0xff]  ;;  %v1937_v48 = vld [vmem:[%s3326_s3 + $0xad0] sm:$0xff]  ;;  %v1938_v63 = vld [vmem:[%s3326_s3 + $0xad8] sm:$0xff]  ;;  %7957 = vst [vmem:[#allocation28_spill] sm:$0xff] %v5995_v8 }
 0x1b3   : > { %v1939_v54 = vld [vmem:[%s3326_s3 + $0xae0] sm:$0xff]  ;;  %v5972_v35 = vld [vmem:[%s3320_s4 + $0xae8] sm:$0xff]  ;;  %v5975_v40 = vld [vmem:[%s3320_s4 + $0xaf0] sm:$0xff]  ;;  %7958 = vst [vmem:[#allocation35_spill] sm:$0xff] %v6007_v47  ;;  %v6025_v47 = vsub.f32 %v5910_v22, %v1928_v61  ;;  %v6063_v19 = vsub.f32 %v5952_v2, %v1936_v4  ;;  %v6066_v3 = vsub.f32 %v5955_v34, %v1937_v48  ;;  %v6069_v9 = vsub.f32 %v5958_v26, %v1938_v63 }
 0x1b4   : > { %v5978_v52 = vld [vmem:[%s3320_s4 + $0xaf8] sm:$0xff]  ;;  %v5981_v55 = vld [vmem:[%s3320_s4 + $0xb00] sm:$0xff]  ;;  %v1940_v13 = vld [vmem:[%s3326_s3 + $0xae8] sm:$0xff]  ;;  %7959 = vst [vmem:[#allocation26_spill] sm:$0xff] %v6011_v29  ;;  %v6072_v42 = vsub.f32 %v5961_v27, %v1939_v54 }
 0x1b5   : > { %v1941_v58 = vld [vmem:[%s3326_s3 + $0xaf0] sm:$0xff]  ;;  %v1942_v38 = vld [vmem:[%s3326_s3 + $0xaf8] sm:$0xff]  ;;  %v1943_v1 = vld [vmem:[%s3326_s3 + $0xb00] sm:$0xff]  ;;  %7960 = vst [vmem:[#allocation27_spill] sm:$0xff] %v6015_v14  ;;  %v6082_v34 = vsub.f32 %v5972_v35, %v1940_v13 }
 0x1b6   : > { %v1880_v28 = vld [vmem:[%s3320_s4 + $0xb08] sm:$0xff]  ;;  %v1881_v60 = vld [vmem:[%s3320_s4 + $0xb10] sm:$0xff]  ;;  %v1882_v51 = vld [vmem:[%s3320_s4 + $0xb18] sm:$0xff]  ;;  %7961 = vst [vmem:[#allocation11_spill] sm:$0xff] %v6025_v47  ;;  %v6085_v26 = vsub.f32 %v5975_v40, %v1941_v58  ;;  %v6088_v27 = vsub.f32 %v5978_v52, %v1942_v38  ;;  %v6091_v48 = vsub.f32 %v5981_v55, %v1943_v1 }
 0x1b7   : > { %v1883_v59 = vld [vmem:[%s3320_s4 + $0xb20] sm:$0xff]  ;;  %v1944_v45 = vld [vmem:[%s3326_s3 + $0xb08] sm:$0xff]  ;;  %v1945_v31 = vld [vmem:[%s3326_s3 + $0xb10] sm:$0xff]  ;;  %7962 = vst [vmem:[#allocation12_spill] sm:$0xff] %v6031_v32 }
 0x1b8   : > { %v1946_v0 = vld [vmem:[%s3326_s3 + $0xb18] sm:$0xff]  ;;  %v1947_v33 = vld [vmem:[%s3326_s3 + $0xb20] sm:$0xff]  ;;  %v1884_v15 = vld [vmem:[%s3320_s4 + $0xb28] sm:$0xff]  ;;  %7963 = vst [vmem:[#allocation14_spill] sm:$0xff] %v6034_v39  ;;  %v6100_v40 = vsub.f32 %v1880_v28, %v1944_v45  ;;  %v6102_v52 = vsub.f32 %v1881_v60, %v1945_v31 }
 0x1b9   : > { %v1885_v17 = vld [vmem:[%s3320_s4 + $0xb30] sm:$0xff]  ;;  %v1886_v56 = vld [vmem:[%s3320_s4 + $0xb38] sm:$0xff]  ;;  %v1887_v8 = vld [vmem:[%s3320_s4 + $0xb40] sm:$0xff]  ;;  %7964 = vst [vmem:[#allocation15_spill] sm:$0xff] %v6044_v30  ;;  %v6104_v58 = vsub.f32 %v1882_v51, %v1946_v0  ;;  %v6106_v55 = vsub.f32 %v1883_v59, %v1947_v33 }
 0x1ba   : > { %v1948_v18 = vld [vmem:[%s3326_s3 + $0xb28] sm:$0xff]  ;;  %v1949_v50 = vld [vmem:[%s3326_s3 + $0xb30] sm:$0xff]  ;;  %v1950_v57 = vld [vmem:[%s3326_s3 + $0xb38] sm:$0xff]  ;;  %7965 = vst [vmem:[#allocation16_spill] sm:$0xff] %v6050_v24 }
 0x1bb   : > { %v1888_v5 = vld [vmem:[%s3320_s4 + $0xb48] sm:$0xff]  ;;  %v1889_v14 = vld [vmem:[%s3320_s4 + $0xb50] sm:$0xff]  ;;  %v1890_v29 = vld [vmem:[%s3320_s4 + $0xb58] sm:$0xff]  ;;  %7966 = vst [vmem:[#allocation17_spill] sm:$0xff] %v6053_v49  ;;  %v6115_v45 = vsub.f32 %v1884_v15, %v1948_v18  ;;  %v6117_v60 = vsub.f32 %v1885_v17, %v1949_v50  ;;  %v6119_v51 = vsub.f32 %v1886_v56, %v1950_v57 }
 0x1bc   : > { %v1891_v22 = vld [vmem:[%s3320_s4 + $0xb60] sm:$0xff]  ;;  %v1952_v47 = vld [vmem:[%s3326_s3 + $0xb48] sm:$0xff]  ;;  %v1953_v41 = vld [vmem:[%s3326_s3 + $0xb50] sm:$0xff]  ;;  %7967 = vst [vmem:[#allocation23_spill] sm:$0xff] %v6063_v19 }
 0x1bd   : > { %v1951_v61 = vld [vmem:[%s3326_s3 + $0xb40] sm:$0xff]  ;;  %v1892_v12 = vld [vmem:[%s3320_s4 + $0xb68] sm:$0xff]  ;;  %v1893_v25 = vld [vmem:[%s3320_s4 + $0xb70] sm:$0xff]  ;;  %7968 = vst [vmem:[#allocation34_spill] sm:$0xff] %v6066_v3  ;;  %v6131_v18 = vsub.f32 %v1889_v14, %v1953_v41 }
 0x1be   : > { %v1894_v39 = vld [vmem:[%s3320_s4 + $0xb78] sm:$0xff]  ;;  %v1895_v7 = vld [vmem:[%s3320_s4 + $0xb80] sm:$0xff]  ;;  %v1956_v32 = vld [vmem:[%s3326_s3 + $0xb68] sm:$0xff]  ;;  %7969 = vst [vmem:[#allocation13_spill] sm:$0xff] %v6069_v9  ;;  %v6121_v31 = vsub.f32 %v1887_v8, %v1951_v61 }
 0x1bf   : > { %v1954_v46 = vld [vmem:[%s3326_s3 + $0xb58] sm:$0xff]  ;;  %v1955_v30 = vld [vmem:[%s3326_s3 + $0xb60] sm:$0xff]  ;;  %7970 = vst [vmem:[#allocation36_spill] sm:$0xff] %v6072_v42  ;;  %v1896_v6 = vld [vmem:[%s3320_s4 + $0xb88] sm:$0xff]  ;;  %v6140_v57 = vsub.f32 %v1892_v12, %v1956_v32 }
 0x1c0   : > { %v1897_v36 = vld [vmem:[%s3320_s4 + $0xb90] sm:$0xff]  ;;  %v1898_v49 = vld [vmem:[%s3320_s4 + $0xb98] sm:$0xff]  ;;  %v1899_v2 = vld [vmem:[%s3320_s4 + $0xba0] sm:$0xff]  ;;  %7971 = vst [vmem:[#allocation37_spill] sm:$0xff] %v6082_v34  ;;  %v6133_v15 = vsub.f32 %v1890_v29, %v1954_v46  ;;  %v6135_v17 = vsub.f32 %v1891_v22, %v1955_v30 }
 0x1c1   : > { %v1957_v4 = vld [vmem:[%s3326_s3 + $0xb70] sm:$0xff]  ;;  %v1958_v19 = vld [vmem:[%s3326_s3 + $0xb78] sm:$0xff]  ;;  %v1959_v24 = vld [vmem:[%s3326_s3 + $0xb80] sm:$0xff]  ;;  %7972 = vst [vmem:[#allocation38_spill] sm:$0xff] %v6085_v26 }
 0x1c2   : > { %7973 = vst [vmem:[#allocation39_spill] sm:$0xff] %v6088_v27  ;;  %7974 = vst [vmem:[#allocation40_spill] sm:$0xff] %v6091_v48  ;;  %v1900_v63 = vld [vmem:[%s3320_s4 + $0xba8] sm:$0xff]  ;;  %v1901_v54 = vld [vmem:[%s3320_s4 + $0xbb0] sm:$0xff]  ;;  %v6142_v61 = vsub.f32 %v1893_v25, %v1957_v4 }
 0x1c3   : > { %v1902_v42 = vld [vmem:[%s3320_s4 + $0xbb8] sm:$0xff]  ;;  %v1903_v35 = vld [vmem:[%s3320_s4 + $0xbc0] sm:$0xff]  ;;  %v1960_v13 = vld [vmem:[%s3326_s3 + $0xb88] sm:$0xff]  ;;  %7975 = vst [vmem:[#allocation19_spill] sm:$0xff] %v6100_v40  ;;  %v6129_v40 = vsub.f32 %v1888_v5, %v1952_v47 }
 0x1c4   : > { %v1961_v34 = vld [vmem:[%s3326_s3 + $0xb90] sm:$0xff]  ;;  %v1962_v9 = vld [vmem:[%s3326_s3 + $0xb98] sm:$0xff]  ;;  %7976 = vst [vmem:[#allocation20_spill] sm:$0xff] %v6102_v52  ;;  %7977 = vst [vmem:[#allocation21_spill] sm:$0xff] %v6104_v58  ;;  %v6151_v41 = vsub.f32 %v1896_v6, %v1960_v13  ;;  %v6191_v6 = vmul.f32 %v5907_v20, %v5907_v20  ;;  %v6211_v20 = vmul.f32 %v5949_v37, %v5949_v37 }
 0x1c5   : > { %7978 = vst [vmem:[#allocation22_spill] sm:$0xff] %v6106_v55  ;;  %v1904_v38 = vld [vmem:[%s3320_s4 + $0xbc8] sm:$0xff]  ;;  %v1905_v1 = vld [vmem:[%s3320_s4 + $0xbd0] sm:$0xff]  ;;  %v1906_v48 = vld [vmem:[%s3320_s4 + $0xbd8] sm:$0xff]  ;;  %v6153_v29 = vsub.f32 %v1897_v36, %v1961_v34  ;;  %v6155_v14 = vsub.f32 %v1898_v49, %v1962_v9  ;;  %v6183_v9 = vmul.f32 %v5903_v10, %v5903_v10  ;;  %v6195_v36 = vmul.f32 %v5925_v43, %v5925_v43 }
 0x1c6   : > { %v1907_v27 = vld [vmem:[%s3320_s4 + $0xbe0] sm:$0xff]  ;;  %v1964_v3 = vld [vmem:[%s3326_s3 + $0xba8] sm:$0xff]  ;;  %v1965_v28 = vld [vmem:[%s3326_s3 + $0xbb0] sm:$0xff]  ;;  %7979 = vst [vmem:[#allocation24_spill] sm:$0xff] %v6117_v60  ;;  %v6203_v10 = vmul.f32 %v5945_v11, %v5945_v11 }
 0x1c7   : > { %v1963_v26 = vld [vmem:[%s3326_s3 + $0xba0] sm:$0xff]  ;;  %7980 = vst [vmem:[#allocation25_spill] sm:$0xff] %v6119_v51  ;;  %7981 = vst [vmem:[#allocation41_spill] sm:$0xff] %v6121_v31  ;;  %v1908_v59 = vld [vmem:[%s3320_s4 + $0xbe8] sm:$0xff]  ;;  %v6144_v31 = vsub.f32 %v1894_v39, %v1958_v19  ;;  %v6146_v51 = vsub.f32 %v1895_v7, %v1959_v24  ;;  %v6159_v30 = vsub.f32 %v1900_v63, %v1964_v3 }
 0x1c8   : > { %v1909_v0 = vld [vmem:[%s3320_s4 + $0xbf0] sm:$0xff]  ;;  %v1910_v33 = vld [vmem:[%s3320_s4 + $0xbf8] sm:$0xff]  ;;  %v1967_v58 = vld [vmem:[%s3326_s3 + $0xbc0] sm:$0xff]  ;;  %v6157_v22 = vsub.f32 %v1899_v2, %v1963_v26  ;;  %v6161_v32 = vsub.f32 %v1901_v54, %v1965_v28  ;;  %v6199_v2 = vmul.f32 %v5943_v44, %v5943_v44 }
 0x1c9   : > { %v1966_v55 = vld [vmem:[%s3326_s3 + $0xbb8] sm:$0xff]  ;;  %v1968_v52 = vld [vmem:[%s3326_s3 + $0xbc8] sm:$0xff]  ;;  %v1969_v56 = vld [vmem:[%s3326_s3 + $0xbd0] sm:$0xff]  ;;  %v6165_v39 = vsub.f32 %v1903_v35, %v1967_v58 }
 0x1ca   : > { %v1970_v8 = vld [vmem:[%s3326_s3 + $0xbd8] sm:$0xff]  ;;  %v1971_v50 = vld [vmem:[%s3326_s3 + $0xbe0] sm:$0xff]  ;;  %v1972_v60 = vld [vmem:[%s3326_s3 + $0xbe8] sm:$0xff]  ;;  %v6163_v12 = vsub.f32 %v1902_v42, %v1966_v55  ;;  %v6167_v24 = vsub.f32 %v1904_v38, %v1968_v52  ;;  %v6169_v25 = vsub.f32 %v1905_v1, %v1969_v56  ;;  %v6187_v42 = vmul.f32 %v5905_v21, %v5905_v21 }
 0x1cb   : > { %v1973_v47 = vld [vmem:[%s3326_s3 + $0xbf0] sm:$0xff]  ;;  %v1974_v5 = vld [vmem:[%s3326_s3 + $0xbf8] sm:$0xff]  ;;  %v6171_v7 = vsub.f32 %v1906_v48, %v1970_v8  ;;  %v6173_v46 = vsub.f32 %v1907_v27, %v1971_v50  ;;  %v6175_v49 = vsub.f32 %v1908_v59, %v1972_v60  ;;  %v6207_v21 = vmul.f32 %v5947_v53, %v5947_v53  ;;  %v7982_v4 = vld [vmem:[#allocation30_spill] sm:$0xff] }
 0x1cc   : > { %v6177_v19 = vsub.f32 %v1909_v0, %v1973_v47  ;;  %v6179_v3 = vsub.f32 %v1910_v33, %v1974_v5  ;;  %v6215_v43 = vmul.f32 %v7982_v4, %v7982_v4  ;;  %v7983_v34 = vld [vmem:[#allocation31_spill] sm:$0xff]  ;;  %v7984_v26 = vld [vmem:[#allocation32_spill] sm:$0xff]  ;;  %v6227_v53 = vmul.f32 %v5989_v62, %v5989_v62  ;;  %v7985_v27 = vld [vmem:[#allocation33_spill] sm:$0xff] }
 0x1cd   : > { %v6219_v44 = vmul.f32 %v7983_v34, %v7983_v34  ;;  %v6223_v11 = vmul.f32 %v7984_v26, %v7984_v26  ;;  %v6231_v37 = vmul.f32 %v7985_v27, %v7985_v27  ;;  %v7986_v48 = vld [vmem:[#allocation18_spill] sm:$0xff]  ;;  %v7987_v54 = vld [vmem:[#allocation35_spill] sm:$0xff]  ;;  %v6255_v1 = vmul.f32 %v6028_v16, %v6028_v16  ;;  %v7991_v28 = vld [vmem:[#allocation12_spill] sm:$0xff] }
 0x1ce   : > { %v6235_v63 = vmul.f32 %v7986_v48, %v7986_v48  ;;  %v6239_v35 = vmul.f32 %v7987_v54, %v7987_v54  ;;  %v7988_v13 = vld [vmem:[#allocation26_spill] sm:$0xff]  ;;  %v7989_v58 = vld [vmem:[#allocation27_spill] sm:$0xff]  ;;  %v6259_v60 = vmul.f32 %v7991_v28, %v7991_v28  ;;  %v6271_v8 = vmul.f32 %v6047_v23, %v6047_v23  ;;  %v7995_v50 = vld [vmem:[#allocation16_spill] sm:$0xff] }
 0x1cf   : > { %v6243_v52 = vmul.f32 %v7988_v13, %v7988_v13  ;;  %v6247_v62 = vmul.f32 %v7989_v58, %v7989_v58  ;;  %v7990_v55 = vld [vmem:[#allocation11_spill] sm:$0xff]  ;;  %v7992_v59 = vld [vmem:[#allocation14_spill] sm:$0xff]  ;;  %v6275_v16 = vmul.f32 %v7995_v50, %v7995_v50  ;;  %v7997_v47 = vld [vmem:[#allocation17_spill] sm:$0xff] }
 0x1d0   : > { %v6251_v38 = vmul.f32 %v7990_v55, %v7990_v55  ;;  %v6263_v0 = vmul.f32 %v7992_v59, %v7992_v59  ;;  %v7993_v33 = vld [vmem:[#allocation15_spill] sm:$0xff]  ;;  %7994 = vst [vmem:[#allocation30_spill] sm:$0xff] %v6271_v8  ;;  %v6279_v5 = vmul.f32 %v7997_v47, %v7997_v47  ;;  %v8001_v26 = vld [vmem:[#allocation34_spill] sm:$0xff]  ;;  %v8003_v48 = vld [vmem:[#allocation13_spill] sm:$0xff] }
 0x1d1   : > { %v6267_v56 = vmul.f32 %v7993_v33, %v7993_v33  ;;  %7996 = vst [vmem:[#allocation31_spill] sm:$0xff] %v6275_v16  ;;  %v7999_v4 = vld [vmem:[#allocation23_spill] sm:$0xff]  ;;  %v6287_v27 = vmul.f32 %v8001_v26, %v8001_v26  ;;  %v6291_v23 = vmul.f32 %v8003_v48, %v8003_v48  ;;  %v8005_v54 = vld [vmem:[#allocation36_spill] sm:$0xff]  ;;  %v8007_v58 = vld [vmem:[#allocation37_spill] sm:$0xff] }
 0x1d2   : > { %7998 = vst [vmem:[#allocation32_spill] sm:$0xff] %v6279_v5  ;;  %v6283_v34 = vmul.f32 %v7999_v4, %v7999_v4  ;;  %v6295_v13 = vmul.f32 %v8005_v54, %v8005_v54  ;;  %v6299_v55 = vmul.f32 %v8007_v58, %v8007_v58  ;;  %v8009_v28 = vld [vmem:[#allocation38_spill] sm:$0xff]  ;;  %v8011_v33 = vld [vmem:[#allocation39_spill] sm:$0xff]  ;;  %v8013_v47 = vld [vmem:[#allocation40_spill] sm:$0xff] }
 0x1d3   : > { %8002 = vst [vmem:[#allocation18_spill] sm:$0xff] %v6287_v27  ;;  %8004 = vst [vmem:[#allocation35_spill] sm:$0xff] %v6291_v23  ;;  %v6303_v59 = vmul.f32 %v8009_v28, %v8009_v28  ;;  %v6307_v50 = vmul.f32 %v8011_v33, %v8011_v33  ;;  %v2071_v4 = vmul.f32 %v8013_v47, %v8013_v47  ;;  %v8014_v26 = vld [vmem:[#allocation19_spill] sm:$0xff]  ;;  %v8015_v54 = vld [vmem:[#allocation20_spill] sm:$0xff] }
 0x1d4   : > { %8000 = vst [vmem:[#allocation33_spill] sm:$0xff] %v6283_v34  ;;  %8006 = vst [vmem:[#allocation26_spill] sm:$0xff] %v6295_v13  ;;  %v2072_v48 = vmul.f32 %v8014_v26, %v8014_v26  ;;  %v2073_v13 = vmul.f32 %v8015_v54, %v8015_v54  ;;  %v8016_v23 = vld [vmem:[#allocation21_spill] sm:$0xff]  ;;  %v8018_v33 = vld [vmem:[#allocation24_spill] sm:$0xff]  ;;  %v2080_v54 = vmul.f32 %v6129_v40, %v6129_v40 }
 0x1d5   : > { %8008 = vst [vmem:[#allocation27_spill] sm:$0xff] %v6299_v55  ;;  %8010 = vst [vmem:[#allocation11_spill] sm:$0xff] %v6303_v59  ;;  %v2074_v58 = vmul.f32 %v8016_v23, %v8016_v23  ;;  %v8017_v55 = vld [vmem:[#allocation22_spill] sm:$0xff]  ;;  %v2076_v59 = vmul.f32 %v6115_v45, %v6115_v45  ;;  %v8019_v27 = vld [vmem:[#allocation25_spill] sm:$0xff]  ;;  %v2081_v23 = vmul.f32 %v6131_v18, %v6131_v18 }
 0x1d6   : > { %8012 = vst [vmem:[#allocation12_spill] sm:$0xff] %v6307_v50  ;;  %v2075_v28 = vmul.f32 %v8017_v55, %v8017_v55  ;;  %v2077_v50 = vmul.f32 %v8018_v33, %v8018_v33  ;;  %v2078_v47 = vmul.f32 %v8019_v27, %v8019_v27  ;;  %v8020_v34 = vld [vmem:[#allocation41_spill] sm:$0xff]  ;;  %v2082_v55 = vmul.f32 %v6133_v15, %v6133_v15 }
 0x1d7   : > { %v2079_v26 = vmul.f32 %v8020_v34, %v8020_v34  ;;  %v2083_v45 = vmul.f32 %v6135_v17, %v6135_v17  ;;  %v2084_v33 = vmul.f32 %v6140_v57, %v6140_v57  ;;  %v2085_v27 = vmul.f32 %v6142_v61, %v6142_v61 }
 0x1d8   : > { %v2086_v34 = vmul.f32 %v6144_v31, %v6144_v31  ;;  %v2087_v40 = vmul.f32 %v6146_v51, %v6146_v51  ;;  %v2088_v18 = vmul.f32 %v6151_v41, %v6151_v41  ;;  %v2089_v15 = vmul.f32 %v6153_v29, %v6153_v29 }
 0x1d9   : > { %v2090_v17 = vmul.f32 %v6155_v14, %v6155_v14  ;;  %v2091_v57 = vmul.f32 %v6157_v22, %v6157_v22  ;;  %v2092_v61 = vmul.f32 %v6159_v30, %v6159_v30  ;;  %v2093_v31 = vmul.f32 %v6161_v32, %v6161_v32 }
 0x1da   : > { %v2094_v51 = vmul.f32 %v6163_v12, %v6163_v12  ;;  %v2095_v41 = vmul.f32 %v6165_v39, %v6165_v39  ;;  %v2096_v29 = vmul.f32 %v6167_v24, %v6167_v24  ;;  %v2097_v14 = vmul.f32 %v6169_v25, %v6169_v25 }
 0x1db   : > { %v2098_v22 = vmul.f32 %v6171_v7, %v6171_v7  ;;  %v2099_v30 = vmul.f32 %v6173_v46, %v6173_v46  ;;  %v2100_v32 = vmul.f32 %v6175_v49, %v6175_v49  ;;  %v2101_v12 = vmul.f32 %v6177_v19, %v6177_v19 }
 0x1dc   : > { %v2102_v39 = vmul.f32 %v6179_v3, %v6179_v3  ;;  %v2103_v24 = vadd.f32 %v2071_v4, %v6183_v9  ;;  %v2104_v5 = vadd.f32 %v2072_v48, %v6187_v42  ;;  %v2105_v25 = vadd.f32 %v2073_v13, %v6191_v6  ;;  %v8021_v13 = vld [vmem:[#allocation30_spill] sm:$0xff]  ;;  %v8024_v4 = vld [vmem:[#allocation33_spill] sm:$0xff] }
 0x1dd   : > { %v2106_v7 = vadd.f32 %v2074_v58, %v6195_v36  ;;  %v2107_v16 = vadd.f32 %v2075_v28, %v6199_v2  ;;  %v2108_v46 = vadd.f32 %v2076_v59, %v6203_v10  ;;  %v2109_v49 = vadd.f32 %v2077_v50, %v6207_v21  ;;  %v8022_v59 = vld [vmem:[#allocation31_spill] sm:$0xff]  ;;  %v8023_v50 = vld [vmem:[#allocation32_spill] sm:$0xff]  ;;  %v8025_v48 = vld [vmem:[#allocation18_spill] sm:$0xff] }
 0x1de   : > { %v2110_v8 = vadd.f32 %v2078_v47, %v6211_v20  ;;  %v2111_v19 = vadd.f32 %v2079_v26, %v6215_v43  ;;  %v2112_v3 = vadd.f32 %v2080_v54, %v6219_v44  ;;  %v2113_v9 = vadd.f32 %v2081_v23, %v6223_v11  ;;  %v8027_v58 = vld [vmem:[#allocation26_spill] sm:$0xff]  ;;  %v8029_v28 = vld [vmem:[#allocation11_spill] sm:$0xff]  ;;  %v8030_v26 = vld [vmem:[#allocation12_spill] sm:$0xff] }
 0x1df   : > { %v2114_v42 = vadd.f32 %v2082_v55, %v6227_v53  ;;  %v2115_v6 = vadd.f32 %v2083_v45, %v6231_v37  ;;  %v2116_v36 = vadd.f32 %v2084_v33, %v6235_v63  ;;  %v2117_v2 = vadd.f32 %v2085_v27, %v6239_v35 }
 0x1e0   : > { %v2118_v10 = vadd.f32 %v2086_v34, %v6243_v52  ;;  %v2119_v21 = vadd.f32 %v2087_v40, %v6247_v62  ;;  %v2120_v20 = vadd.f32 %v2088_v18, %v6251_v38  ;;  %v2121_v43 = vadd.f32 %v2089_v15, %v6255_v1  ;;  %v8026_v38 = vld [vmem:[#allocation35_spill] sm:$0xff] }
 0x1e1   : > { %v2122_v44 = vadd.f32 %v2090_v17, %v6259_v60  ;;  %v2123_v11 = vadd.f32 %v2091_v57, %v6263_v0  ;;  %v2124_v53 = vadd.f32 %v2092_v61, %v6267_v56  ;;  %v2125_v37 = vadd.f32 %v2093_v31, %v8021_v13  ;;  %v8028_v0 = vld [vmem:[#allocation27_spill] sm:$0xff]  ;;  %v2167_v17 = vld [vmem:[%s3320_s4 + $0xc00] sm:$0xff]  ;;  %v2169_v61 = vld [vmem:[%s3320_s4 + $0xc10] sm:$0xff] }
 0x1e2   : > { %v2126_v63 = vadd.f32 %v2094_v51, %v8022_v59  ;;  %v2127_v35 = vadd.f32 %v2095_v41, %v8023_v50  ;;  %v2128_v52 = vadd.f32 %v2096_v29, %v8024_v4  ;;  %v2129_v62 = vadd.f32 %v2097_v14, %v8025_v48  ;;  %v2168_v57 = vld [vmem:[%s3320_s4 + $0xc08] sm:$0xff]  ;;  %v2231_v31 = vld [vmem:[%s3326_s3 + $0xc00] sm:$0xff]  ;;  %v2170_v29 = vld [vmem:[%s3320_s4 + $0xc18] sm:$0xff] }
 0x1e3   : > { %v2130_v1 = vadd.f32 %v2098_v22, %v8026_v38  ;;  %v2131_v60 = vadd.f32 %v2099_v30, %v8027_v58  ;;  %v2132_v56 = vadd.f32 %v2100_v32, %v8028_v0  ;;  %v2133_v47 = vadd.f32 %v2101_v12, %v8029_v28  ;;  %v2232_v14 = vld [vmem:[%s3326_s3 + $0xc08] sm:$0xff]  ;;  %v2233_v22 = vld [vmem:[%s3326_s3 + $0xc10] sm:$0xff]  ;;  %v2178_v50 = vld [vmem:[%s3320_s4 + $0xc58] sm:$0xff] }
 0x1e4   : > { %v2134_v54 = vadd.f32 %v2102_v39, %v8030_v26  ;;  %v2135_v23 = vadd.f32 %v2119_v21, %v2103_v24  ;;  %v2136_v55 = vadd.f32 %v2120_v20, %v2104_v5  ;;  %v2137_v45 = vadd.f32 %v2121_v43, %v2105_v25  ;;  %v2171_v24 = vld [vmem:[%s3320_s4 + $0xc20] sm:$0xff]  ;;  %v2172_v25 = vld [vmem:[%s3320_s4 + $0xc28] sm:$0xff]  ;;  %v2238_v21 = vld [vmem:[%s3326_s3 + $0xc38] sm:$0xff] }
 0x1e5   : > { %v2138_v33 = vadd.f32 %v2122_v44, %v2106_v7  ;;  %v2139_v27 = vadd.f32 %v2123_v11, %v2107_v16  ;;  %v2140_v34 = vadd.f32 %v2124_v53, %v2108_v46  ;;  %v2141_v40 = vadd.f32 %v2125_v37, %v2109_v49  ;;  %v2173_v7 = vld [vmem:[%s3320_s4 + $0xc30] sm:$0xff]  ;;  %v2174_v46 = vld [vmem:[%s3320_s4 + $0xc38] sm:$0xff]  ;;  %v2235_v49 = vld [vmem:[%s3326_s3 + $0xc20] sm:$0xff] }
 0x1e6   : > { %v2142_v18 = vadd.f32 %v2126_v63, %v2110_v8  ;;  %v2143_v15 = vadd.f32 %v2127_v35, %v2111_v19  ;;  %v2144_v5 = vadd.f32 %v2128_v52, %v2112_v3  ;;  %v2145_v51 = vadd.f32 %v2129_v62, %v2113_v9  ;;  %v2234_v8 = vld [vmem:[%s3326_s3 + $0xc18] sm:$0xff]  ;;  %v2236_v19 = vld [vmem:[%s3326_s3 + $0xc28] sm:$0xff]  ;;  %v2237_v3 = vld [vmem:[%s3326_s3 + $0xc30] sm:$0xff] }
 0x1e7   : > { %v2146_v41 = vadd.f32 %v2130_v1, %v2114_v42  ;;  %v2147_v16 = vadd.f32 %v2131_v60, %v2115_v6  ;;  %v2148_v30 = vadd.f32 %v2132_v56, %v2116_v36  ;;  %v2149_v32 = vadd.f32 %v2133_v47, %v2117_v2  ;;  %v2175_v2 = vld [vmem:[%s3320_s4 + $0xc40] sm:$0xff]  ;;  %v2240_v43 = vld [vmem:[%s3326_s3 + $0xc48] sm:$0xff]  ;;  %v8031_v44 = vld [vmem:[#allocation29_spill] sm:$0xff] }
 0x1e8   : > { %v2150_v12 = vadd.f32 %v2134_v54, %v2118_v10  ;;  %v2151_v39 = vadd.f32 %v2143_v15, %v2135_v23  ;;  %v2152_v9 = vadd.f32 %v2144_v5, %v2136_v55  ;;  %v2153_v42 = vadd.f32 %v2145_v51, %v2137_v45  ;;  %v2176_v10 = vld [vmem:[%s3320_s4 + $0xc48] sm:$0xff]  ;;  %v2239_v20 = vld [vmem:[%s3326_s3 + $0xc40] sm:$0xff]  ;;  %v8032_v11 = vld [vmem:[#allocation28_spill] sm:$0xff] }
 0x1e9   : > { %v2154_v6 = vadd.f32 %v2146_v41, %v2138_v33  ;;  %v2155_v36 = vadd.f32 %v2147_v16, %v2139_v27  ;;  %v6427_v53 = vadd.f32 %v8032_v11, %v8031_v44  ;;  %v2156_v13 = vadd.f32 %v2148_v30, %v2140_v34  ;;  %v2177_v63 = vld [vmem:[%s3320_s4 + $0xc50] sm:$0xff]  ;;  %v2179_v35 = vld [vmem:[%s3320_s4 + $0xc60] sm:$0xff]  ;;  %v2180_v4 = vld [vmem:[%s3320_s4 + $0xc68] sm:$0xff] }
 0x1ea   : > { %v2157_v37 = vadd.f32 %v2149_v32, %v2141_v40  ;;  %v2158_v59 = vadd.f32 %v2150_v12, %v2142_v18  ;;  %v2241_v52 = vld [vmem:[%s3326_s3 + $0xc50] sm:$0xff]  ;;  %v2242_v48 = vld [vmem:[%s3326_s3 + $0xc58] sm:$0xff]  ;;  %v2243_v62 = vld [vmem:[%s3326_s3 + $0xc60] sm:$0xff]  ;;  %v6455_v26 = vsub.f32 %v2167_v17, %v2231_v31  ;;  %v6457_v54 = vsub.f32 %v2168_v57, %v2232_v14 }
 0x1eb   : > { %8033 = vst [vmem:[#allocation14_spill] sm:$0xff] %v6427_v53  ;;  %v2244_v38 = vld [vmem:[%s3326_s3 + $0xc68] sm:$0xff]  ;;  %v2159_v1 = vadd.f32 %v2155_v36, %v2151_v39  ;;  %v6438_v58 = vld [vmem:[%s3320_s4 + $0xc70] sm:$0xff]  ;;  %v6441_v60 = vld [vmem:[%s3320_s4 + $0xc78] sm:$0xff]  ;;  %v6459_v23 = vsub.f32 %v2169_v61, %v2233_v22  ;;  %v2160_v55 = vadd.f32 %v2156_v13, %v2152_v9  ;;  %v6477_v31 = vsub.f32 %v2170_v29, %v2234_v8 }
 0x1ec   : > { %v6444_v0 = vld [vmem:[%s3320_s4 + $0xc80] sm:$0xff]  ;;  %v6447_v56 = vld [vmem:[%s3326_s3 + $0xc70] sm:$0xff]  ;;  %v6450_v28 = vld [vmem:[%s3326_s3 + $0xc78] sm:$0xff]  ;;  %v2161_v45 = vadd.f32 %v2157_v37, %v2153_v42  ;;  %v2162_v33 = vadd.f32 %v2158_v59, %v2154_v6  ;;  %v6495_v8 = vsub.f32 %v2171_v24, %v2235_v49  ;;  %v6497_v32 = vsub.f32 %v2172_v25, %v2236_v19 }
 0x1ed   : > { %v6453_v47 = vld [vmem:[%s3326_s3 + $0xc80] sm:$0xff]  ;;  %v6462_v27 = vld [vmem:[%s3320_s4 + $0xc88] sm:$0xff]  ;;  %v6465_v34 = vld [vmem:[%s3320_s4 + $0xc90] sm:$0xff]  ;;  %v6499_v12 = vsub.f32 %v2173_v7, %v2237_v3  ;;  %v6501_v39 = vsub.f32 %v2174_v46, %v2238_v21  ;;  %v6519_v3 = vsub.f32 %v2175_v2, %v2239_v20  ;;  %v6521_v21 = vsub.f32 %v2176_v10, %v2240_v43 }
 0x1ee   : > { %v6468_v40 = vld [vmem:[%s3320_s4 + $0xc98] sm:$0xff]  ;;  %v6471_v18 = vld [vmem:[%s3320_s4 + $0xca0] sm:$0xff]  ;;  %v2248_v15 = vld [vmem:[%s3326_s3 + $0xc88] sm:$0xff]  ;;  %v2163_v9 = vadd.f32 %v2161_v45, %v2159_v1  ;;  %v2164_v42 = vadd.f32 %v2162_v33, %v2160_v55  ;;  %v6539_v10 = vsub.f32 %v2177_v63, %v2241_v52  ;;  %v6541_v43 = vsub.f32 %v2178_v50, %v2242_v48 }
 0x1ef   : > { %v2249_v17 = vld [vmem:[%s3326_s3 + $0xc90] sm:$0xff]  ;;  %v2250_v57 = vld [vmem:[%s3326_s3 + $0xc98] sm:$0xff]  ;;  %v2251_v61 = vld [vmem:[%s3326_s3 + $0xca0] sm:$0xff]  ;;  %8034 = vst [vmem:[#allocation15_spill] sm:$0xff] %v6519_v3  ;;  %v6543_v55 = vsub.f32 %v2179_v35, %v2243_v62  ;;  %v6545_v45 = vsub.f32 %v2180_v4, %v2244_v38  ;;  %v6559_v35 = vsub.f32 %v6438_v58, %v6447_v56  ;;  %v6563_v4 = vsub.f32 %v6441_v60, %v6450_v28 }
 0x1f0   : > { %v6480_v5 = vld [vmem:[%s3320_s4 + $0xca8] sm:$0xff]  ;;  %v6483_v51 = vld [vmem:[%s3320_s4 + $0xcb0] sm:$0xff]  ;;  %v6486_v41 = vld [vmem:[%s3320_s4 + $0xcb8] sm:$0xff]  ;;  %8035 = vst [vmem:[#allocation16_spill] sm:$0xff] %v6521_v21  ;;  %v6547_v33 = vadd.f32 %v2164_v42, %v2163_v9  ;;  %v6567_v62 = vsub.f32 %v6444_v0, %v6453_v47  ;;  %v6580_v60 = vsub.f32 %v6465_v34, %v2249_v17  ;;  %v6583_v0 = vsub.f32 %v6468_v40, %v2250_v57 }
 0x1f1   : > { %v6489_v16 = vld [vmem:[%s3320_s4 + $0xcc0] sm:$0xff]  ;;  %v2252_v14 = vld [vmem:[%s3326_s3 + $0xca8] sm:$0xff]  ;;  %v2253_v22 = vld [vmem:[%s3326_s3 + $0xcb0] sm:$0xff]  ;;  %8036 = vst [vmem:[#allocation17_spill] sm:$0xff] %v6539_v10  ;;  %v6586_v28 = vsub.f32 %v6471_v18, %v2251_v61 }
 0x1f2   : > { %v2254_v30 = vld [vmem:[%s3326_s3 + $0xcb8] sm:$0xff]  ;;  %v2255_v29 = vld [vmem:[%s3326_s3 + $0xcc0] sm:$0xff]  ;;  %v6504_v6 = vld [vmem:[%s3320_s4 + $0xcc8] sm:$0xff]  ;;  %8037 = vst [vmem:[#allocation23_spill] sm:$0xff] %v6543_v55  ;;  %v6596_v34 = vsub.f32 %v6480_v5, %v2252_v14  ;;  %v6599_v40 = vsub.f32 %v6483_v51, %v2253_v22 }
 0x1f3   : > { %v6507_v36 = vld [vmem:[%s3320_s4 + $0xcd0] sm:$0xff]  ;;  %v6510_v24 = vld [vmem:[%s3320_s4 + $0xcd8] sm:$0xff]  ;;  %v6513_v25 = vld [vmem:[%s3320_s4 + $0xce0] sm:$0xff]  ;;  %8038 = vst [vmem:[#allocation34_spill] sm:$0xff] %v6545_v45  ;;  %v6602_v18 = vsub.f32 %v6486_v41, %v2254_v30  ;;  %v6605_v17 = vsub.f32 %v6489_v16, %v2255_v29 }
 0x1f4   : > { %v2256_v7 = vld [vmem:[%s3326_s3 + $0xcc8] sm:$0xff]  ;;  %v2257_v49 = vld [vmem:[%s3326_s3 + $0xcd0] sm:$0xff]  ;;  %v2258_v19 = vld [vmem:[%s3326_s3 + $0xcd8] sm:$0xff]  ;;  %8039 = vst [vmem:[#allocation13_spill] sm:$0xff] %v6547_v33 }
 0x1f5   : > { %v2259_v46 = vld [vmem:[%s3326_s3 + $0xce0] sm:$0xff]  ;;  %v6524_v44 = vld [vmem:[%s3320_s4 + $0xce8] sm:$0xff]  ;;  %v6527_v11 = vld [vmem:[%s3320_s4 + $0xcf0] sm:$0xff]  ;;  %8040 = vst [vmem:[#allocation36_spill] sm:$0xff] %v6559_v35  ;;  %v6577_v35 = vsub.f32 %v6462_v27, %v2248_v15  ;;  %v6615_v51 = vsub.f32 %v6504_v6, %v2256_v7  ;;  %v6618_v41 = vsub.f32 %v6507_v36, %v2257_v49  ;;  %v6621_v16 = vsub.f32 %v6510_v24, %v2258_v19 }
 0x1f6   : > { %v6530_v13 = vld [vmem:[%s3320_s4 + $0xcf8] sm:$0xff]  ;;  %v6533_v37 = vld [vmem:[%s3320_s4 + $0xd00] sm:$0xff]  ;;  %v2260_v59 = vld [vmem:[%s3326_s3 + $0xce8] sm:$0xff]  ;;  %8041 = vst [vmem:[#allocation37_spill] sm:$0xff] %v6563_v4  ;;  %v6624_v22 = vsub.f32 %v6513_v25, %v2259_v46 }
 0x1f7   : > { %v2261_v2 = vld [vmem:[%s3326_s3 + $0xcf0] sm:$0xff]  ;;  %v2262_v20 = vld [vmem:[%s3326_s3 + $0xcf8] sm:$0xff]  ;;  %v2263_v1 = vld [vmem:[%s3326_s3 + $0xd00] sm:$0xff]  ;;  %8042 = vst [vmem:[#allocation38_spill] sm:$0xff] %v6567_v62  ;;  %v6634_v36 = vsub.f32 %v6524_v44, %v2260_v59 }
 0x1f8   : > { %v2200_v53 = vld [vmem:[%s3320_s4 + $0xd08] sm:$0xff]  ;;  %v2201_v21 = vld [vmem:[%s3320_s4 + $0xd10] sm:$0xff]  ;;  %v2202_v3 = vld [vmem:[%s3320_s4 + $0xd18] sm:$0xff]  ;;  %8043 = vst [vmem:[#allocation39_spill] sm:$0xff] %v6577_v35  ;;  %v6637_v24 = vsub.f32 %v6527_v11, %v2261_v2  ;;  %v6640_v25 = vsub.f32 %v6530_v13, %v2262_v20  ;;  %v6643_v49 = vsub.f32 %v6533_v37, %v2263_v1 }
 0x1f9   : > { %v2203_v63 = vld [vmem:[%s3320_s4 + $0xd20] sm:$0xff]  ;;  %v2264_v52 = vld [vmem:[%s3326_s3 + $0xd08] sm:$0xff]  ;;  %v2265_v10 = vld [vmem:[%s3326_s3 + $0xd10] sm:$0xff]  ;;  %8044 = vst [vmem:[#allocation40_spill] sm:$0xff] %v6583_v0 }
 0x1fa   : > { %v2266_v50 = vld [vmem:[%s3326_s3 + $0xd18] sm:$0xff]  ;;  %v2267_v48 = vld [vmem:[%s3326_s3 + $0xd20] sm:$0xff]  ;;  %v2204_v38 = vld [vmem:[%s3320_s4 + $0xd28] sm:$0xff]  ;;  %8045 = vst [vmem:[#allocation19_spill] sm:$0xff] %v6586_v28  ;;  %v6652_v11 = vsub.f32 %v2200_v53, %v2264_v52  ;;  %v6654_v13 = vsub.f32 %v2201_v21, %v2265_v10 }
 0x1fb   : > { %v2205_v9 = vld [vmem:[%s3320_s4 + $0xd30] sm:$0xff]  ;;  %v2206_v42 = vld [vmem:[%s3320_s4 + $0xd38] sm:$0xff]  ;;  %v2207_v33 = vld [vmem:[%s3320_s4 + $0xd40] sm:$0xff]  ;;  %8046 = vst [vmem:[#allocation20_spill] sm:$0xff] %v6596_v34  ;;  %v6656_v2 = vsub.f32 %v2202_v3, %v2266_v50  ;;  %v6658_v37 = vsub.f32 %v2203_v63, %v2267_v48 }
 0x1fc   : > { %v2268_v45 = vld [vmem:[%s3326_s3 + $0xd28] sm:$0xff]  ;;  %v2269_v58 = vld [vmem:[%s3326_s3 + $0xd30] sm:$0xff]  ;;  %v2270_v56 = vld [vmem:[%s3326_s3 + $0xd38] sm:$0xff]  ;;  %8047 = vst [vmem:[#allocation21_spill] sm:$0xff] %v6602_v18 }
 0x1fd   : > { %v2208_v47 = vld [vmem:[%s3320_s4 + $0xd48] sm:$0xff]  ;;  %v2209_v62 = vld [vmem:[%s3320_s4 + $0xd50] sm:$0xff]  ;;  %v2210_v4 = vld [vmem:[%s3320_s4 + $0xd58] sm:$0xff]  ;;  %8048 = vst [vmem:[#allocation22_spill] sm:$0xff] %v6605_v17  ;;  %v6667_v52 = vsub.f32 %v2204_v38, %v2268_v45  ;;  %v6669_v21 = vsub.f32 %v2205_v9, %v2269_v58  ;;  %v6671_v3 = vsub.f32 %v2206_v42, %v2270_v56 }
 0x1fe   : > { %v2211_v27 = vld [vmem:[%s3320_s4 + $0xd60] sm:$0xff]  ;;  %v2272_v35 = vld [vmem:[%s3326_s3 + $0xd48] sm:$0xff]  ;;  %v2273_v55 = vld [vmem:[%s3326_s3 + $0xd50] sm:$0xff]  ;;  %8049 = vst [vmem:[#allocation24_spill] sm:$0xff] %v6615_v51 }
 0x1ff   : > { %v2271_v15 = vld [vmem:[%s3326_s3 + $0xd40] sm:$0xff]  ;;  %v2212_v57 = vld [vmem:[%s3320_s4 + $0xd68] sm:$0xff]  ;;  %v2213_v61 = vld [vmem:[%s3320_s4 + $0xd70] sm:$0xff]  ;;  %8050 = vst [vmem:[#allocation25_spill] sm:$0xff] %v6618_v41  ;;  %v6683_v45 = vsub.f32 %v2209_v62, %v2273_v55 }
 0x200   : > { %v2214_v28 = vld [vmem:[%s3320_s4 + $0xd78] sm:$0xff]  ;;  %v2215_v5 = vld [vmem:[%s3320_s4 + $0xd80] sm:$0xff]  ;;  %v2276_v0 = vld [vmem:[%s3326_s3 + $0xd68] sm:$0xff]  ;;  %8051 = vst [vmem:[#allocation41_spill] sm:$0xff] %v6621_v16  ;;  %v6673_v10 = vsub.f32 %v2207_v33, %v2271_v15 }
 0x201   : > { %v2274_v14 = vld [vmem:[%s3326_s3 + $0xd58] sm:$0xff]  ;;  %v2275_v34 = vld [vmem:[%s3326_s3 + $0xd60] sm:$0xff]  ;;  %8052 = vst [vmem:[#allocation30_spill] sm:$0xff] %v6624_v22  ;;  %v2216_v30 = vld [vmem:[%s3320_s4 + $0xd88] sm:$0xff]  ;;  %v6692_v56 = vsub.f32 %v2212_v57, %v2276_v0 }
 0x202   : > { %v2217_v29 = vld [vmem:[%s3320_s4 + $0xd90] sm:$0xff]  ;;  %v2218_v17 = vld [vmem:[%s3320_s4 + $0xd98] sm:$0xff]  ;;  %v2219_v6 = vld [vmem:[%s3320_s4 + $0xda0] sm:$0xff]  ;;  %8053 = vst [vmem:[#allocation31_spill] sm:$0xff] %v6634_v36  ;;  %v6685_v38 = vsub.f32 %v2210_v4, %v2274_v14  ;;  %v6687_v9 = vsub.f32 %v2211_v27, %v2275_v34 }
 0x203   : > { %v2277_v7 = vld [vmem:[%s3326_s3 + $0xd70] sm:$0xff]  ;;  %v2278_v51 = vld [vmem:[%s3326_s3 + $0xd78] sm:$0xff]  ;;  %v2279_v18 = vld [vmem:[%s3326_s3 + $0xd80] sm:$0xff]  ;;  %8054 = vst [vmem:[#allocation32_spill] sm:$0xff] %v6637_v24 }
 0x204   : > { %8055 = vst [vmem:[#allocation33_spill] sm:$0xff] %v6640_v25  ;;  %8056 = vst [vmem:[#allocation18_spill] sm:$0xff] %v6643_v49  ;;  %v2220_v19 = vld [vmem:[%s3320_s4 + $0xda8] sm:$0xff]  ;;  %v2221_v46 = vld [vmem:[%s3320_s4 + $0xdb0] sm:$0xff]  ;;  %v6694_v15 = vsub.f32 %v2213_v61, %v2277_v7 }
 0x205   : > { %v2222_v22 = vld [vmem:[%s3320_s4 + $0xdb8] sm:$0xff]  ;;  %v2223_v44 = vld [vmem:[%s3320_s4 + $0xdc0] sm:$0xff]  ;;  %v2280_v59 = vld [vmem:[%s3326_s3 + $0xd88] sm:$0xff]  ;;  %8057 = vst [vmem:[#allocation35_spill] sm:$0xff] %v6652_v11  ;;  %v6681_v11 = vsub.f32 %v2208_v47, %v2272_v35 }
 0x206   : > { %v2281_v36 = vld [vmem:[%s3326_s3 + $0xd90] sm:$0xff]  ;;  %v2282_v16 = vld [vmem:[%s3326_s3 + $0xd98] sm:$0xff]  ;;  %8058 = vst [vmem:[#allocation26_spill] sm:$0xff] %v6654_v13  ;;  %8059 = vst [vmem:[#allocation27_spill] sm:$0xff] %v6656_v2  ;;  %v6703_v55 = vsub.f32 %v2216_v30, %v2280_v59  ;;  %v6743_v30 = vmul.f32 %v6459_v23, %v6459_v23  ;;  %v6763_v23 = vmul.f32 %v6501_v39, %v6501_v39 }
 0x207   : > { %8060 = vst [vmem:[#allocation11_spill] sm:$0xff] %v6658_v37  ;;  %v2224_v20 = vld [vmem:[%s3320_s4 + $0xdc8] sm:$0xff]  ;;  %v2225_v1 = vld [vmem:[%s3320_s4 + $0xdd0] sm:$0xff]  ;;  %v2226_v49 = vld [vmem:[%s3320_s4 + $0xdd8] sm:$0xff]  ;;  %v6705_v4 = vsub.f32 %v2217_v29, %v2281_v36  ;;  %v6707_v62 = vsub.f32 %v2218_v17, %v2282_v16  ;;  %v6735_v16 = vmul.f32 %v6455_v26, %v6455_v26  ;;  %v6747_v29 = vmul.f32 %v6477_v31, %v6477_v31 }
 0x208   : > { %v2227_v25 = vld [vmem:[%s3320_s4 + $0xde0] sm:$0xff]  ;;  %v2284_v41 = vld [vmem:[%s3326_s3 + $0xda8] sm:$0xff]  ;;  %v2285_v53 = vld [vmem:[%s3326_s3 + $0xdb0] sm:$0xff]  ;;  %8061 = vst [vmem:[#allocation12_spill] sm:$0xff] %v6669_v21  ;;  %v6755_v26 = vmul.f32 %v6497_v32, %v6497_v32 }
 0x209   : > { %v2283_v24 = vld [vmem:[%s3326_s3 + $0xda0] sm:$0xff]  ;;  %8062 = vst [vmem:[#allocation29_spill] sm:$0xff] %v6671_v3  ;;  %8063 = vst [vmem:[#allocation28_spill] sm:$0xff] %v6673_v10  ;;  %v2228_v63 = vld [vmem:[%s3320_s4 + $0xde8] sm:$0xff]  ;;  %v6696_v10 = vsub.f32 %v2214_v28, %v2278_v51  ;;  %v6698_v3 = vsub.f32 %v2215_v5, %v2279_v18  ;;  %v6711_v34 = vsub.f32 %v2220_v19, %v2284_v41 }
 0x20a   : > { %v2229_v50 = vld [vmem:[%s3320_s4 + $0xdf0] sm:$0xff]  ;;  %v2230_v48 = vld [vmem:[%s3320_s4 + $0xdf8] sm:$0xff]  ;;  %v2287_v2 = vld [vmem:[%s3326_s3 + $0xdc0] sm:$0xff]  ;;  %v6709_v27 = vsub.f32 %v2219_v6, %v2283_v24  ;;  %v6713_v0 = vsub.f32 %v2221_v46, %v2285_v53  ;;  %v6751_v6 = vmul.f32 %v6495_v8, %v6495_v8 }
 0x20b   : > { %v2286_v37 = vld [vmem:[%s3326_s3 + $0xdb8] sm:$0xff]  ;;  %v2288_v13 = vld [vmem:[%s3326_s3 + $0xdc8] sm:$0xff]  ;;  %v2289_v42 = vld [vmem:[%s3326_s3 + $0xdd0] sm:$0xff]  ;;  %v6717_v28 = vsub.f32 %v2223_v44, %v2287_v2 }
 0x20c   : > { %v2290_v33 = vld [vmem:[%s3326_s3 + $0xdd8] sm:$0xff]  ;;  %v2291_v58 = vld [vmem:[%s3326_s3 + $0xde0] sm:$0xff]  ;;  %v2292_v21 = vld [vmem:[%s3326_s3 + $0xde8] sm:$0xff]  ;;  %v6715_v57 = vsub.f32 %v2222_v22, %v2286_v37  ;;  %v6719_v18 = vsub.f32 %v2224_v20, %v2288_v13  ;;  %v6721_v61 = vsub.f32 %v2225_v1, %v2289_v42  ;;  %v6739_v22 = vmul.f32 %v6457_v54, %v6457_v54 }
 0x20d   : > { %v2293_v35 = vld [vmem:[%s3326_s3 + $0xdf0] sm:$0xff]  ;;  %v2294_v47 = vld [vmem:[%s3326_s3 + $0xdf8] sm:$0xff]  ;;  %v6723_v5 = vsub.f32 %v2226_v49, %v2290_v33  ;;  %v6725_v14 = vsub.f32 %v2227_v25, %v2291_v58  ;;  %v6727_v17 = vsub.f32 %v2228_v63, %v2292_v21  ;;  %v6759_v54 = vmul.f32 %v6499_v12, %v6499_v12  ;;  %v8064_v7 = vld [vmem:[#allocation15_spill] sm:$0xff] }
 0x20e   : > { %v6729_v51 = vsub.f32 %v2229_v50, %v2293_v35  ;;  %v6731_v41 = vsub.f32 %v2230_v48, %v2294_v47  ;;  %v6767_v31 = vmul.f32 %v8064_v7, %v8064_v7  ;;  %v8065_v36 = vld [vmem:[#allocation16_spill] sm:$0xff]  ;;  %v8066_v24 = vld [vmem:[#allocation17_spill] sm:$0xff]  ;;  %v6779_v12 = vmul.f32 %v6541_v43, %v6541_v43  ;;  %v8067_v25 = vld [vmem:[#allocation23_spill] sm:$0xff] }
 0x20f   : > { %v6771_v8 = vmul.f32 %v8065_v36, %v8065_v36  ;;  %v6775_v32 = vmul.f32 %v8066_v24, %v8066_v24  ;;  %v6783_v39 = vmul.f32 %v8067_v25, %v8067_v25  ;;  %v8068_v49 = vld [vmem:[#allocation34_spill] sm:$0xff]  ;;  %v8069_v46 = vld [vmem:[#allocation36_spill] sm:$0xff]  ;;  %v8070_v59 = vld [vmem:[#allocation37_spill] sm:$0xff]  ;;  %v6807_v1 = vmul.f32 %v6580_v60, %v6580_v60 }
 0x210   : > { %v6787_v19 = vmul.f32 %v8068_v49, %v8068_v49  ;;  %v6791_v44 = vmul.f32 %v8069_v46, %v8069_v46  ;;  %v6795_v13 = vmul.f32 %v8070_v59, %v8070_v59  ;;  %v8071_v2 = vld [vmem:[#allocation38_spill] sm:$0xff]  ;;  %v8072_v37 = vld [vmem:[#allocation39_spill] sm:$0xff]  ;;  %v8073_v53 = vld [vmem:[#allocation40_spill] sm:$0xff]  ;;  %v6823_v33 = vmul.f32 %v6599_v40, %v6599_v40 }
 0x211   : > { %v6799_v43 = vmul.f32 %v8071_v2, %v8071_v2  ;;  %v6803_v20 = vmul.f32 %v8072_v37, %v8072_v37  ;;  %v6811_v21 = vmul.f32 %v8073_v53, %v8073_v53  ;;  %v8074_v63 = vld [vmem:[#allocation19_spill] sm:$0xff]  ;;  %v8075_v48 = vld [vmem:[#allocation20_spill] sm:$0xff]  ;;  %v8077_v58 = vld [vmem:[#allocation21_spill] sm:$0xff] }
 0x212   : > { %v6815_v50 = vmul.f32 %v8074_v63, %v8074_v63  ;;  %v6819_v42 = vmul.f32 %v8075_v48, %v8075_v48  ;;  %8076 = vst [vmem:[#allocation15_spill] sm:$0xff] %v6823_v33  ;;  %v6827_v60 = vmul.f32 %v8077_v58, %v8077_v58  ;;  %v8079_v35 = vld [vmem:[#allocation22_spill] sm:$0xff]  ;;  %v8081_v7 = vld [vmem:[#allocation24_spill] sm:$0xff]  ;;  %v8083_v24 = vld [vmem:[#allocation25_spill] sm:$0xff] }
 0x213   : > { %v6831_v47 = vmul.f32 %v8079_v35, %v8079_v35  ;;  %v6835_v36 = vmul.f32 %v8081_v7, %v8081_v7  ;;  %v6839_v25 = vmul.f32 %v8083_v24, %v8083_v24  ;;  %v8085_v49 = vld [vmem:[#allocation41_spill] sm:$0xff]  ;;  %v8087_v46 = vld [vmem:[#allocation30_spill] sm:$0xff]  ;;  %v8089_v2 = vld [vmem:[#allocation31_spill] sm:$0xff] }
 0x214   : > { %8078 = vst [vmem:[#allocation16_spill] sm:$0xff] %v6827_v60  ;;  %v6843_v40 = vmul.f32 %v8085_v49, %v8085_v49  ;;  %v6847_v59 = vmul.f32 %v8087_v46, %v8087_v46  ;;  %v6851_v37 = vmul.f32 %v8089_v2, %v8089_v2  ;;  %v8091_v53 = vld [vmem:[#allocation32_spill] sm:$0xff]  ;;  %v8093_v48 = vld [vmem:[#allocation33_spill] sm:$0xff]  ;;  %v8095_v35 = vld [vmem:[#allocation18_spill] sm:$0xff] }
 0x215   : > { %8080 = vst [vmem:[#allocation17_spill] sm:$0xff] %v6831_v47  ;;  %8082 = vst [vmem:[#allocation23_spill] sm:$0xff] %v6835_v36  ;;  %v6855_v63 = vmul.f32 %v8091_v53, %v8091_v53  ;;  %v6859_v58 = vmul.f32 %v8093_v48, %v8093_v48  ;;  %v2391_v7 = vmul.f32 %v8095_v35, %v8095_v35  ;;  %v8096_v24 = vld [vmem:[#allocation35_spill] sm:$0xff]  ;;  %v8097_v46 = vld [vmem:[#allocation26_spill] sm:$0xff] }
 0x216   : > { %8084 = vst [vmem:[#allocation34_spill] sm:$0xff] %v6839_v25  ;;  %8086 = vst [vmem:[#allocation36_spill] sm:$0xff] %v6843_v40  ;;  %v2392_v49 = vmul.f32 %v8096_v24, %v8096_v24  ;;  %v8098_v40 = vld [vmem:[#allocation27_spill] sm:$0xff]  ;;  %v8100_v48 = vld [vmem:[#allocation12_spill] sm:$0xff] }
 0x217   : > { %8088 = vst [vmem:[#allocation37_spill] sm:$0xff] %v6847_v59  ;;  %8090 = vst [vmem:[#allocation38_spill] sm:$0xff] %v6851_v37  ;;  %v2393_v59 = vmul.f32 %v8097_v46, %v8097_v46  ;;  %v2394_v2 = vmul.f32 %v8098_v40, %v8098_v40  ;;  %v8099_v37 = vld [vmem:[#allocation11_spill] sm:$0xff]  ;;  %v8101_v25 = vld [vmem:[#allocation29_spill] sm:$0xff]  ;;  %v2400_v46 = vmul.f32 %v6681_v11, %v6681_v11 }
 0x218   : > { %8092 = vst [vmem:[#allocation39_spill] sm:$0xff] %v6855_v63  ;;  %8094 = vst [vmem:[#allocation40_spill] sm:$0xff] %v6859_v58  ;;  %v2395_v53 = vmul.f32 %v8099_v37, %v8099_v37  ;;  %v2396_v63 = vmul.f32 %v6667_v52, %v6667_v52  ;;  %v2397_v58 = vmul.f32 %v8100_v48, %v8100_v48  ;;  %v8102_v36 = vld [vmem:[#allocation28_spill] sm:$0xff] }
 0x219   : > { %v2398_v35 = vmul.f32 %v8101_v25, %v8101_v25  ;;  %v2399_v24 = vmul.f32 %v8102_v36, %v8102_v36  ;;  %v2401_v40 = vmul.f32 %v6683_v45, %v6683_v45  ;;  %v2402_v37 = vmul.f32 %v6685_v38, %v6685_v38 }
 0x21a   : > { %v2403_v52 = vmul.f32 %v6687_v9, %v6687_v9  ;;  %v2404_v48 = vmul.f32 %v6692_v56, %v6692_v56  ;;  %v2405_v25 = vmul.f32 %v6694_v15, %v6694_v15  ;;  %v2406_v36 = vmul.f32 %v6696_v10, %v6696_v10 }
 0x21b   : > { %v2407_v11 = vmul.f32 %v6698_v3, %v6698_v3  ;;  %v2408_v45 = vmul.f32 %v6703_v55, %v6703_v55  ;;  %v2409_v38 = vmul.f32 %v6705_v4, %v6705_v4  ;;  %v2410_v9 = vmul.f32 %v6707_v62, %v6707_v62 }
 0x21c   : > { %v2411_v56 = vmul.f32 %v6709_v27, %v6709_v27  ;;  %v2412_v15 = vmul.f32 %v6711_v34, %v6711_v34  ;;  %v2413_v10 = vmul.f32 %v6713_v0, %v6713_v0  ;;  %v2414_v3 = vmul.f32 %v6715_v57, %v6715_v57 }
 0x21d   : > { %v2415_v55 = vmul.f32 %v6717_v28, %v6717_v28  ;;  %v2416_v4 = vmul.f32 %v6719_v18, %v6719_v18  ;;  %v2417_v62 = vmul.f32 %v6721_v61, %v6721_v61  ;;  %v2418_v27 = vmul.f32 %v6723_v5, %v6723_v5 }
 0x21e   : > { %v2419_v34 = vmul.f32 %v6725_v14, %v6725_v14  ;;  %v2420_v0 = vmul.f32 %v6727_v17, %v6727_v17  ;;  %v2421_v57 = vmul.f32 %v6729_v51, %v6729_v51  ;;  %v2422_v28 = vmul.f32 %v6731_v41, %v6731_v41 }
 0x21f   : > { %v2423_v18 = vadd.f32 %v2391_v7, %v6735_v16  ;;  %v2424_v47 = vadd.f32 %v2392_v49, %v6739_v22  ;;  %v2425_v61 = vadd.f32 %v2393_v59, %v6743_v30  ;;  %v2426_v5 = vadd.f32 %v2394_v2, %v6747_v29  ;;  %v8103_v59 = vld [vmem:[#allocation15_spill] sm:$0xff]  ;;  %v8107_v49 = vld [vmem:[#allocation34_spill] sm:$0xff]  ;;  %v8109_v2 = vld [vmem:[#allocation37_spill] sm:$0xff] }
 0x220   : > { %v2427_v60 = vadd.f32 %v2395_v53, %v6751_v6  ;;  %v2428_v14 = vadd.f32 %v2396_v63, %v6755_v26  ;;  %v2429_v17 = vadd.f32 %v2397_v58, %v6759_v54  ;;  %v2430_v33 = vadd.f32 %v2398_v35, %v6763_v23  ;;  %v8104_v63 = vld [vmem:[#allocation16_spill] sm:$0xff]  ;;  %v8105_v58 = vld [vmem:[#allocation17_spill] sm:$0xff]  ;;  %v8106_v7 = vld [vmem:[#allocation23_spill] sm:$0xff] }
 0x221   : > { %v2431_v51 = vadd.f32 %v2399_v24, %v6767_v31  ;;  %v2432_v41 = vadd.f32 %v2400_v46, %v6771_v8  ;;  %v2433_v16 = vadd.f32 %v2401_v40, %v6775_v32  ;;  %v2434_v22 = vadd.f32 %v2402_v37, %v6779_v12  ;;  %v8110_v53 = vld [vmem:[#allocation38_spill] sm:$0xff]  ;;  %v8111_v35 = vld [vmem:[#allocation39_spill] sm:$0xff]  ;;  %v8112_v24 = vld [vmem:[#allocation40_spill] sm:$0xff] }
 0x222   : > { %v2435_v30 = vadd.f32 %v2403_v52, %v6783_v39  ;;  %v2436_v29 = vadd.f32 %v2404_v48, %v6787_v19  ;;  %v2437_v6 = vadd.f32 %v2405_v25, %v6791_v44  ;;  %v2438_v26 = vadd.f32 %v2406_v36, %v6795_v13 }
 0x223   : > { %v2439_v54 = vadd.f32 %v2407_v11, %v6799_v43  ;;  %v2440_v23 = vadd.f32 %v2408_v45, %v6803_v20  ;;  %v2441_v31 = vadd.f32 %v2409_v38, %v6807_v1  ;;  %v2442_v8 = vadd.f32 %v2410_v9, %v6811_v21  ;;  %v8108_v20 = vld [vmem:[#allocation36_spill] sm:$0xff]  ;;  %v2487_v9 = vld [vmem:[%s3320_s4 + $0xe00] sm:$0xff] }
 0x224   : > { %v2443_v32 = vadd.f32 %v2411_v56, %v6815_v50  ;;  %v2444_v12 = vadd.f32 %v2412_v15, %v6819_v42  ;;  %v2445_v39 = vadd.f32 %v2413_v10, %v8103_v59  ;;  %v2446_v19 = vadd.f32 %v2414_v3, %v8104_v63  ;;  %v2488_v56 = vld [vmem:[%s3320_s4 + $0xe08] sm:$0xff]  ;;  %v6982_v59 = vld [vmem:[%s3320_s4 + $0xe58] sm:$0xff] }
 0x225   : > { %v2447_v44 = vadd.f32 %v2415_v55, %v8105_v58  ;;  %v2448_v13 = vadd.f32 %v2416_v4, %v8106_v7  ;;  %v2449_v43 = vadd.f32 %v2417_v62, %v8107_v49  ;;  %v2450_v1 = vadd.f32 %v2418_v27, %v8108_v20  ;;  %v2489_v55 = vld [vmem:[%s3320_s4 + $0xe10] sm:$0xff]  ;;  %v2551_v4 = vld [vmem:[%s3326_s3 + $0xe00] sm:$0xff]  ;;  %v2560_v63 = vld [vmem:[%s3326_s3 + $0xe48] sm:$0xff] }
 0x226   : > { %v2451_v21 = vadd.f32 %v2419_v34, %v8109_v2  ;;  %v2452_v50 = vadd.f32 %v2420_v0, %v8110_v53  ;;  %v2453_v42 = vadd.f32 %v2421_v57, %v8111_v35  ;;  %v2454_v46 = vadd.f32 %v2422_v28, %v8112_v24  ;;  %v2553_v62 = vld [vmem:[%s3326_s3 + $0xe10] sm:$0xff]  ;;  %v2490_v57 = vld [vmem:[%s3320_s4 + $0xe18] sm:$0xff]  ;;  %v2491_v28 = vld [vmem:[%s3320_s4 + $0xe20] sm:$0xff] }
 0x227   : > { %v2455_v40 = vadd.f32 %v2439_v54, %v2423_v18  ;;  %v2456_v37 = vadd.f32 %v2440_v23, %v2424_v47  ;;  %v2457_v52 = vadd.f32 %v2441_v31, %v2425_v61  ;;  %v2458_v48 = vadd.f32 %v2442_v8, %v2426_v5  ;;  %v2492_v18 = vld [vmem:[%s3320_s4 + $0xe28] sm:$0xff]  ;;  %v2493_v61 = vld [vmem:[%s3320_s4 + $0xe30] sm:$0xff]  ;;  %v2554_v5 = vld [vmem:[%s3326_s3 + $0xe18] sm:$0xff] }
 0x228   : > { %v2459_v25 = vadd.f32 %v2443_v32, %v2427_v60  ;;  %v2460_v36 = vadd.f32 %v2444_v12, %v2428_v14  ;;  %v2461_v11 = vadd.f32 %v2445_v39, %v2429_v17  ;;  %v2462_v45 = vadd.f32 %v2446_v19, %v2430_v33  ;;  %v2552_v60 = vld [vmem:[%s3326_s3 + $0xe08] sm:$0xff]  ;;  %v2555_v14 = vld [vmem:[%s3326_s3 + $0xe20] sm:$0xff]  ;;  %v6979_v12 = vld [vmem:[%s3320_s4 + $0xe50] sm:$0xff] }
 0x229   : > { %v2463_v38 = vadd.f32 %v2447_v44, %v2431_v51  ;;  %v2464_v15 = vadd.f32 %v2448_v13, %v2432_v41  ;;  %v2465_v10 = vadd.f32 %v2449_v43, %v2433_v16  ;;  %v2466_v47 = vadd.f32 %v2450_v1, %v2434_v22  ;;  %v2556_v17 = vld [vmem:[%s3326_s3 + $0xe28] sm:$0xff]  ;;  %v2559_v54 = vld [vmem:[%s3326_s3 + $0xe40] sm:$0xff]  ;;  %v2561_v19 = vld [vmem:[%s3326_s3 + $0xe50] sm:$0xff] }
 0x22a   : > { %v2467_v3 = vadd.f32 %v2451_v21, %v2435_v30  ;;  %v2468_v33 = vadd.f32 %v2452_v50, %v2436_v29  ;;  %v2469_v27 = vadd.f32 %v2453_v42, %v2437_v6  ;;  %v2470_v34 = vadd.f32 %v2454_v46, %v2438_v26  ;;  %v2494_v30 = vld [vmem:[%s3320_s4 + $0xe38] sm:$0xff]  ;;  %v2495_v29 = vld [vmem:[%s3320_s4 + $0xe40] sm:$0xff]  ;;  %v2557_v6 = vld [vmem:[%s3326_s3 + $0xe30] sm:$0xff] }
 0x22b   : > { %v2471_v0 = vadd.f32 %v2463_v38, %v2455_v40  ;;  %v2472_v51 = vadd.f32 %v2464_v15, %v2456_v37  ;;  %v2473_v41 = vadd.f32 %v2465_v10, %v2457_v52  ;;  %v2474_v16 = vadd.f32 %v2466_v47, %v2458_v48  ;;  %v2558_v26 = vld [vmem:[%s3326_s3 + $0xe38] sm:$0xff]  ;;  %v6976_v32 = vld [vmem:[%s3320_s4 + $0xe48] sm:$0xff]  ;;  %v6985_v39 = vld [vmem:[%s3320_s4 + $0xe60] sm:$0xff] }
 0x22c   : > { %v2475_v22 = vadd.f32 %v2467_v3, %v2459_v25  ;;  %v2476_v23 = vadd.f32 %v2468_v33, %v2460_v36  ;;  %v2477_v31 = vadd.f32 %v2469_v27, %v2461_v11  ;;  %v2478_v8 = vadd.f32 %v2470_v34, %v2462_v45  ;;  %v2562_v58 = vld [vmem:[%s3326_s3 + $0xe58] sm:$0xff]  ;;  %v2563_v44 = vld [vmem:[%s3326_s3 + $0xe60] sm:$0xff]  ;;  %v6996_v20 = vld [vmem:[%s3320_s4 + $0xe68] sm:$0xff] }
 0x22d   : > { %v8113_v7 = vld [vmem:[#allocation14_spill] sm:$0xff]  ;;  %v8114_v13 = vld [vmem:[#allocation13_spill] sm:$0xff]  ;;  %v6999_v1 = vld [vmem:[%s3320_s4 + $0xe70] sm:$0xff]  ;;  %v7011_v24 = vsub.f32 %v2487_v9, %v2551_v4  ;;  %v7013_v46 = vsub.f32 %v2488_v56, %v2552_v60  ;;  %v7031_v15 = vsub.f32 %v2489_v55, %v2553_v62  ;;  %v7049_v62 = vsub.f32 %v2490_v57, %v2554_v5 }
 0x22e   : > { %v6993_v49 = vadd.f32 %v8114_v13, %v8113_v7  ;;  %v2479_v43 = vadd.f32 %v2475_v22, %v2471_v0  ;;  %v7002_v2 = vld [vmem:[%s3320_s4 + $0xe78] sm:$0xff]  ;;  %v7005_v21 = vld [vmem:[%s3320_s4 + $0xe80] sm:$0xff]  ;;  %v2564_v53 = vld [vmem:[%s3326_s3 + $0xe68] sm:$0xff]  ;;  %v2480_v40 = vadd.f32 %v2476_v23, %v2472_v51  ;;  %v2481_v37 = vadd.f32 %v2477_v31, %v2473_v41 }
 0x22f   : > { %v2565_v50 = vld [vmem:[%s3326_s3 + $0xe70] sm:$0xff]  ;;  %v2566_v35 = vld [vmem:[%s3326_s3 + $0xe78] sm:$0xff]  ;;  %v2567_v42 = vld [vmem:[%s3326_s3 + $0xe80] sm:$0xff]  ;;  %v2482_v52 = vadd.f32 %v2478_v8, %v2474_v16  ;;  %v7051_v34 = vsub.f32 %v2491_v28, %v2555_v14  ;;  %v7053_v0 = vsub.f32 %v2492_v18, %v2556_v17  ;;  %v7055_v51 = vsub.f32 %v2493_v61, %v2557_v6 }
 0x230   : > { %8115 = vst [vmem:[#allocation19_spill] sm:$0xff] %v6993_v49  ;;  %v7016_v48 = vld [vmem:[%s3320_s4 + $0xe88] sm:$0xff]  ;;  %v7019_v25 = vld [vmem:[%s3320_s4 + $0xe90] sm:$0xff]  ;;  %v7022_v36 = vld [vmem:[%s3320_s4 + $0xe98] sm:$0xff]  ;;  %v7057_v41 = vadd.f32 %v2481_v37, %v2479_v43  ;;  %v7077_v6 = vsub.f32 %v2494_v30, %v2558_v26  ;;  %v7079_v23 = vsub.f32 %v2495_v29, %v2559_v54  ;;  %v7098_v29 = vsub.f32 %v6976_v32, %v2560_v63 }
 0x231   : > { %v7025_v11 = vld [vmem:[%s3320_s4 + $0xea0] sm:$0xff]  ;;  %v2568_v45 = vld [vmem:[%s3326_s3 + $0xe88] sm:$0xff]  ;;  %v2569_v38 = vld [vmem:[%s3326_s3 + $0xe90] sm:$0xff]  ;;  %v7059_v16 = vadd.f32 %v2482_v52, %v2480_v40  ;;  %v7101_v54 = vsub.f32 %v6979_v12, %v2561_v19  ;;  %v7104_v37 = vsub.f32 %v6982_v59, %v2562_v58  ;;  %v7107_v52 = vsub.f32 %v6985_v39, %v2563_v44 }
 0x232   : > { %v2570_v9 = vld [vmem:[%s3326_s3 + $0xe98] sm:$0xff]  ;;  %v2571_v56 = vld [vmem:[%s3326_s3 + $0xea0] sm:$0xff]  ;;  %v7034_v10 = vld [vmem:[%s3320_s4 + $0xea8] sm:$0xff]  ;;  %8116 = vst [vmem:[#allocation20_spill] sm:$0xff] %v7057_v41  ;;  %v7126_v39 = vsub.f32 %v6996_v20, %v2564_v53  ;;  %v7129_v44 = vsub.f32 %v6999_v1, %v2565_v50  ;;  %v7132_v41 = vsub.f32 %v7002_v2, %v2566_v35  ;;  %v7145_v1 = vsub.f32 %v7016_v48, %v2568_v45 }
 0x233   : > { %v7037_v47 = vld [vmem:[%s3320_s4 + $0xeb0] sm:$0xff]  ;;  %v7040_v3 = vld [vmem:[%s3320_s4 + $0xeb8] sm:$0xff]  ;;  %v7043_v4 = vld [vmem:[%s3320_s4 + $0xec0] sm:$0xff]  ;;  %8117 = vst [vmem:[#allocation21_spill] sm:$0xff] %v7059_v16  ;;  %v7148_v2 = vsub.f32 %v7019_v25, %v2569_v38  ;;  %v7154_v50 = vsub.f32 %v7025_v11, %v2571_v56 }
 0x234   : > { %v2572_v60 = vld [vmem:[%s3326_s3 + $0xea8] sm:$0xff]  ;;  %v2573_v33 = vld [vmem:[%s3326_s3 + $0xeb0] sm:$0xff]  ;;  %v2574_v27 = vld [vmem:[%s3326_s3 + $0xeb8] sm:$0xff]  ;;  %8118 = vst [vmem:[#allocation22_spill] sm:$0xff] %v7079_v23 }
 0x235   : > { %v2575_v55 = vld [vmem:[%s3326_s3 + $0xec0] sm:$0xff]  ;;  %v7062_v22 = vld [vmem:[%s3320_s4 + $0xec8] sm:$0xff]  ;;  %v7065_v57 = vld [vmem:[%s3320_s4 + $0xed0] sm:$0xff]  ;;  %8119 = vst [vmem:[#allocation24_spill] sm:$0xff] %v7098_v29  ;;  %v7164_v25 = vsub.f32 %v7034_v10, %v2572_v60  ;;  %v7170_v11 = vsub.f32 %v7040_v3, %v2574_v27 }
 0x236   : > { %v7068_v28 = vld [vmem:[%s3320_s4 + $0xed8] sm:$0xff]  ;;  %v7071_v18 = vld [vmem:[%s3320_s4 + $0xee0] sm:$0xff]  ;;  %v2576_v5 = vld [vmem:[%s3326_s3 + $0xec8] sm:$0xff]  ;;  %8120 = vst [vmem:[#allocation25_spill] sm:$0xff] %v7101_v54  ;;  %v7173_v38 = vsub.f32 %v7043_v4, %v2575_v55 }
 0x237   : > { %v2577_v61 = vld [vmem:[%s3326_s3 + $0xed0] sm:$0xff]  ;;  %v2578_v14 = vld [vmem:[%s3326_s3 + $0xed8] sm:$0xff]  ;;  %v2579_v17 = vld [vmem:[%s3326_s3 + $0xee0] sm:$0xff]  ;;  %8121 = vst [vmem:[#allocation41_spill] sm:$0xff] %v7104_v37 }
 0x238   : > { %v7082_v31 = vld [vmem:[%s3320_s4 + $0xee8] sm:$0xff]  ;;  %v7085_v8 = vld [vmem:[%s3320_s4 + $0xef0] sm:$0xff]  ;;  %v7088_v7 = vld [vmem:[%s3320_s4 + $0xef8] sm:$0xff]  ;;  %8122 = vst [vmem:[#allocation30_spill] sm:$0xff] %v7107_v52  ;;  %v7135_v52 = vsub.f32 %v7005_v21, %v2567_v42  ;;  %v7151_v21 = vsub.f32 %v7022_v36, %v2570_v9  ;;  %v7167_v36 = vsub.f32 %v7037_v47, %v2573_v33  ;;  %v7183_v47 = vsub.f32 %v7062_v22, %v2576_v5 }
 0x239   : > { %v7091_v13 = vld [vmem:[%s3320_s4 + $0xf00] sm:$0xff]  ;;  %v2580_v43 = vld [vmem:[%s3326_s3 + $0xee8] sm:$0xff]  ;;  %v2581_v40 = vld [vmem:[%s3326_s3 + $0xef0] sm:$0xff]  ;;  %8123 = vst [vmem:[#allocation31_spill] sm:$0xff] %v7126_v39  ;;  %v7186_v3 = vsub.f32 %v7065_v57, %v2577_v61  ;;  %v7189_v4 = vsub.f32 %v7068_v28, %v2578_v14  ;;  %v7192_v33 = vsub.f32 %v7071_v18, %v2579_v17 }
 0x23a   : > { %v2582_v30 = vld [vmem:[%s3326_s3 + $0xef8] sm:$0xff]  ;;  %v2583_v26 = vld [vmem:[%s3326_s3 + $0xf00] sm:$0xff]  ;;  %v7110_v49 = vld [vmem:[%s3320_s4 + $0xf08] sm:$0xff]  ;;  %8124 = vst [vmem:[#allocation32_spill] sm:$0xff] %v7132_v41  ;;  %v7202_v57 = vsub.f32 %v7082_v31, %v2580_v43  ;;  %v7205_v28 = vsub.f32 %v7085_v8, %v2581_v40 }
 0x23b   : > { %v7113_v16 = vld [vmem:[%s3320_s4 + $0xf10] sm:$0xff]  ;;  %v7116_v32 = vld [vmem:[%s3320_s4 + $0xf18] sm:$0xff]  ;;  %v7119_v12 = vld [vmem:[%s3320_s4 + $0xf20] sm:$0xff]  ;;  %8125 = vst [vmem:[#allocation33_spill] sm:$0xff] %v7135_v52  ;;  %v7208_v18 = vsub.f32 %v7088_v7, %v2582_v30  ;;  %v7211_v61 = vsub.f32 %v7091_v13, %v2583_v26 }
 0x23c   : > { %v2584_v63 = vld [vmem:[%s3326_s3 + $0xf08] sm:$0xff]  ;;  %v2585_v19 = vld [vmem:[%s3326_s3 + $0xf10] sm:$0xff]  ;;  %v2586_v59 = vld [vmem:[%s3326_s3 + $0xf18] sm:$0xff]  ;;  %8126 = vst [vmem:[#allocation18_spill] sm:$0xff] %v7145_v1 }
 0x23d   : > { %v2587_v58 = vld [vmem:[%s3326_s3 + $0xf20] sm:$0xff]  ;;  %v2524_v37 = vld [vmem:[%s3320_s4 + $0xf28] sm:$0xff]  ;;  %v2525_v54 = vld [vmem:[%s3320_s4 + $0xf30] sm:$0xff]  ;;  %8127 = vst [vmem:[#allocation35_spill] sm:$0xff] %v7151_v21  ;;  %v7221_v8 = vsub.f32 %v7110_v49, %v2584_v63  ;;  %v7224_v7 = vsub.f32 %v7113_v16, %v2585_v19  ;;  %v7227_v13 = vsub.f32 %v7116_v32, %v2586_v59 }
 0x23e   : > { %v2526_v29 = vld [vmem:[%s3320_s4 + $0xf38] sm:$0xff]  ;;  %v2527_v20 = vld [vmem:[%s3320_s4 + $0xf40] sm:$0xff]  ;;  %v2588_v53 = vld [vmem:[%s3326_s3 + $0xf28] sm:$0xff]  ;;  %8128 = vst [vmem:[#allocation26_spill] sm:$0xff] %v7154_v50  ;;  %v7230_v40 = vsub.f32 %v7119_v12, %v2587_v58 }
 0x23f   : > { %v2589_v39 = vld [vmem:[%s3326_s3 + $0xf30] sm:$0xff]  ;;  %v2590_v23 = vld [vmem:[%s3326_s3 + $0xf38] sm:$0xff]  ;;  %v2528_v35 = vld [vmem:[%s3320_s4 + $0xf48] sm:$0xff]  ;;  %8129 = vst [vmem:[#allocation27_spill] sm:$0xff] %v7164_v25  ;;  %v7239_v16 = vsub.f32 %v2524_v37, %v2588_v53 }
 0x240   : > { %v2529_v42 = vld [vmem:[%s3320_s4 + $0xf50] sm:$0xff]  ;;  %v2530_v52 = vld [vmem:[%s3320_s4 + $0xf58] sm:$0xff]  ;;  %v2531_v48 = vld [vmem:[%s3320_s4 + $0xf60] sm:$0xff]  ;;  %8130 = vst [vmem:[#allocation11_spill] sm:$0xff] %v7170_v11  ;;  %v7241_v32 = vsub.f32 %v2525_v54, %v2589_v39  ;;  %v7243_v19 = vsub.f32 %v2526_v29, %v2590_v23 }
 0x241   : > { %v2591_v45 = vld [vmem:[%s3326_s3 + $0xf40] sm:$0xff]  ;;  %v2592_v1 = vld [vmem:[%s3326_s3 + $0xf48] sm:$0xff]  ;;  %v2593_v41 = vld [vmem:[%s3326_s3 + $0xf50] sm:$0xff]  ;;  %8131 = vst [vmem:[#allocation12_spill] sm:$0xff] %v7173_v38 }
 0x242   : > { %v2532_v9 = vld [vmem:[%s3320_s4 + $0xf68] sm:$0xff]  ;;  %v2533_v56 = vld [vmem:[%s3320_s4 + $0xf70] sm:$0xff]  ;;  %v2534_v50 = vld [vmem:[%s3320_s4 + $0xf78] sm:$0xff]  ;;  %8132 = vst [vmem:[#allocation29_spill] sm:$0xff] %v7183_v47  ;;  %v7245_v12 = vsub.f32 %v2527_v20, %v2591_v45  ;;  %v7255_v37 = vsub.f32 %v2529_v42, %v2593_v41 }
 0x243   : > { %v2535_v10 = vld [vmem:[%s3320_s4 + $0xf80] sm:$0xff]  ;;  %v2594_v60 = vld [vmem:[%s3326_s3 + $0xf58] sm:$0xff]  ;;  %v2596_v21 = vld [vmem:[%s3326_s3 + $0xf68] sm:$0xff]  ;;  %8133 = vst [vmem:[#allocation28_spill] sm:$0xff] %v7186_v3  ;;  %v7253_v3 = vsub.f32 %v2528_v35, %v2592_v1 }
 0x244   : > { %v2595_v25 = vld [vmem:[%s3326_s3 + $0xf60] sm:$0xff]  ;;  %8134 = vst [vmem:[#allocation15_spill] sm:$0xff] %v7189_v4  ;;  %8135 = vst [vmem:[#allocation16_spill] sm:$0xff] %v7192_v33  ;;  %v2536_v27 = vld [vmem:[%s3320_s4 + $0xf88] sm:$0xff]  ;;  %v7257_v53 = vsub.f32 %v2530_v52, %v2594_v60  ;;  %v7264_v20 = vsub.f32 %v2532_v9, %v2596_v21 }
 0x245   : > { %v2537_v55 = vld [vmem:[%s3320_s4 + $0xf90] sm:$0xff]  ;;  %v2538_v38 = vld [vmem:[%s3320_s4 + $0xf98] sm:$0xff]  ;;  %v2539_v22 = vld [vmem:[%s3320_s4 + $0xfa0] sm:$0xff]  ;;  %8136 = vst [vmem:[#allocation17_spill] sm:$0xff] %v7202_v57  ;;  %v7259_v54 = vsub.f32 %v2531_v48, %v2595_v25 }
 0x246   : > { %v2597_v5 = vld [vmem:[%s3326_s3 + $0xf70] sm:$0xff]  ;;  %v2598_v47 = vld [vmem:[%s3326_s3 + $0xf78] sm:$0xff]  ;;  %v2599_v11 = vld [vmem:[%s3326_s3 + $0xf80] sm:$0xff]  ;;  %8137 = vst [vmem:[#allocation23_spill] sm:$0xff] %v7205_v28 }
 0x247   : > { %8138 = vst [vmem:[#allocation34_spill] sm:$0xff] %v7208_v18  ;;  %8139 = vst [vmem:[#allocation36_spill] sm:$0xff] %v7211_v61  ;;  %v2540_v14 = vld [vmem:[%s3320_s4 + $0xfa8] sm:$0xff]  ;;  %v2541_v17 = vld [vmem:[%s3320_s4 + $0xfb0] sm:$0xff]  ;;  %v7266_v45 = vsub.f32 %v2533_v56, %v2597_v5  ;;  %v7323_v5 = vmul.f32 %v7051_v34, %v7051_v34 }
 0x248   : > { %v2542_v33 = vld [vmem:[%s3320_s4 + $0xfb8] sm:$0xff]  ;;  %v2543_v31 = vld [vmem:[%s3320_s4 + $0xfc0] sm:$0xff]  ;;  %v2600_v43 = vld [vmem:[%s3326_s3 + $0xf88] sm:$0xff]  ;;  %8140 = vst [vmem:[#allocation37_spill] sm:$0xff] %v7221_v8 }
 0x249   : > { %v2601_v57 = vld [vmem:[%s3326_s3 + $0xf90] sm:$0xff]  ;;  %v2602_v4 = vld [vmem:[%s3326_s3 + $0xf98] sm:$0xff]  ;;  %8141 = vst [vmem:[#allocation38_spill] sm:$0xff] %v7224_v7  ;;  %8142 = vst [vmem:[#allocation39_spill] sm:$0xff] %v7227_v13  ;;  %v7275_v41 = vsub.f32 %v2536_v27, %v2600_v43  ;;  %v7311_v27 = vmul.f32 %v7013_v46, %v7013_v46  ;;  %v7331_v46 = vmul.f32 %v7055_v51, %v7055_v51 }
 0x24a   : > { %8143 = vst [vmem:[#allocation40_spill] sm:$0xff] %v7230_v40  ;;  %v2544_v30 = vld [vmem:[%s3320_s4 + $0xfc8] sm:$0xff]  ;;  %v2545_v26 = vld [vmem:[%s3320_s4 + $0xfd0] sm:$0xff]  ;;  %v2546_v61 = vld [vmem:[%s3320_s4 + $0xfd8] sm:$0xff]  ;;  %v7277_v52 = vsub.f32 %v2537_v55, %v2601_v57  ;;  %v7279_v42 = vsub.f32 %v2538_v38, %v2602_v4  ;;  %v7315_v55 = vmul.f32 %v7031_v15, %v7031_v15  ;;  %v7335_v15 = vmul.f32 %v7077_v6, %v7077_v6 }
 0x24b   : > { %v2547_v18 = vld [vmem:[%s3320_s4 + $0xfe0] sm:$0xff]  ;;  %v2604_v63 = vld [vmem:[%s3326_s3 + $0xfa8] sm:$0xff]  ;;  %v2605_v8 = vld [vmem:[%s3326_s3 + $0xfb0] sm:$0xff]  ;;  %8144 = vst [vmem:[#allocation14_spill] sm:$0xff] %v7241_v32  ;;  %v7363_v43 = vmul.f32 %v7129_v44, %v7129_v44 }
 0x24c   : > { %v2603_v49 = vld [vmem:[%s3326_s3 + $0xfa0] sm:$0xff]  ;;  %8145 = vst [vmem:[#allocation13_spill] sm:$0xff] %v7243_v19  ;;  %8146 = vst [vmem:[#allocation42_spill] sm:$0xff] %v7245_v12  ;;  %v2548_v59 = vld [vmem:[%s3320_s4 + $0xfe8] sm:$0xff]  ;;  %v7268_v12 = vsub.f32 %v2534_v50, %v2598_v47  ;;  %v7270_v19 = vsub.f32 %v2535_v10, %v2599_v11  ;;  %v7283_v25 = vsub.f32 %v2540_v14, %v2604_v63 }
 0x24d   : > { %v2549_v58 = vld [vmem:[%s3320_s4 + $0xff0] sm:$0xff]  ;;  %v2550_v40 = vld [vmem:[%s3320_s4 + $0xff8] sm:$0xff]  ;;  %v2607_v7 = vld [vmem:[%s3326_s3 + $0xfc0] sm:$0xff]  ;;  %v7281_v48 = vsub.f32 %v2539_v22, %v2603_v49  ;;  %v7285_v21 = vsub.f32 %v2541_v17, %v2605_v8  ;;  %v7319_v22 = vmul.f32 %v7049_v62, %v7049_v62  ;;  %v7379_v49 = vmul.f32 %v7148_v2, %v7148_v2 }
 0x24e   : > { %v2606_v13 = vld [vmem:[%s3326_s3 + $0xfb8] sm:$0xff]  ;;  %v2608_v28 = vld [vmem:[%s3326_s3 + $0xfc8] sm:$0xff]  ;;  %v2609_v23 = vld [vmem:[%s3326_s3 + $0xfd0] sm:$0xff]  ;;  %v7289_v50 = vsub.f32 %v2543_v31, %v2607_v7 }
 0x24f   : > { %v2610_v29 = vld [vmem:[%s3326_s3 + $0xfd8] sm:$0xff]  ;;  %v2611_v39 = vld [vmem:[%s3326_s3 + $0xfe0] sm:$0xff]  ;;  %v2612_v32 = vld [vmem:[%s3326_s3 + $0xfe8] sm:$0xff]  ;;  %v7287_v9 = vsub.f32 %v2542_v33, %v2606_v13  ;;  %v7291_v11 = vsub.f32 %v2544_v30, %v2608_v28  ;;  %v7293_v56 = vsub.f32 %v2545_v26, %v2609_v23  ;;  %v7307_v33 = vmul.f32 %v7011_v24, %v7011_v24 }
 0x250   : > { %v2613_v1 = vld [vmem:[%s3326_s3 + $0xff0] sm:$0xff]  ;;  %v2614_v35 = vld [vmem:[%s3326_s3 + $0xff8] sm:$0xff]  ;;  %v7295_v10 = vsub.f32 %v2546_v61, %v2610_v29  ;;  %v7297_v60 = vsub.f32 %v2547_v18, %v2611_v39  ;;  %v7299_v38 = vsub.f32 %v2548_v59, %v2612_v32  ;;  %v7327_v24 = vmul.f32 %v7053_v0, %v7053_v0  ;;  %v8147_v57 = vld [vmem:[#allocation22_spill] sm:$0xff] }
 0x251   : > { %v7301_v47 = vsub.f32 %v2549_v58, %v2613_v1  ;;  %v7303_v4 = vsub.f32 %v2550_v40, %v2614_v35  ;;  %v7339_v62 = vmul.f32 %v8147_v57, %v8147_v57  ;;  %v8148_v28 = vld [vmem:[#allocation24_spill] sm:$0xff]  ;;  %v8149_v18 = vld [vmem:[#allocation25_spill] sm:$0xff]  ;;  %v8151_v14 = vld [vmem:[#allocation30_spill] sm:$0xff]  ;;  %v7395_v29 = vmul.f32 %v7167_v36, %v7167_v36 }
 0x252   : > { %v7343_v34 = vmul.f32 %v8148_v28, %v8148_v28  ;;  %v7347_v0 = vmul.f32 %v8149_v18, %v8149_v18  ;;  %v8150_v61 = vld [vmem:[#allocation41_spill] sm:$0xff]  ;;  %v7355_v6 = vmul.f32 %v8151_v14, %v8151_v14  ;;  %v8152_v17 = vld [vmem:[#allocation31_spill] sm:$0xff]  ;;  %v8153_v8 = vld [vmem:[#allocation32_spill] sm:$0xff] }
 0x253   : > { %v7351_v51 = vmul.f32 %v8150_v61, %v8150_v61  ;;  %v7359_v31 = vmul.f32 %v8152_v17, %v8152_v17  ;;  %v7367_v7 = vmul.f32 %v8153_v8, %v8153_v8  ;;  %v8154_v13 = vld [vmem:[#allocation33_spill] sm:$0xff]  ;;  %v8155_v30 = vld [vmem:[#allocation18_spill] sm:$0xff]  ;;  %v8156_v63 = vld [vmem:[#allocation35_spill] sm:$0xff]  ;;  %8159 = vst [vmem:[#allocation22_spill] sm:$0xff] %v7395_v29 }
 0x254   : > { %v7371_v40 = vmul.f32 %v8154_v13, %v8154_v13  ;;  %v7375_v26 = vmul.f32 %v8155_v30, %v8155_v30  ;;  %v7383_v44 = vmul.f32 %v8156_v63, %v8156_v63  ;;  %v8157_v32 = vld [vmem:[#allocation26_spill] sm:$0xff]  ;;  %v8158_v58 = vld [vmem:[#allocation27_spill] sm:$0xff]  ;;  %v8162_v1 = vld [vmem:[#allocation12_spill] sm:$0xff] }
 0x255   : > { %v7387_v59 = vmul.f32 %v8157_v32, %v8157_v32  ;;  %v7391_v23 = vmul.f32 %v8158_v58, %v8158_v58  ;;  %v8160_v39 = vld [vmem:[#allocation11_spill] sm:$0xff]  ;;  %v7403_v35 = vmul.f32 %v8162_v1, %v8162_v1  ;;  %v8164_v57 = vld [vmem:[#allocation29_spill] sm:$0xff]  ;;  %v8166_v18 = vld [vmem:[#allocation28_spill] sm:$0xff] }
 0x256   : > { %v7399_v2 = vmul.f32 %v8160_v39, %v8160_v39  ;;  %v7407_v28 = vmul.f32 %v8164_v57, %v8164_v57  ;;  %v7411_v61 = vmul.f32 %v8166_v18, %v8166_v18  ;;  %v8168_v14 = vld [vmem:[#allocation15_spill] sm:$0xff]  ;;  %v8170_v17 = vld [vmem:[#allocation16_spill] sm:$0xff]  ;;  %v8172_v13 = vld [vmem:[#allocation17_spill] sm:$0xff] }
 0x257   : > { %8163 = vst [vmem:[#allocation25_spill] sm:$0xff] %v7403_v35  ;;  %v7415_v36 = vmul.f32 %v8168_v14, %v8168_v14  ;;  %v7419_v8 = vmul.f32 %v8170_v17, %v8170_v17  ;;  %v7423_v30 = vmul.f32 %v8172_v13, %v8172_v13  ;;  %v8174_v63 = vld [vmem:[#allocation23_spill] sm:$0xff]  ;;  %v8176_v58 = vld [vmem:[#allocation34_spill] sm:$0xff]  ;;  %v8178_v1 = vld [vmem:[#allocation36_spill] sm:$0xff] }
 0x258   : > { %8161 = vst [vmem:[#allocation24_spill] sm:$0xff] %v7399_v2  ;;  %8165 = vst [vmem:[#allocation41_spill] sm:$0xff] %v7407_v28  ;;  %v7427_v32 = vmul.f32 %v8174_v63, %v8174_v63  ;;  %v7431_v39 = vmul.f32 %v8176_v58, %v8176_v58  ;;  %v2711_v57 = vmul.f32 %v8178_v1, %v8178_v1  ;;  %v8179_v18 = vld [vmem:[#allocation37_spill] sm:$0xff]  ;;  %v8180_v17 = vld [vmem:[#allocation38_spill] sm:$0xff] }
 0x259   : > { %8167 = vst [vmem:[#allocation30_spill] sm:$0xff] %v7411_v61  ;;  %8169 = vst [vmem:[#allocation31_spill] sm:$0xff] %v7415_v36  ;;  %v2712_v14 = vmul.f32 %v8179_v18, %v8179_v18  ;;  %v8181_v36 = vld [vmem:[#allocation39_spill] sm:$0xff]  ;;  %v8183_v58 = vld [vmem:[#allocation14_spill] sm:$0xff] }
 0x25a   : > { %8171 = vst [vmem:[#allocation32_spill] sm:$0xff] %v7419_v8  ;;  %8173 = vst [vmem:[#allocation33_spill] sm:$0xff] %v7423_v30  ;;  %v2713_v8 = vmul.f32 %v8180_v17, %v8180_v17  ;;  %v2714_v13 = vmul.f32 %v8181_v36, %v8181_v36  ;;  %v8182_v30 = vld [vmem:[#allocation40_spill] sm:$0xff]  ;;  %v8184_v61 = vld [vmem:[#allocation13_spill] sm:$0xff]  ;;  %v2720_v17 = vmul.f32 %v7253_v3, %v7253_v3 }
 0x25b   : > { %8175 = vst [vmem:[#allocation18_spill] sm:$0xff] %v7427_v32  ;;  %8177 = vst [vmem:[#allocation35_spill] sm:$0xff] %v7431_v39  ;;  %v2715_v63 = vmul.f32 %v8182_v30, %v8182_v30  ;;  %v2716_v32 = vmul.f32 %v7239_v16, %v7239_v16  ;;  %v2717_v39 = vmul.f32 %v8183_v58, %v8183_v58  ;;  %v8185_v28 = vld [vmem:[#allocation42_spill] sm:$0xff] }
 0x25c   : > { %v2718_v1 = vmul.f32 %v8184_v61, %v8184_v61  ;;  %v2719_v18 = vmul.f32 %v8185_v28, %v8185_v28  ;;  %v2721_v36 = vmul.f32 %v7255_v37, %v7255_v37  ;;  %v2722_v30 = vmul.f32 %v7257_v53, %v7257_v53 }
 0x25d   : > { %v2723_v16 = vmul.f32 %v7259_v54, %v7259_v54  ;;  %v2724_v58 = vmul.f32 %v7264_v20, %v7264_v20  ;;  %v2725_v61 = vmul.f32 %v7266_v45, %v7266_v45  ;;  %v2726_v28 = vmul.f32 %v7268_v12, %v7268_v12 }
 0x25e   : > { %v2727_v3 = vmul.f32 %v7270_v19, %v7270_v19  ;;  %v2728_v37 = vmul.f32 %v7275_v41, %v7275_v41  ;;  %v2729_v53 = vmul.f32 %v7277_v52, %v7277_v52  ;;  %v2730_v54 = vmul.f32 %v7279_v42, %v7279_v42 }
 0x25f   : > { %v2731_v20 = vmul.f32 %v7281_v48, %v7281_v48  ;;  %v2732_v45 = vmul.f32 %v7283_v25, %v7283_v25  ;;  %v2733_v12 = vmul.f32 %v7285_v21, %v7285_v21  ;;  %v2734_v19 = vmul.f32 %v7287_v9, %v7287_v9 }
 0x260   : > { %v2735_v41 = vmul.f32 %v7289_v50, %v7289_v50  ;;  %v2736_v52 = vmul.f32 %v7291_v11, %v7291_v11  ;;  %v2737_v42 = vmul.f32 %v7293_v56, %v7293_v56  ;;  %v2738_v48 = vmul.f32 %v7295_v10, %v7295_v10 }
 0x261   : > { %v2739_v25 = vmul.f32 %v7297_v60, %v7297_v60  ;;  %v2740_v21 = vmul.f32 %v7299_v38, %v7299_v38  ;;  %v2741_v9 = vmul.f32 %v7301_v47, %v7301_v47  ;;  %v2742_v50 = vmul.f32 %v7303_v4, %v7303_v4 }
 0x262   : > { %v2743_v11 = vadd.f32 %v2711_v57, %v7307_v33  ;;  %v2744_v35 = vadd.f32 %v2712_v14, %v7311_v27  ;;  %v2745_v56 = vadd.f32 %v2713_v8, %v7315_v55  ;;  %v2746_v10 = vadd.f32 %v2714_v13, %v7319_v22  ;;  %v8186_v8 = vld [vmem:[#allocation22_spill] sm:$0xff]  ;;  %v8189_v57 = vld [vmem:[#allocation41_spill] sm:$0xff]  ;;  %v8191_v13 = vld [vmem:[#allocation31_spill] sm:$0xff] }
 0x263   : > { %v2747_v2 = vadd.f32 %v2715_v63, %v7323_v5  ;;  %v2748_v60 = vadd.f32 %v2716_v32, %v7327_v24  ;;  %v2749_v38 = vadd.f32 %v2717_v39, %v7331_v46  ;;  %v2750_v29 = vadd.f32 %v2718_v1, %v7335_v15  ;;  %v8187_v32 = vld [vmem:[#allocation24_spill] sm:$0xff]  ;;  %v8188_v39 = vld [vmem:[#allocation25_spill] sm:$0xff]  ;;  %v8190_v14 = vld [vmem:[#allocation30_spill] sm:$0xff] }
 0x264   : > { %v2751_v47 = vadd.f32 %v2719_v18, %v7339_v62  ;;  %v2752_v4 = vadd.f32 %v2720_v17, %v7343_v34  ;;  %v2753_v33 = vadd.f32 %v2721_v36, %v7347_v0  ;;  %v2754_v27 = vadd.f32 %v2722_v30, %v7351_v51  ;;  %v8192_v63 = vld [vmem:[#allocation32_spill] sm:$0xff]  ;;  %v8193_v1 = vld [vmem:[#allocation33_spill] sm:$0xff]  ;;  %v8194_v18 = vld [vmem:[#allocation18_spill] sm:$0xff] }
 0x265   : > { %v2755_v55 = vadd.f32 %v2723_v16, %v7355_v6  ;;  %v2756_v22 = vadd.f32 %v2724_v58, %v7359_v31  ;;  %v2757_v5 = vadd.f32 %v2725_v61, %v7363_v43  ;;  %v2758_v24 = vadd.f32 %v2726_v28, %v7367_v7  ;;  %v8195_v17 = vld [vmem:[#allocation35_spill] sm:$0xff] }
 0x266   : > { %v2759_v46 = vadd.f32 %v2727_v3, %v7371_v40  ;;  %v2760_v15 = vadd.f32 %v2728_v37, %v7375_v26  ;;  %v2761_v62 = vadd.f32 %v2729_v53, %v7379_v49  ;;  %v2762_v34 = vadd.f32 %v2730_v54, %v7383_v44 }
 0x267   : > { %v2763_v0 = vadd.f32 %v2731_v20, %v7387_v59  ;;  %v2764_v51 = vadd.f32 %v2732_v45, %v7391_v23  ;;  %v2765_v6 = vadd.f32 %v2733_v12, %v8186_v8  ;;  %v2766_v31 = vadd.f32 %v2734_v19, %v8187_v32 }
 0x268   : > { %v2767_v43 = vadd.f32 %v2735_v41, %v8188_v39  ;;  %v2768_v7 = vadd.f32 %v2736_v52, %v8189_v57  ;;  %v2769_v40 = vadd.f32 %v2737_v42, %v8190_v14  ;;  %v2770_v26 = vadd.f32 %v2738_v48, %v8191_v13 }
 0x269   : > { %v2771_v49 = vadd.f32 %v2739_v25, %v8192_v63  ;;  %v2772_v44 = vadd.f32 %v2740_v21, %v8193_v1  ;;  %v2773_v59 = vadd.f32 %v2741_v9, %v8194_v18  ;;  %v2774_v23 = vadd.f32 %v2742_v50, %v8195_v17  ;;  %v8197_v50 = vld [vmem:[#allocation21_spill] sm:$0xff] }
 0x26a   : > { %v2775_v36 = vadd.f32 %v2759_v46, %v2743_v11  ;;  %v2776_v30 = vadd.f32 %v2760_v15, %v2744_v35  ;;  %v2777_v16 = vadd.f32 %v2761_v62, %v2745_v56  ;;  %v2778_v58 = vadd.f32 %v2762_v34, %v2746_v10  ;;  %v8196_v35 = vld [vmem:[#allocation20_spill] sm:$0xff] }
 0x26b   : > { %v2779_v61 = vadd.f32 %v2763_v0, %v2747_v2  ;;  %v2780_v28 = vadd.f32 %v2764_v51, %v2748_v60  ;;  %v2781_v3 = vadd.f32 %v2765_v6, %v2749_v38  ;;  %v2782_v37 = vadd.f32 %v2766_v31, %v2750_v29 }
 0x26c   : > { %v2783_v53 = vadd.f32 %v2767_v43, %v2751_v47  ;;  %v2784_v54 = vadd.f32 %v2768_v7, %v2752_v4  ;;  %v2785_v20 = vadd.f32 %v2769_v40, %v2753_v33  ;;  %v2786_v45 = vadd.f32 %v2770_v26, %v2754_v27  ;;  %v8198_v4 = vld [vmem:[#allocation19_spill] sm:$0xff] }
 0x26d   : > { %v2787_v12 = vadd.f32 %v2771_v49, %v2755_v55  ;;  %v2788_v19 = vadd.f32 %v2772_v44, %v2756_v22  ;;  %v2789_v41 = vadd.f32 %v2773_v59, %v2757_v5  ;;  %v2790_v52 = vadd.f32 %v2774_v23, %v2758_v24  ;;  %v246_v5 = vld [vmem:[#allocation7] sm:$0xff] }
 0x26e   : > { %v2791_v42 = vadd.f32 %v2783_v53, %v2775_v36  ;;  %v2792_v48 = vadd.f32 %v2784_v54, %v2776_v30  ;;  %v2793_v25 = vadd.f32 %v2785_v20, %v2777_v16  ;;  %v2794_v21 = vadd.f32 %v2786_v45, %v2778_v58 }
 0x26f   : > { %v2795_v9 = vadd.f32 %v2787_v12, %v2779_v61  ;;  %v2485_v11 = vadd.f32 %v8197_v50, %v8196_v35  ;;  %v2796_v2 = vadd.f32 %v2788_v19, %v2780_v28  ;;  %v2797_v56 = vadd.f32 %v2789_v41, %v2781_v3 }
 0x270   : > { %v2798_v10 = vadd.f32 %v2790_v52, %v2782_v37 }
 0x271   : > { %v2799_v29 = vadd.f32 %v2795_v9, %v2791_v42  ;;  %v2800_v60 = vadd.f32 %v2796_v2, %v2792_v48  ;;  %v2801_v38 = vadd.f32 %v2797_v56, %v2793_v25  ;;  %v2486_v33 = vadd.f32 %v2485_v11, %v8198_v4 }
 0x272   : > { %v2802_v47 = vadd.f32 %v2798_v10, %v2794_v21 }
 0x273   : > { %v2803_v27 = vadd.f32 %v2801_v38, %v2799_v29 }
 0x274   : > { %v2804_v55 = vadd.f32 %v2802_v47, %v2800_v60 }
 0x276   : > { %v2805_v22 = vadd.f32 %v2804_v55, %v2803_v27  ;;  %2812 = sbr.rel (%p2922_p13) target bundleno = 647 (0x287), region = 44 }
 0x278   : > { %v2806_v24 = vadd.f32 %v2805_v22, %v2486_v33 }
 0x27a   : > { %v2807_v46 = vadd.f32 %v2806_v24, %v246_v5 }
 0x27c   : > { %2808 = vst [vmem:[#allocation7] sm:$0xff] %v2807_v46 }
 0x283   : > { %v2813_v15 = vld [vmem:[#allocation7] sm:$0xff] }
 0x284   : > { %v2814_v62 = vmul.f32 9.536743e-07, %v2813_v15 }
 0x286   : > { %2815 = vst [vmem:[#allocation7] sm:$0xff] %v2814_v62 }
 0x287 PF: > { %p7535_p6 = scmp.eq.s32.totalorder %s2909_s15, 1  ;;  %s3150_s29 = smov [#allocation7]  }
 0x288   : > { %s2825_s5 = sshll.u32 %s3150_s29, 4  ;;  %s2826_s5 = int_to_ptr.vmem [resolvable:$true] %s2825_s5 }
 0x289   : > { %s3059_s6 = scalar_lea.vmem %s2826_s5, 128  ;;  %p3066_p1 = scmp.lt.s32.totalorder %s2826_s5, %s2826_s5 }
 0x28a   : > { %p3060_p10 = scmp.ne.s32.totalorder %s2826_s5, %s3059_s6  ;;  %p3067_p5 = scmp.lt.s32.totalorder %s3059_s6, %s3059_s6 }
 0x28c   : > { %p3061_p3 = pnand %p3060_p10, %p7535_p6  ;;  %p3068_p7 = por %p3067_p5, %p3066_p1 }
 0x28e   : > { %p3062_p4 = pneg %p3061_p3 }
 0x290   : > { %p3069_p9 = pnand %p3068_p7, %p3062_p4 }
 0x292   : > { %3072 = shalt.err (!%p3069_p9)
}
 0x293   : > { %s3073_s15 = scalar_lea.hbm %s7581_s2, 128 }
 0x294   : > { %p3074_p12 = scmp.ne.s32.totalorder %s7581_s2, %s3073_s15  ;;  %p3079_p8 = scmp.lt.u32.totalorder %s3073_s15, %s7581_s2 }
 0x296   : > { %p3075_p0 = pnand %p3074_p12, %p7535_p6 }
 0x298   : > { %p3076_p2 = pneg %p3075_p0 }
 0x29a   : > { %p3081_p11 = pnand %p3079_p8, %p3076_p2 }
 0x29c   : > { %3084 = shalt.err (!%p3081_p11)
}
 0x29d   : > { %2934 = dma.vmem_to_hbm [thread:$0]  (%p7535_p6), %s2826_s5, 128, %s7581_s2, [#allocation4]  }
 0x29e   : > { %3118 = dma.done.wait (%p7535_p6), [#allocation4], 128  }
 0x29f   : > { %3120 = vsyncadd (%p7535_p6), [#allocation4], 4294967168 }
 0x2a0 PF: > { %s19_s14 = sadd.s32 1, %s3143_s14   ;;  %s8200_s9 = smov %s3127_s10 }
 0x2a1   : > { %p16_p13 = scmp.ge.s32.totalorder %s19_s14, 4   ;;  %s8201_s10 = smov %s3131_s11 }
 0x2a2   : > { %s8202_s11 = smov %s3222_s24  ;;  %s8203_s12 = smov %s3139_s13 }
 0x2a3   : > { %s8204_s13 = smov %s8206_s16  ;;  %18 = sbr.rel (!%p16_p13) target bundleno = 7 (0x7), region = 87 }
 0x2aa   :  { %2838 = vsyncpa [#allocation3], 1 }
 0x2ab   :  { %2840 = vsyncpa [#allocation3 + $0x1], 1 }
 0x2ac   :  { %2841 = vsyncpa [#allocation6], 1 }
 0x2ad   :  { %2843 = vsyncpa [#allocation6 + $0x1], 1 }
 0x2ae   :  { %2844 = vsyncpa [#allocation4], 1 }
 0x2af   :  { %2846 = vsyncpa [#allocation4 + $0x1], 1 }

</bundles_post_ra>
